<compile_context>
chip_gen: v6e
topology: v6e:2x2x1
jax: 0.10.0
libtpu: 0.0.40
codegen_flags: <defaults>
</compile_context>

<pallas_src>
import functools

import jax
import jax.numpy as jnp
from jax import lax
from jax.experimental import pallas as pl
from jax.experimental.pallas import tpu as pltpu

EPS = 1e-5

# GEMM tile sizes (clamped per call to the padded problem size).
TM, TN, TK = 512, 512, 512
# Row tile for the BatchNorm apply kernel.
TM_BN = 512
# MXU-native operand dtype; accumulation stays float32.
GEMM_IN_DTYPE = jnp.bfloat16
# 512-tile footprint (double-buffered bf16 inputs + resident f32 output) is only
# a few MiB; cap explicitly so tile sweeps stay honest on v7x (64 MiB physical)
# and v5e (16 MiB default scoped VMEM).
VMEM_LIMIT_BYTES = 32 * 1024 * 1024


def _round_up(x, m):
    return ((x + m - 1) // m) * m


# ----------------------------- Pallas kernels ------------------------------
def _gemm_bnstats_kernel(a_ref, b_ref, o_ref, stats_ref, *, m_valid, tm):
    """One (tm, tn) tile of A @ B (bf16 in, f32 accumulate) with a fused
    BatchNorm-statistics epilogue on the resident f32 accumulator.

    Grid = (M tiles, N tiles, K tiles), K innermost.  stats block (8, tn):
    row 0 = per-channel sum, row 1 = per-channel sum of squares (rows 2..7 pad).
    """
    k = pl.program_id(2)

    part = jnp.dot(a_ref[...], b_ref[...], preferred_element_type=jnp.float32)

    @pl.when(k == 0)
    def _():                    # first K step: plain store (no zero-init + add)
        o_ref[...] = part

    @pl.when(k > 0)
    def _():
        o_ref[...] += part

    @pl.when(k == pl.num_programs(2) - 1)
    def _():                    # epilogue: stats from the f32 accumulator
        y = o_ref[...]
        if m_valid is not None:     # mask padded rows out of the statistics
            rows = pl.program_id(0) * tm + lax.broadcasted_iota(jnp.int32, y.shape, 0)
            y = jnp.where(rows < m_valid, y, 0.0)
        stats_ref[...] = jnp.zeros_like(stats_ref)
        stats_ref[0:1, :] = jnp.sum(y, axis=0, keepdims=True)
        stats_ref[1:2, :] = jnp.sum(y * y, axis=0, keepdims=True)


def _bn_apply_kernel(y_ref, scale_ref, shift_ref, o_ref, *, relu):
    out = y_ref[...] * scale_ref[...] + shift_ref[...]
    if relu:
        out = jnp.maximum(out, 0.0)
    o_ref[...] = out.astype(o_ref.dtype)


# ----------------------------- Pallas wrappers ------------------------------
def conv_gemm_with_stats(A, B):
    """C = A @ B on the MXU with per-channel sum / sumsq fused into the last-K
    epilogue.  A: (M, K) bf16, B: (K, Cout) bf16.

    Returns (C_padded (Mp, Np) f32, ssum (Np,), ssq (Np,), Np).  Padded columns
    of C are exact zeros (zero-padded B, no bias).
    """
    M, K = A.shape
    K2, Cout = B.shape
    assert K == K2
    tm = min(TM, _round_up(M, 16))      # bf16 sublane packing -> multiple of 16
    tn = min(TN, _round_up(Cout, 128))
    tk = min(TK, _round_up(K, 128))
    Mp, Kp, Np = _round_up(M, tm), _round_up(K, tk), _round_up(Cout, tn)
    Ap = jnp.pad(A, ((0, Mp - M), (0, Kp - K)))          # already bf16
    Bp = jnp.pad(B, ((0, Kp - K), (0, Np - Cout)))
    mtiles = Mp // tm

    Cpad, stats = pl.pallas_call(
        functools.partial(_gemm_bnstats_kernel,
                          m_valid=None if M == Mp else M, tm=tm),
        out_shape=(jax.ShapeDtypeStruct((Mp, Np), jnp.float32),
                   jax.ShapeDtypeStruct((mtiles * 8, Np), jnp.float32)),
        grid_spec=pltpu.PrefetchScalarGridSpec(
            num_scalar_prefetch=0,
            grid=(mtiles, Np // tn, Kp // tk),
            in_specs=[pl.BlockSpec((tm, tk), lambda i, j, k: (i, k)),
                      pl.BlockSpec((tk, tn), lambda i, j, k: (k, j))],
            out_specs=(pl.BlockSpec((tm, tn), lambda i, j, k: (i, j)),
                       pl.BlockSpec((8, tn), lambda i, j, k: (i, j))),
        ),
        compiler_params=pltpu.CompilerParams(
            dimension_semantics=("parallel", "parallel", "arbitrary"),
            vmem_limit_bytes=VMEM_LIMIT_BYTES),
    )(Ap, Bp)

    # Tiny (mtiles, Np) reduction of the per-M-tile partial stats in XLA.
    stats = stats.reshape(mtiles, 8, Np)
    ssum = stats[:, 0, :].sum(axis=0)
    ssq = stats[:, 1, :].sum(axis=0)
    return Cpad, ssum, ssq, Np


def bn_scale_shift(ssum, ssq, gamma, beta, m_valid, Cp):
    """Training-mode BatchNorm scale/shift from fused per-channel sum / sumsq."""
    c = gamma.shape[0]
    g = jnp.pad(gamma.astype(jnp.float32), (0, Cp - c))
    b = jnp.pad(beta.astype(jnp.float32), (0, Cp - c))
    inv_m = 1.0 / float(m_valid)
    mean = ssum * inv_m
    var = jnp.maximum(ssq * inv_m - mean * mean, 0.0)   # biased, like torch train BN
    scale = g * lax.rsqrt(var + EPS)
    shift = b - mean * scale
    return scale.reshape(1, Cp), shift.reshape(1, Cp)


def pallas_bn_apply(Y, scale, shift, *, relu, out_dtype):
    """Tiled y*scale + shift (+ fused ReLU) with fused output-dtype cast."""
    Mp, Cp = Y.shape
    tm = min(TM_BN, Mp)
    assert Mp % tm == 0
    return pl.pallas_call(
        functools.partial(_bn_apply_kernel, relu=relu),
        out_shape=jax.ShapeDtypeStruct((Mp, Cp), out_dtype),
        grid_spec=pltpu.PrefetchScalarGridSpec(
            num_scalar_prefetch=0,
            grid=(Mp // tm,),
            in_specs=[pl.BlockSpec((tm, Cp), lambda i: (i, 0)),
                      pl.BlockSpec((1, Cp), lambda i: (0, 0)),
                      pl.BlockSpec((1, Cp), lambda i: (0, 0))],
            out_specs=pl.BlockSpec((tm, Cp), lambda i: (i, 0)),
        ),
        compiler_params=pltpu.CompilerParams(
            dimension_semantics=("parallel",),
            vmem_limit_bytes=VMEM_LIMIT_BYTES),
    )(Y, scale, shift)


# ------------------------------- JAX glue -----------------------------------
def _out_size(s, k, stride, pad):
    return (s + 2 * pad - k) // stride + 1


def im2col_3d_cl(x_cl, k, stride, pad):
    """Channel-last im2col: (N, D, H, W, C) bf16 -> (N*Do*Ho*Wo, k^3*C),
    K ordered tap-major / channel-fastest (matches conv_weight_matrix)."""
    # TODO(synk): build these K-panels in-kernel from the NDHWC HBM ref
    # (memory_space=pl.ANY + per-tap double-buffered make_async_copy) instead of
    # materializing the k^3-expanded matrix -- the remaining A-side HBM lever.
    N, D, H, W, C = x_cl.shape
    Do = _out_size(D, k, stride, pad)
    Ho = _out_size(H, k, stride, pad)
    Wo = _out_size(W, k, stride, pad)
    xp = jnp.pad(x_cl, ((0, 0), (pad, pad), (pad, pad), (pad, pad), (0, 0)))
    cols = []
    for kd in range(k):
        for kh in range(k):
            for kw in range(k):
                cols.append(xp[:,
                               kd:kd + stride * Do:stride,
                               kh:kh + stride * Ho:stride,
                               kw:kw + stride * Wo:stride, :])
    patches = jnp.stack(cols, axis=4)                     # (N,Do,Ho,Wo,k^3,C)
    return patches.reshape(N * Do * Ho * Wo, k ** 3 * C), (N, Do, Ho, Wo)


def conv_weight_matrix(w):
    """torch (Cout, Cin, kD, kH, kW) -> (k^3*Cin, Cout) bf16, tap-major /
    Cin-fastest, matching im2col_3d_cl's K ordering."""
    Cout, Cin, kD, kH, kW = w.shape
    return (w.transpose(2, 3, 4, 1, 0)
             .reshape(kD * kH * kW * Cin, Cout)
             .astype(GEMM_IN_DTYPE))


def residual_branch3d(x, params, *, filter_size, stride):
    """Sequential(ReLU, Conv3d(s), BN, ReLU, Conv3d(1), BN) on NCDHW f32 input."""
    pad = round(filter_size / 3)           # round_(filter_size) of the torch module
    k = filter_size
    Cout = params["w1"].shape[0]

    # Leading ReLU + NCDHW->NDHWC relayout + bf16 cast: one fused XLA pass over
    # the un-expanded input; activations stay channel-last until the branch output.
    x_cl = jnp.maximum(x, 0.0).transpose(0, 2, 3, 4, 1).astype(GEMM_IN_DTYPE)

    # ---- conv1 (stride s): GEMM + fused BN1 stats, then BN1 apply + ReLU ----
    A1, (n, d1, h1, w1) = im2col_3d_cl(x_cl, k, stride, pad)
    Y1, ssum1, ssq1, Cp1 = conv_gemm_with_stats(A1, conv_weight_matrix(params["w1"]))
    s1, b1 = bn_scale_shift(ssum1, ssq1, params["g1"], params["b1"], A1.shape[0], Cp1)
    Z1 = pallas_bn_apply(Y1, s1, b1, relu=True, out_dtype=GEMM_IN_DTYPE)  # bf16, channel-last
    z1_cl = Z1[:A1.shape[0], :Cout].reshape(n, d1, h1, w1, Cout)

    # ---- conv2 (stride 1): GEMM + fused BN2 stats ----
    A2, (_, d2, h2, w2) = im2col_3d_cl(z1_cl, k, 1, pad)
    Y2, ssum2, ssq2, Cp2 = conv_gemm_with_stats(A2, conv_weight_matrix(params["w2"]))
    s2, b2 = bn_scale_shift(ssum2, ssq2, params["g2"], params["b2"], A2.shape[0], Cp2)

    # Final BN2 apply is a per-channel affine; fuse it (in XLA) into the single
    # output slice/reshape/transpose back to NCDHW instead of a standalone pass.
    # TODO(synk): for narrow Cout, a transposed GEMM (W @ A^T) would also fill the
    # 256-wide v6e/v7x MXU columns with the spatial dim.
    y2 = Y2[:A2.shape[0], :Cout] * s2[:, :Cout] + b2[:, :Cout]
    return y2.reshape(n, d2, h2, w2, Cout).transpose(0, 4, 1, 2, 3)


# ------------------------ reference & deterministic params ------------------
def _reference_branch(x, params, *, filter_size, stride):
    """Pure-JAX f32 reference of the torch module (training-mode BN)."""
    pad = round(filter_size / 3)

    def conv_bn(y, w, g, b, s):
        y = lax.conv_general_dilated(
            y, w, window_strides=(s, s, s), padding=[(pad, pad)] * 3,
            dimension_numbers=("NCDHW", "OIDHW", "NCDHW"))
        mean = y.mean(axis=(0, 2, 3, 4), keepdims=True)
        var = y.var(axis=(0, 2, 3, 4), keepdims=True)     # biased, like torch train BN
        return ((y - mean) * lax.rsqrt(var + EPS) * g.reshape(1, -1, 1, 1, 1)
                + b.reshape(1, -1, 1, 1, 1))

    y = conv_bn(jnp.maximum(x, 0.0), params["w1"], params["g1"], params["b1"], stride)
    y = conv_bn(jnp.maximum(y, 0.0), params["w2"], params["g2"], params["b2"], 1)
    return y


def init_params(key, in_channels, out_channels, filter_size):
    k1, k2 = jax.random.split(key)

    def conv_w(kk, cout, cin):
        return jax.random.normal(
            kk, (cout, cin, filter_size, filter_size, filter_size), jnp.float32) * 0.05

    ones = jnp.ones((out_channels,), jnp.float32)    # torch BN defaults: gamma=1
    zeros = jnp.zeros((out_channels,), jnp.float32)  # beta=0
    return {"w1": conv_w(k1, out_channels, in_channels), "g1": ones, "b1": zeros,
            "w2": conv_w(k2, out_channels, out_channels), "g2": ones, "b2": zeros}


if __name__ == "__main__":
    key = jax.random.PRNGKey(0)
    kx, kp = jax.random.split(key)

    in_channels, out_channels, filter_size, stride = 4, 16, 3, 2
    x = jax.random.normal(kx, (2, in_channels, 16, 16, 16), jnp.float32)  # NCDHW
    params = init_params(kp, in_channels, out_channels, filter_size)

    fwd = jax.jit(functools.partial(residual_branch3d,
                                    filter_size=filter_size, stride=stride))
    out = jax.block_until_ready(fwd(x, params))

    # 16 -> conv(k=3, s=2, p=1) -> 8 -> conv(k=3, s=1, p=1) -> 8
    assert out.shape == (2, out_channels, 8, 8, 8), out.shape
    assert bool(jnp.all(jnp.isfinite(out)))

    # Explicit tolerance check vs a pure-JAX f32 reference (bf16 MXU operands ->
    # ~1e-2 absolute error on the unit-variance BN output).
    ref = _reference_branch(x, params, filter_size=filter_size, stride=stride)
    max_err = float(jnp.max(jnp.abs(out - ref)))
    assert max_err < 1e-1, f"max abs error vs reference: {max_err}"
    print("KERNEL_OK")
</pallas_src>

<mosaic_0001>
module attributes {stable_mosaic.version = 11 : i64} {
  func.func @_bn_apply_kernel(%arg0: i32, %arg1: memref<512x128xf32, #tpu.memory_space<vmem>>, %arg2: memref<1x128xf32, #tpu.memory_space<vmem>>, %arg3: memref<1x128xf32, #tpu.memory_space<vmem>>, %arg4: memref<512x128xbf16, #tpu.memory_space<vmem>>) attributes {dimension_semantics = [#tpu.dimension_semantics<parallel>], iteration_bounds = array<i64: 2>, scalar_prefetch = 0 : i64, scratch_operands = 0 : i64, tpu.core_type = #tpu.core_type<tc>, window_params = [{transform_indices = @transform_0, window_bounds = array<i64: 512, 128>}, {pipeline_mode = #tpu.pipeline_mode<synchronous>, transform_indices = @transform_1, window_bounds = array<i64: 1, 128>}, {pipeline_mode = #tpu.pipeline_mode<synchronous>, transform_indices = @transform_2, window_bounds = array<i64: 1, 128>}, {transform_indices = @transform_3, window_bounds = array<i64: 512, 128>}]} {
    %c0 = arith.constant 0 : index
    %c0_0 = arith.constant 0 : index
    %0 = vector.load %arg1[%c0, %c0_0] : memref<512x128xf32, #tpu.memory_space<vmem>>, vector<512x128xf32>
    %c0_1 = arith.constant 0 : index
    %c0_2 = arith.constant 0 : index
    %1 = vector.load %arg2[%c0_1, %c0_2] : memref<1x128xf32, #tpu.memory_space<vmem>>, vector<1x128xf32>
    %2 = vector.broadcast %1 : vector<1x128xf32> to vector<512x128xf32>
    %3 = arith.mulf %0, %2 : vector<512x128xf32>
    %c0_3 = arith.constant 0 : index
    %c0_4 = arith.constant 0 : index
    %4 = vector.load %arg3[%c0_3, %c0_4] : memref<1x128xf32, #tpu.memory_space<vmem>>, vector<1x128xf32>
    %5 = vector.broadcast %4 : vector<1x128xf32> to vector<512x128xf32>
    %6 = arith.addf %3, %5 : vector<512x128xf32>
    %cst = arith.constant 0.000000e+00 : f32
    %7 = vector.broadcast %cst : f32 to vector<512x128xf32>
    %8 = arith.maximumf %6, %7 : vector<512x128xf32>
    %9 = arith.truncf %8 : vector<512x128xf32> to vector<512x128xbf16>
    %c0_5 = arith.constant 0 : index
    %c0_6 = arith.constant 0 : index
    %10 = vector.load %arg4[%c0_5, %c0_6] : memref<512x128xbf16, #tpu.memory_space<vmem>>, vector<512x128xbf16>
    tpu.vector_store %arg4[%c0_5, %c0_6], %9 {strides = array<i32>} : memref<512x128xbf16, #tpu.memory_space<vmem>>, vector<512x128xbf16>,
    return
  }
  func.func @transform_0(%arg0: i32) -> (i32, i32) {
    %c0_i32 = arith.constant 0 : i32
    %c0_i32_0 = arith.constant 0 : i32
    return %arg0, %c0_i32 : i32, i32
  }
  func.func @transform_1(%arg0: i32) -> (i32, i32) {
    %c0_i32 = arith.constant 0 : i32
    %c0_i32_0 = arith.constant 0 : i32
    %c0_i32_1 = arith.constant 0 : i32
    return %c0_i32, %c0_i32_0 : i32, i32
  }
  func.func @transform_2(%arg0: i32) -> (i32, i32) {
    %c0_i32 = arith.constant 0 : i32
    %c0_i32_0 = arith.constant 0 : i32
    %c0_i32_1 = arith.constant 0 : i32
    return %c0_i32, %c0_i32_0 : i32, i32
  }
  func.func @transform_3(%arg0: i32) -> (i32, i32) {
    %c0_i32 = arith.constant 0 : i32
    %c0_i32_0 = arith.constant 0 : i32
    return %arg0, %c0_i32 : i32, i32
  }
}

module attributes {stable_mosaic.version = 11 : i64} {
  func.func @_gemm_bnstats_kernel(%arg0: i32, %arg1: i32, %arg2: i32, %arg3: memref<512x128xbf16, #tpu.memory_space<vmem>>, %arg4: memref<128x128xbf16, #tpu.memory_space<vmem>>, %arg5: memref<512x128xf32, #tpu.memory_space<vmem>>, %arg6: memref<8x128xf32, #tpu.memory_space<vmem>>) attributes {dimension_semantics = [#tpu.dimension_semantics<parallel>, #tpu.dimension_semantics<parallel>, #tpu.dimension_semantics<arbitrary>], iteration_bounds = array<i64: 2, 1, 1>, scalar_prefetch = 0 : i64, scratch_operands = 0 : i64, tpu.core_type = #tpu.core_type<tc>, window_params = [{transform_indices = @transform_0, window_bounds = array<i64: 512, 128>}, {transform_indices = @transform_1, window_bounds = array<i64: 128, 128>}, {transform_indices = @transform_2, window_bounds = array<i64: 512, 128>}, {transform_indices = @transform_3, window_bounds = array<i64: 8, 128>}]} {
    %c0 = arith.constant 0 : index
    %c0_0 = arith.constant 0 : index
    %0 = vector.load %arg3[%c0, %c0_0] : memref<512x128xbf16, #tpu.memory_space<vmem>>, vector<512x128xbf16>
    %c0_1 = arith.constant 0 : index
    %c0_2 = arith.constant 0 : index
    %1 = vector.load %arg4[%c0_1, %c0_2] : memref<128x128xbf16, #tpu.memory_space<vmem>>, vector<128x128xbf16>
    %cst = arith.constant dense<0.000000e+00> : vector<512x128xf32>
    %2 = tpu.matmul %0, %1, %cst {dimension_numbers = #tpu.dot_dimension_numbers<[1], [0], [0], [1], [0, 0, 1, 1], [], []>} : vector<512x128xbf16>, vector<128x128xbf16>, vector<512x128xf32> -> vector<512x128xf32>
    %c0_i32 = arith.constant 0 : i32
    %3 = arith.cmpi eq, %arg2, %c0_i32 : i32
    %4 = arith.extui %3 : i1 to i32
    %c0_i32_3 = arith.constant 0 : i32
    %5 = arith.cmpi ne, %4, %c0_i32_3 : i32
    scf.if %5 {
      %c0_8 = arith.constant 0 : index
      %c0_9 = arith.constant 0 : index
      %12 = vector.load %arg5[%c0_8, %c0_9] : memref<512x128xf32, #tpu.memory_space<vmem>>, vector<512x128xf32>
      tpu.vector_store %arg5[%c0_8, %c0_9], %2 {strides = array<i32>} : memref<512x128xf32, #tpu.memory_space<vmem>>, vector<512x128xf32>,
    } else {
    }
    %c0_i32_4 = arith.constant 0 : i32
    %6 = arith.cmpi sgt, %arg2, %c0_i32_4 : i32
    %7 = arith.extui %6 : i1 to i32
    %c0_i32_5 = arith.constant 0 : i32
    %8 = arith.cmpi ne, %7, %c0_i32_5 : i32
    scf.if %8 {
      %c0_8 = arith.constant 0 : index
      %c0_9 = arith.constant 0 : index
      %12 = vector.load %arg5[%c0_8, %c0_9] : memref<512x128xf32, #tpu.memory_space<vmem>>, vector<512x128xf32>
      %13 = arith.addf %12, %2 : vector<512x128xf32>
      %c0_10 = arith.constant 0 : index
      %c0_11 = arith.constant 0 : index
      %14 = vector.load %arg5[%c0_10, %c0_11] : memref<512x128xf32, #tpu.memory_space<vmem>>, vector<512x128xf32>
      tpu.vector_store %arg5[%c0_10, %c0_11], %13 {strides = array<i32>} : memref<512x128xf32, #tpu.memory_space<vmem>>, vector<512x128xf32>,
    } else {
    }
    %c0_i32_6 = arith.constant 0 : i32
    %9 = arith.cmpi eq, %arg2, %c0_i32_6 : i32
    %10 = arith.extui %9 : i1 to i32
    %c0_i32_7 = arith.constant 0 : i32
    %11 = arith.cmpi ne, %10, %c0_i32_7 : i32
    scf.if %11 {
      %c0_8 = arith.constant 0 : index
      %c0_9 = arith.constant 0 : index
      %12 = vector.load %arg5[%c0_8, %c0_9] : memref<512x128xf32, #tpu.memory_space<vmem>>, vector<512x128xf32>
      %cst_10 = arith.constant 0.000000e+00 : f32
      %13 = vector.broadcast %cst_10 : f32 to vector<8x128xf32>
      %c0_11 = arith.constant 0 : index
      %c0_12 = arith.constant 0 : index
      %14 = vector.load %arg6[%c0_11, %c0_12] : memref<8x128xf32, #tpu.memory_space<vmem>>, vector<8x128xf32>
      tpu.vector_store %arg6[%c0_11, %c0_12], %13 {strides = array<i32>} : memref<8x128xf32, #tpu.memory_space<vmem>>, vector<8x128xf32>,
      %cst_13 = arith.constant dense<0.000000e+00> : vector<128xf32>
      %15 = vector.multi_reduction <add>, %12, %cst_13 [0] : vector<512x128xf32> to vector<128xf32>
      %16 = vector.shape_cast %15 : vector<128xf32> to vector<1x128xf32>
      %c0_14 = arith.constant 0 : index
      %c0_15 = arith.constant 0 : index
      %17 = vector.load %arg6[%c0_14, %c0_15] : memref<8x128xf32, #tpu.memory_space<vmem>>, vector<1x128xf32>
      tpu.vector_store %arg6[%c0_14, %c0_15], %16 {strides = array<i32>} : memref<8x128xf32, #tpu.memory_space<vmem>>, vector<1x128xf32>,
      %18 = arith.mulf %12, %12 : vector<512x128xf32>
      %cst_16 = arith.constant dense<0.000000e+00> : vector<128xf32>
      %19 = vector.multi_reduction <add>, %18, %cst_16 [0] : vector<512x128xf32> to vector<128xf32>
      %20 = vector.shape_cast %19 : vector<128xf32> to vector<1x128xf32>
      %c1 = arith.constant 1 : index
      %c0_17 = arith.constant 0 : index
      %21 = vector.load %arg6[%c1, %c0_17] : memref<8x128xf32, #tpu.memory_space<vmem>>, vector<1x128xf32>
      tpu.vector_store %arg6[%c1, %c0_17], %20 {strides = array<i32>} : memref<8x128xf32, #tpu.memory_space<vmem>>, vector<1x128xf32>,
    } else {
    }
    return
  }
  func.func @transform_0(%arg0: i32, %arg1: i32, %arg2: i32) -> (i32, i32) {
    %c0_i32 = arith.constant 0 : i32
    return %arg0, %arg2 : i32, i32
  }
  func.func @transform_1(%arg0: i32, %arg1: i32, %arg2: i32) -> (i32, i32) {
    %c0_i32 = arith.constant 0 : i32
    return %arg2, %arg1 : i32, i32
  }
  func.func @transform_2(%arg0: i32, %arg1: i32, %arg2: i32) -> (i32, i32) {
    %c0_i32 = arith.constant 0 : i32
    return %arg0, %arg1 : i32, i32
  }
  func.func @transform_3(%arg0: i32, %arg1: i32, %arg2: i32) -> (i32, i32) {
    %c0_i32 = arith.constant 0 : i32
    return %arg0, %arg1 : i32, i32
  }
}

module attributes {stable_mosaic.version = 11 : i64} {
  func.func @_gemm_bnstats_kernel(%arg0: i32, %arg1: i32, %arg2: i32, %arg3: memref<512x512xbf16, #tpu.memory_space<vmem>>, %arg4: memref<512x128xbf16, #tpu.memory_space<vmem>>, %arg5: memref<512x128xf32, #tpu.memory_space<vmem>>, %arg6: memref<8x128xf32, #tpu.memory_space<vmem>>) attributes {dimension_semantics = [#tpu.dimension_semantics<parallel>, #tpu.dimension_semantics<parallel>, #tpu.dimension_semantics<arbitrary>], iteration_bounds = array<i64: 2, 1, 1>, scalar_prefetch = 0 : i64, scratch_operands = 0 : i64, tpu.core_type = #tpu.core_type<tc>, window_params = [{transform_indices = @transform_0, window_bounds = array<i64: 512, 512>}, {transform_indices = @transform_1, window_bounds = array<i64: 512, 128>}, {transform_indices = @transform_2, window_bounds = array<i64: 512, 128>}, {transform_indices = @transform_3, window_bounds = array<i64: 8, 128>}]} {
    %c0 = arith.constant 0 : index
    %c0_0 = arith.constant 0 : index
    %0 = vector.load %arg3[%c0, %c0_0] : memref<512x512xbf16, #tpu.memory_space<vmem>>, vector<512x512xbf16>
    %c0_1 = arith.constant 0 : index
    %c0_2 = arith.constant 0 : index
    %1 = vector.load %arg4[%c0_1, %c0_2] : memref<512x128xbf16, #tpu.memory_space<vmem>>, vector<512x128xbf16>
    %cst = arith.constant dense<0.000000e+00> : vector<512x128xf32>
    %2 = tpu.matmul %0, %1, %cst {dimension_numbers = #tpu.dot_dimension_numbers<[1], [0], [0], [1], [0, 0, 1, 1], [], []>} : vector<512x512xbf16>, vector<512x128xbf16>, vector<512x128xf32> -> vector<512x128xf32>
    %c0_i32 = arith.constant 0 : i32
    %3 = arith.cmpi eq, %arg2, %c0_i32 : i32
    %4 = arith.extui %3 : i1 to i32
    %c0_i32_3 = arith.constant 0 : i32
    %5 = arith.cmpi ne, %4, %c0_i32_3 : i32
    scf.if %5 {
      %c0_8 = arith.constant 0 : index
      %c0_9 = arith.constant 0 : index
      %12 = vector.load %arg5[%c0_8, %c0_9] : memref<512x128xf32, #tpu.memory_space<vmem>>, vector<512x128xf32>
      tpu.vector_store %arg5[%c0_8, %c0_9], %2 {strides = array<i32>} : memref<512x128xf32, #tpu.memory_space<vmem>>, vector<512x128xf32>,
    } else {
    }
    %c0_i32_4 = arith.constant 0 : i32
    %6 = arith.cmpi sgt, %arg2, %c0_i32_4 : i32
    %7 = arith.extui %6 : i1 to i32
    %c0_i32_5 = arith.constant 0 : i32
    %8 = arith.cmpi ne, %7, %c0_i32_5 : i32
    scf.if %8 {
      %c0_8 = arith.constant 0 : index
      %c0_9 = arith.constant 0 : index
      %12 = vector.load %arg5[%c0_8, %c0_9] : memref<512x128xf32, #tpu.memory_space<vmem>>, vector<512x128xf32>
      %13 = arith.addf %12, %2 : vector<512x128xf32>
      %c0_10 = arith.constant 0 : index
      %c0_11 = arith.constant 0 : index
      %14 = vector.load %arg5[%c0_10, %c0_11] : memref<512x128xf32, #tpu.memory_space<vmem>>, vector<512x128xf32>
      tpu.vector_store %arg5[%c0_10, %c0_11], %13 {strides = array<i32>} : memref<512x128xf32, #tpu.memory_space<vmem>>, vector<512x128xf32>,
    } else {
    }
    %c0_i32_6 = arith.constant 0 : i32
    %9 = arith.cmpi eq, %arg2, %c0_i32_6 : i32
    %10 = arith.extui %9 : i1 to i32
    %c0_i32_7 = arith.constant 0 : i32
    %11 = arith.cmpi ne, %10, %c0_i32_7 : i32
    scf.if %11 {
      %c0_8 = arith.constant 0 : index
      %c0_9 = arith.constant 0 : index
      %12 = vector.load %arg5[%c0_8, %c0_9] : memref<512x128xf32, #tpu.memory_space<vmem>>, vector<512x128xf32>
      %cst_10 = arith.constant 0.000000e+00 : f32
      %13 = vector.broadcast %cst_10 : f32 to vector<8x128xf32>
      %c0_11 = arith.constant 0 : index
      %c0_12 = arith.constant 0 : index
      %14 = vector.load %arg6[%c0_11, %c0_12] : memref<8x128xf32, #tpu.memory_space<vmem>>, vector<8x128xf32>
      tpu.vector_store %arg6[%c0_11, %c0_12], %13 {strides = array<i32>} : memref<8x128xf32, #tpu.memory_space<vmem>>, vector<8x128xf32>,
      %cst_13 = arith.constant dense<0.000000e+00> : vector<128xf32>
      %15 = vector.multi_reduction <add>, %12, %cst_13 [0] : vector<512x128xf32> to vector<128xf32>
      %16 = vector.shape_cast %15 : vector<128xf32> to vector<1x128xf32>
      %c0_14 = arith.constant 0 : index
      %c0_15 = arith.constant 0 : index
      %17 = vector.load %arg6[%c0_14, %c0_15] : memref<8x128xf32, #tpu.memory_space<vmem>>, vector<1x128xf32>
      tpu.vector_store %arg6[%c0_14, %c0_15], %16 {strides = array<i32>} : memref<8x128xf32, #tpu.memory_space<vmem>>, vector<1x128xf32>,
      %18 = arith.mulf %12, %12 : vector<512x128xf32>
      %cst_16 = arith.constant dense<0.000000e+00> : vector<128xf32>
      %19 = vector.multi_reduction <add>, %18, %cst_16 [0] : vector<512x128xf32> to vector<128xf32>
      %20 = vector.shape_cast %19 : vector<128xf32> to vector<1x128xf32>
      %c1 = arith.constant 1 : index
      %c0_17 = arith.constant 0 : index
      %21 = vector.load %arg6[%c1, %c0_17] : memref<8x128xf32, #tpu.memory_space<vmem>>, vector<1x128xf32>
      tpu.vector_store %arg6[%c1, %c0_17], %20 {strides = array<i32>} : memref<8x128xf32, #tpu.memory_space<vmem>>, vector<1x128xf32>,
    } else {
    }
    return
  }
  func.func @transform_0(%arg0: i32, %arg1: i32, %arg2: i32) -> (i32, i32) {
    %c0_i32 = arith.constant 0 : i32
    return %arg0, %arg2 : i32, i32
  }
  func.func @transform_1(%arg0: i32, %arg1: i32, %arg2: i32) -> (i32, i32) {
    %c0_i32 = arith.constant 0 : i32
    return %arg2, %arg1 : i32, i32
  }
  func.func @transform_2(%arg0: i32, %arg1: i32, %arg2: i32) -> (i32, i32) {
    %c0_i32 = arith.constant 0 : i32
    return %arg0, %arg1 : i32, i32
  }
  func.func @transform_3(%arg0: i32, %arg1: i32, %arg2: i32) -> (i32, i32) {
    %c0_i32 = arith.constant 0 : i32
    return %arg0, %arg1 : i32, i32
  }
}

</mosaic_0001>

<bundles_post_ra>
// kernel: residual_branch3d.4
= control target key start
LH: loop header
LB: loop body
LE: loop exit
PB: predicated region body
PF: predicated region fallthrough
CT: control target
= control target key end

     0   :  { %s1188_s12 = smov 0   ;;  %s1447_s0 = inlined_call_operand.vmem [shape: f32[1024,128], index: 0, kind: input, shape index: {}]   ;;  %s1448_s1 = inlined_call_operand.vmem [shape: f32[1,128], index: 1, kind: input, shape index: {}]   ;;  %s1449_s2 = inlined_call_operand.vmem [shape: f32[1,128], index: 2, kind: input, shape index: {}]   ;;  %s1450_s3 = inlined_call_operand.vmem [shape: bf16[1024,128], index: 3, kind: output, shape index: {}]  }
   0x1 LB: > { %s820_s13 = sadd.s32 4294967295, %s1166_s12   ;;  %p824_p0 = scmp.ge.s32.totalorder %s1166_s12, 1  ;;  %s1166_s12 = sphi %s1188_s12, %s13_s12  }
   0x2   : > { %p138_p1 = scmp.lt.s32.totalorder %s1166_s12, 3 }
   0x4   : > { %p139_p2 = pnand %p824_p0, %p138_p1 }
   0x5   : > { %s825_s14 = sshll.u32 (!%p139_p2), %s820_s13, 6 }
   0x6   : > { %142 = sbr.rel (%p139_p2) target bundleno = 77 (0x4d), region = 32  ;;  %p163_p3 = scmp.lt.s32.totalorder (!%p139_p2), %s825_s14, 127 }
   0xb   : > { %s1452_s14 = smov (!%p163_p3, %s825_s14), 127  ;;  %v1202_v0 = vld [vmem:[%s1448_s1] ss:$0 sm:$0xff] }
   0xc   : > { %s826_s15 = sshll.u32 %s1452_s14, 3  ;;  %v1212_v1 = vld [vmem:[%s1449_s2] ss:$0 sm:$0xff]  ;;  %s828_s23 = sshll.u32 %s1452_s14, 2 }
   0xd   : > { %s1207_s20 = scalar_lea.vmem %s1447_s0, %s826_s15  ;;  %s1244_s26 = scalar_lea.vmem %s1450_s3, %s828_s23 }
   0xe   : > { %v174_v2 = vld [vmem:[%s1207_s20] sm:$0xff]  ;;  %v175_v3 = vld [vmem:[%s1207_s20 + $0x8] sm:$0xff]  ;;  %v176_v4 = vld [vmem:[%s1207_s20 + $0x10] sm:$0xff] }
   0xf   : > { %v245_v5 = vmul.f32 %v1202_v0, %v174_v2  ;;  %v246_v6 = vmul.f32 %v1202_v0, %v175_v3  ;;  %v177_v7 = vld [vmem:[%s1207_s20 + $0x18] sm:$0xff]  ;;  %v247_v8 = vmul.f32 %v1202_v0, %v176_v4  ;;  %v178_v9 = vld [vmem:[%s1207_s20 + $0x20] sm:$0xff]  ;;  %v179_v10 = vld [vmem:[%s1207_s20 + $0x28] sm:$0xff] }
  0x10   : > { %v248_v11 = vmul.f32 %v1202_v0, %v177_v7  ;;  %v249_v12 = vmul.f32 %v1202_v0, %v178_v9  ;;  %v250_v13 = vmul.f32 %v1202_v0, %v179_v10  ;;  %v180_v14 = vld [vmem:[%s1207_s20 + $0x30] sm:$0xff]  ;;  %v181_v15 = vld [vmem:[%s1207_s20 + $0x38] sm:$0xff]  ;;  %v182_v24 = vld [vmem:[%s1207_s20 + $0x40] sm:$0xff] }
  0x11   : > { %v316_v16 = vadd.f32 %v1212_v1, %v245_v5  ;;  %v317_v17 = vadd.f32 %v1212_v1, %v246_v6  ;;  %v318_v18 = vadd.f32 %v1212_v1, %v247_v8  ;;  %v251_v19 = vmul.f32 %v1202_v0, %v180_v14  ;;  %v183_v25 = vld [vmem:[%s1207_s20 + $0x48] sm:$0xff]  ;;  %v184_v30 = vld [vmem:[%s1207_s20 + $0x50] sm:$0xff]  ;;  %v185_v35 = vld [vmem:[%s1207_s20 + $0x58] sm:$0xff] }
  0x12   : > { %v319_v20 = vadd.f32 %v1212_v1, %v248_v11  ;;  %v320_v21 = vadd.f32 %v1212_v1, %v249_v12  ;;  %v321_v22 = vadd.f32 %v1212_v1, %v250_v13  ;;  %v252_v23 = vmul.f32 %v1202_v0, %v181_v15  ;;  %v186_v36 = vld [vmem:[%s1207_s20 + $0x60] sm:$0xff]  ;;  %v187_v41 = vld [vmem:[%s1207_s20 + $0x68] sm:$0xff]  ;;  %v188_v42 = vld [vmem:[%s1207_s20 + $0x70] sm:$0xff] }
  0x13   : > { %v380_v26 = vmax.f32 %v316_v16, 0.0  ;;  %v381_v27 = vmax.f32 %v317_v17, 0.0  ;;  %v382_v28 = vmax.f32 %v318_v18, 0.0  ;;  %v322_v29 = vadd.f32 %v1212_v1, %v251_v19  ;;  %v189_v51 = vld [vmem:[%s1207_s20 + $0x78] sm:$0xff]  ;;  %v190_v56 = vld [vmem:[%s1207_s20 + $0x80] sm:$0xff]  ;;  %v191_v61 = vld [vmem:[%s1207_s20 + $0x88] sm:$0xff] }
  0x14   : > { %v383_v31 = vmax.f32 %v319_v20, 0.0  ;;  %v384_v32 = vmax.f32 %v320_v21, 0.0  ;;  %v385_v33 = vmax.f32 %v321_v22, 0.0  ;;  %v323_v34 = vadd.f32 %v1212_v1, %v252_v23  ;;  %v192_v4 = vld [vmem:[%s1207_s20 + $0x90] sm:$0xff]  ;;  %v193_v5 = vld [vmem:[%s1207_s20 + $0x98] sm:$0xff]  ;;  %v194_v10 = vld [vmem:[%s1207_s20 + $0xa0] sm:$0xff] }
  0x15   : > { %v964_v37 = vpack.c.bf16 %v381_v27, %v380_v26  ;;  %v386_v38 = vmax.f32 %v322_v29, 0.0  ;;  %v253_v39 = vmul.f32 %v1202_v0, %v182_v24  ;;  %v254_v40 = vmul.f32 %v1202_v0, %v183_v25  ;;  %v195_v15 = vld [vmem:[%s1207_s20 + $0xa8] sm:$0xff]  ;;  %v196_v20 = vld [vmem:[%s1207_s20 + $0xb0] sm:$0xff]  ;;  %v197_v25 = vld [vmem:[%s1207_s20 + $0xb8] sm:$0xff] }
  0x16   : > { %v969_v43 = vpack.c.bf16 %v383_v31, %v382_v28  ;;  %v974_v44 = vpack.c.bf16 %v385_v33, %v384_v32  ;;  %v387_v45 = vmax.f32 %v323_v34, 0.0  ;;  %v255_v46 = vmul.f32 %v1202_v0, %v184_v30  ;;  %v198_v30 = vld [vmem:[%s1207_s20 + $0xc0] sm:$0xff] }
  0x17   : > { %965 = vst [vmem:[%s1244_s26] sm:$0xff] %v964_v37   ;;  %v324_v47 = vadd.f32 %v1212_v1, %v253_v39  ;;  %v325_v48 = vadd.f32 %v1212_v1, %v254_v40  ;;  %v256_v49 = vmul.f32 %v1202_v0, %v185_v35  ;;  %v257_v50 = vmul.f32 %v1202_v0, %v186_v36  ;;  %v199_v35 = vld [vmem:[%s1207_s20 + $0xc8] sm:$0xff]  ;;  %v200_v40 = vld [vmem:[%s1207_s20 + $0xd0] sm:$0xff] }
  0x18   : > { %1121 = vst [vmem:[%s1244_s26 + $0x8] sm:$0xff] %v969_v43   ;;  %1122 = vst [vmem:[%s1244_s26 + $0x10] sm:$0xff] %v974_v44   ;;  %v979_v52 = vpack.c.bf16 %v387_v45, %v386_v38  ;;  %v326_v53 = vadd.f32 %v1212_v1, %v255_v46  ;;  %v258_v54 = vmul.f32 %v1202_v0, %v187_v41  ;;  %v201_v41 = vld [vmem:[%s1207_s20 + $0xd8] sm:$0xff]  ;;  %v202_v46 = vld [vmem:[%s1207_s20 + $0xe0] sm:$0xff] }
  0x19   : > { %v259_v55 = vmul.f32 %v1202_v0, %v188_v42  ;;  %v388_v57 = vmax.f32 %v324_v47, 0.0  ;;  %v389_v58 = vmax.f32 %v325_v48, 0.0  ;;  %v327_v59 = vadd.f32 %v1212_v1, %v256_v49 }
  0x1a   : > { %v328_v60 = vadd.f32 %v1212_v1, %v257_v50  ;;  %1123 = vst [vmem:[%s1244_s26 + $0x18] sm:$0xff] %v979_v52   ;;  %v390_v62 = vmax.f32 %v326_v53, 0.0  ;;  %v329_v63 = vadd.f32 %v1212_v1, %v258_v54  ;;  %v260_v2 = vmul.f32 %v1202_v0, %v189_v51  ;;  %v203_v51 = vld [vmem:[%s1207_s20 + $0xe8] sm:$0xff] }
  0x1b   : > { %v330_v3 = vadd.f32 %v1212_v1, %v259_v55  ;;  %v984_v6 = vpack.c.bf16 %v389_v58, %v388_v57  ;;  %v391_v7 = vmax.f32 %v327_v59, 0.0  ;;  %v261_v9 = vmul.f32 %v1202_v0, %v190_v56  ;;  %v204_v56 = vld [vmem:[%s1207_s20 + $0xf0] sm:$0xff] }
  0x1c   : > { %v392_v8 = vmax.f32 %v328_v60, 0.0  ;;  %v393_v11 = vmax.f32 %v329_v63, 0.0  ;;  %v331_v12 = vadd.f32 %v1212_v1, %v260_v2  ;;  %v262_v14 = vmul.f32 %v1202_v0, %v191_v61  ;;  %v205_v61 = vld [vmem:[%s1207_s20 + $0xf8] sm:$0xff] }
  0x1d   : > { %v394_v13 = vmax.f32 %v330_v3, 0.0  ;;  %1124 = vst [vmem:[%s1244_s26 + $0x20] sm:$0xff] %v984_v6   ;;  %v989_v16 = vpack.c.bf16 %v391_v7, %v390_v62  ;;  %v332_v17 = vadd.f32 %v1212_v1, %v261_v9  ;;  %v263_v18 = vmul.f32 %v1202_v0, %v192_v4  ;;  %v206_v4 = vld [vmem:[%s1207_s20 + $0x100] sm:$0xff]  ;;  %v207_v9 = vld [vmem:[%s1207_s20 + $0x108] sm:$0xff] }
  0x1e   : > { %v264_v19 = vmul.f32 %v1202_v0, %v193_v5  ;;  %v994_v21 = vpack.c.bf16 %v393_v11, %v392_v8  ;;  %v395_v22 = vmax.f32 %v331_v12, 0.0  ;;  %v333_v23 = vadd.f32 %v1212_v1, %v262_v14  ;;  %v208_v14 = vld [vmem:[%s1207_s20 + $0x110] sm:$0xff] }
  0x1f   : > { %v265_v24 = vmul.f32 %v1202_v0, %v194_v10  ;;  %1125 = vst [vmem:[%s1244_s26 + $0x28] sm:$0xff] %v989_v16   ;;  %v396_v26 = vmax.f32 %v332_v17, 0.0  ;;  %v334_v27 = vadd.f32 %v1212_v1, %v263_v18  ;;  %v266_v29 = vmul.f32 %v1202_v0, %v195_v15  ;;  %v209_v15 = vld [vmem:[%s1207_s20 + $0x118] sm:$0xff] }
  0x20   : > { %v335_v28 = vadd.f32 %v1212_v1, %v264_v19  ;;  %1126 = vst [vmem:[%s1244_s26 + $0x30] sm:$0xff] %v994_v21   ;;  %v999_v31 = vpack.c.bf16 %v395_v22, %v394_v13  ;;  %v397_v32 = vmax.f32 %v333_v23, 0.0  ;;  %v267_v34 = vmul.f32 %v1202_v0, %v196_v20  ;;  %v210_v20 = vld [vmem:[%s1207_s20 + $0x120] sm:$0xff] }
  0x21   : > { %v336_v33 = vadd.f32 %v1212_v1, %v265_v24  ;;  %v398_v36 = vmax.f32 %v334_v27, 0.0  ;;  %v337_v38 = vadd.f32 %v1212_v1, %v266_v29  ;;  %v268_v39 = vmul.f32 %v1202_v0, %v197_v25  ;;  %v211_v25 = vld [vmem:[%s1207_s20 + $0x128] sm:$0xff] }
  0x22   : > { %v399_v37 = vmax.f32 %v335_v28, 0.0  ;;  %1127 = vst [vmem:[%s1244_s26 + $0x38] sm:$0xff] %v999_v31   ;;  %v1004_v42 = vpack.c.bf16 %v397_v32, %v396_v26  ;;  %v338_v44 = vadd.f32 %v1212_v1, %v267_v34  ;;  %v269_v45 = vmul.f32 %v1202_v0, %v198_v30  ;;  %v212_v30 = vld [vmem:[%s1207_s20 + $0x130] sm:$0xff] }
  0x23   : > { %v400_v43 = vmax.f32 %v336_v33, 0.0  ;;  %v401_v48 = vmax.f32 %v337_v38, 0.0  ;;  %v339_v49 = vadd.f32 %v1212_v1, %v268_v39  ;;  %v270_v50 = vmul.f32 %v1202_v0, %v199_v35  ;;  %v213_v35 = vld [vmem:[%s1207_s20 + $0x138] sm:$0xff] }
  0x24   : > { %v1009_v47 = vpack.c.bf16 %v399_v37, %v398_v36  ;;  %1128 = vst [vmem:[%s1244_s26 + $0x40] sm:$0xff] %v1004_v42   ;;  %v402_v52 = vmax.f32 %v338_v44, 0.0  ;;  %v340_v53 = vadd.f32 %v1212_v1, %v269_v45  ;;  %v271_v54 = vmul.f32 %v1202_v0, %v200_v40  ;;  %v214_v40 = vld [vmem:[%s1207_s20 + $0x140] sm:$0xff]  ;;  %v215_v45 = vld [vmem:[%s1207_s20 + $0x148] sm:$0xff] }
  0x25   : > { %v272_v55 = vmul.f32 %v1202_v0, %v201_v41  ;;  %v1014_v57 = vpack.c.bf16 %v401_v48, %v400_v43  ;;  %v403_v58 = vmax.f32 %v339_v49, 0.0  ;;  %v341_v59 = vadd.f32 %v1212_v1, %v270_v50  ;;  %v216_v50 = vld [vmem:[%s1207_s20 + $0x150] sm:$0xff] }
  0x26   : > { %1129 = vst [vmem:[%s1244_s26 + $0x48] sm:$0xff] %v1009_v47   ;;  %v273_v60 = vmul.f32 %v1202_v0, %v202_v46  ;;  %v404_v62 = vmax.f32 %v340_v53, 0.0  ;;  %v342_v63 = vadd.f32 %v1212_v1, %v271_v54  ;;  %v274_v3 = vmul.f32 %v1202_v0, %v203_v51  ;;  %v217_v51 = vld [vmem:[%s1207_s20 + $0x158] sm:$0xff] }
  0x27   : > { %v343_v2 = vadd.f32 %v1212_v1, %v272_v55  ;;  %1130 = vst [vmem:[%s1244_s26 + $0x50] sm:$0xff] %v1014_v57   ;;  %v1019_v5 = vpack.c.bf16 %v403_v58, %v402_v52  ;;  %v405_v6 = vmax.f32 %v341_v59, 0.0  ;;  %v275_v8 = vmul.f32 %v1202_v0, %v204_v56  ;;  %v218_v56 = vld [vmem:[%s1207_s20 + $0x160] sm:$0xff] }
  0x28   : > { %v344_v7 = vadd.f32 %v1212_v1, %v273_v60  ;;  %v406_v10 = vmax.f32 %v342_v63, 0.0  ;;  %v345_v12 = vadd.f32 %v1212_v1, %v274_v3  ;;  %v276_v13 = vmul.f32 %v1202_v0, %v205_v61  ;;  %v219_v61 = vld [vmem:[%s1207_s20 + $0x168] sm:$0xff] }
  0x29   : > { %v407_v11 = vmax.f32 %v343_v2, 0.0  ;;  %1131 = vst [vmem:[%s1244_s26 + $0x58] sm:$0xff] %v1019_v5   ;;  %v1024_v16 = vpack.c.bf16 %v405_v6, %v404_v62  ;;  %v346_v18 = vadd.f32 %v1212_v1, %v275_v8  ;;  %v277_v19 = vmul.f32 %v1202_v0, %v206_v4  ;;  %v220_v4 = vld [vmem:[%s1207_s20 + $0x170] sm:$0xff] }
  0x2a   : > { %v408_v17 = vmax.f32 %v344_v7, 0.0  ;;  %v409_v22 = vmax.f32 %v345_v12, 0.0  ;;  %v347_v23 = vadd.f32 %v1212_v1, %v276_v13  ;;  %v278_v24 = vmul.f32 %v1202_v0, %v207_v9  ;;  %v221_v9 = vld [vmem:[%s1207_s20 + $0x178] sm:$0xff] }
  0x2b   : > { %v1029_v21 = vpack.c.bf16 %v407_v11, %v406_v10  ;;  %1132 = vst [vmem:[%s1244_s26 + $0x60] sm:$0xff] %v1024_v16   ;;  %v410_v26 = vmax.f32 %v346_v18, 0.0  ;;  %v348_v27 = vadd.f32 %v1212_v1, %v277_v19  ;;  %v279_v28 = vmul.f32 %v1202_v0, %v208_v14  ;;  %v222_v14 = vld [vmem:[%s1207_s20 + $0x180] sm:$0xff]  ;;  %v223_v19 = vld [vmem:[%s1207_s20 + $0x188] sm:$0xff] }
  0x2c   : > { %v280_v29 = vmul.f32 %v1202_v0, %v209_v15  ;;  %v1034_v31 = vpack.c.bf16 %v409_v22, %v408_v17  ;;  %v411_v32 = vmax.f32 %v347_v23, 0.0  ;;  %v349_v33 = vadd.f32 %v1212_v1, %v278_v24  ;;  %v224_v24 = vld [vmem:[%s1207_s20 + $0x190] sm:$0xff] }
  0x2d   : > { %1133 = vst [vmem:[%s1244_s26 + $0x68] sm:$0xff] %v1029_v21   ;;  %v281_v34 = vmul.f32 %v1202_v0, %v210_v20  ;;  %v412_v36 = vmax.f32 %v348_v27, 0.0  ;;  %v350_v37 = vadd.f32 %v1212_v1, %v279_v28  ;;  %v282_v39 = vmul.f32 %v1202_v0, %v211_v25  ;;  %v225_v25 = vld [vmem:[%s1207_s20 + $0x198] sm:$0xff] }
  0x2e   : > { %v351_v38 = vadd.f32 %v1212_v1, %v280_v29  ;;  %1134 = vst [vmem:[%s1244_s26 + $0x70] sm:$0xff] %v1034_v31   ;;  %v1039_v41 = vpack.c.bf16 %v411_v32, %v410_v26  ;;  %v413_v42 = vmax.f32 %v349_v33, 0.0  ;;  %v283_v44 = vmul.f32 %v1202_v0, %v212_v30  ;;  %v226_v30 = vld [vmem:[%s1207_s20 + $0x1a0] sm:$0xff] }
  0x2f   : > { %v352_v43 = vadd.f32 %v1212_v1, %v281_v34  ;;  %v414_v46 = vmax.f32 %v350_v37, 0.0  ;;  %v353_v48 = vadd.f32 %v1212_v1, %v282_v39  ;;  %v284_v49 = vmul.f32 %v1202_v0, %v213_v35  ;;  %v227_v35 = vld [vmem:[%s1207_s20 + $0x1a8] sm:$0xff] }
  0x30   : > { %v415_v47 = vmax.f32 %v351_v38, 0.0  ;;  %1135 = vst [vmem:[%s1244_s26 + $0x78] sm:$0xff] %v1039_v41   ;;  %v1044_v52 = vpack.c.bf16 %v413_v42, %v412_v36  ;;  %v354_v54 = vadd.f32 %v1212_v1, %v283_v44  ;;  %v285_v55 = vmul.f32 %v1202_v0, %v214_v40  ;;  %v228_v40 = vld [vmem:[%s1207_s20 + $0x1b0] sm:$0xff] }
  0x31   : > { %v416_v53 = vmax.f32 %v352_v43, 0.0  ;;  %v417_v58 = vmax.f32 %v353_v48, 0.0  ;;  %v355_v59 = vadd.f32 %v1212_v1, %v284_v49  ;;  %v286_v60 = vmul.f32 %v1202_v0, %v215_v45  ;;  %v229_v45 = vld [vmem:[%s1207_s20 + $0x1b8] sm:$0xff] }
  0x32   : > { %v1049_v57 = vpack.c.bf16 %v415_v47, %v414_v46  ;;  %1136 = vst [vmem:[%s1244_s26 + $0x80] sm:$0xff] %v1044_v52   ;;  %v418_v62 = vmax.f32 %v354_v54, 0.0  ;;  %v356_v63 = vadd.f32 %v1212_v1, %v285_v55  ;;  %v287_v2 = vmul.f32 %v1202_v0, %v216_v50  ;;  %v230_v50 = vld [vmem:[%s1207_s20 + $0x1c0] sm:$0xff]  ;;  %v231_v55 = vld [vmem:[%s1207_s20 + $0x1c8] sm:$0xff] }
  0x33   : > { %v288_v3 = vmul.f32 %v1202_v0, %v217_v51  ;;  %v1054_v5 = vpack.c.bf16 %v417_v58, %v416_v53  ;;  %v419_v6 = vmax.f32 %v355_v59, 0.0  ;;  %v357_v7 = vadd.f32 %v1212_v1, %v286_v60  ;;  %v232_v60 = vld [vmem:[%s1207_s20 + $0x1d0] sm:$0xff] }
  0x34   : > { %1137 = vst [vmem:[%s1244_s26 + $0x88] sm:$0xff] %v1049_v57   ;;  %v289_v8 = vmul.f32 %v1202_v0, %v218_v56  ;;  %v420_v10 = vmax.f32 %v356_v63, 0.0  ;;  %v358_v11 = vadd.f32 %v1212_v1, %v287_v2  ;;  %v290_v13 = vmul.f32 %v1202_v0, %v219_v61  ;;  %v233_v61 = vld [vmem:[%s1207_s20 + $0x1d8] sm:$0xff] }
  0x35   : > { %v359_v12 = vadd.f32 %v1212_v1, %v288_v3  ;;  %1138 = vst [vmem:[%s1244_s26 + $0x90] sm:$0xff] %v1054_v5   ;;  %v1059_v15 = vpack.c.bf16 %v419_v6, %v418_v62  ;;  %v421_v16 = vmax.f32 %v357_v7, 0.0  ;;  %v291_v18 = vmul.f32 %v1202_v0, %v220_v4  ;;  %v234_v4 = vld [vmem:[%s1207_s20 + $0x1e0] sm:$0xff] }
  0x36   : > { %v360_v17 = vadd.f32 %v1212_v1, %v289_v8  ;;  %v422_v20 = vmax.f32 %v358_v11, 0.0  ;;  %v361_v22 = vadd.f32 %v1212_v1, %v290_v13  ;;  %v292_v23 = vmul.f32 %v1202_v0, %v221_v9  ;;  %v235_v9 = vld [vmem:[%s1207_s20 + $0x1e8] sm:$0xff] }
  0x37   : > { %v423_v21 = vmax.f32 %v359_v12, 0.0  ;;  %1139 = vst [vmem:[%s1244_s26 + $0x98] sm:$0xff] %v1059_v15   ;;  %v1064_v26 = vpack.c.bf16 %v421_v16, %v420_v10  ;;  %v362_v28 = vadd.f32 %v1212_v1, %v291_v18  ;;  %v293_v29 = vmul.f32 %v1202_v0, %v222_v14  ;;  %v236_v14 = vld [vmem:[%s1207_s20 + $0x1f0] sm:$0xff] }
  0x38   : > { %v424_v27 = vmax.f32 %v360_v17, 0.0  ;;  %v425_v32 = vmax.f32 %v361_v22, 0.0  ;;  %v363_v33 = vadd.f32 %v1212_v1, %v292_v23  ;;  %v294_v34 = vmul.f32 %v1202_v0, %v223_v19  ;;  %v237_v19 = vld [vmem:[%s1207_s20 + $0x1f8] sm:$0xff] }
  0x39   : > { %v1069_v31 = vpack.c.bf16 %v423_v21, %v422_v20  ;;  %1140 = vst [vmem:[%s1244_s26 + $0xa0] sm:$0xff] %v1064_v26   ;;  %v426_v36 = vmax.f32 %v362_v28, 0.0  ;;  %v364_v37 = vadd.f32 %v1212_v1, %v293_v29  ;;  %v295_v38 = vmul.f32 %v1202_v0, %v224_v24 }
  0x3a   : > { %v296_v39 = vmul.f32 %v1202_v0, %v225_v25  ;;  %v1074_v41 = vpack.c.bf16 %v425_v32, %v424_v27  ;;  %v427_v42 = vmax.f32 %v363_v33, 0.0  ;;  %v365_v43 = vadd.f32 %v1212_v1, %v294_v34 }
  0x3b   : > { %1141 = vst [vmem:[%s1244_s26 + $0xa8] sm:$0xff] %v1069_v31   ;;  %v297_v44 = vmul.f32 %v1202_v0, %v226_v30  ;;  %v428_v46 = vmax.f32 %v364_v37, 0.0  ;;  %v366_v47 = vadd.f32 %v1212_v1, %v295_v38  ;;  %v298_v49 = vmul.f32 %v1202_v0, %v227_v35 }
  0x3c   : > { %v367_v48 = vadd.f32 %v1212_v1, %v296_v39  ;;  %1142 = vst [vmem:[%s1244_s26 + $0xb0] sm:$0xff] %v1074_v41   ;;  %v1079_v51 = vpack.c.bf16 %v427_v42, %v426_v36  ;;  %v429_v52 = vmax.f32 %v365_v43, 0.0  ;;  %v299_v54 = vmul.f32 %v1202_v0, %v228_v40 }
  0x3d   : > { %v368_v53 = vadd.f32 %v1212_v1, %v297_v44  ;;  %v430_v56 = vmax.f32 %v366_v47, 0.0  ;;  %v369_v58 = vadd.f32 %v1212_v1, %v298_v49  ;;  %v300_v59 = vmul.f32 %v1202_v0, %v229_v45 }
  0x3e   : > { %v431_v57 = vmax.f32 %v367_v48, 0.0  ;;  %1143 = vst [vmem:[%s1244_s26 + $0xb8] sm:$0xff] %v1079_v51   ;;  %v1084_v62 = vpack.c.bf16 %v429_v52, %v428_v46  ;;  %v370_v2 = vadd.f32 %v1212_v1, %v299_v54  ;;  %v301_v3 = vmul.f32 %v1202_v0, %v230_v50 }
  0x3f   : > { %v432_v63 = vmax.f32 %v368_v53, 0.0  ;;  %v433_v6 = vmax.f32 %v369_v58, 0.0  ;;  %v371_v7 = vadd.f32 %v1212_v1, %v300_v59  ;;  %v302_v8 = vmul.f32 %v1202_v0, %v231_v55 }
  0x40   : > { %v1089_v5 = vpack.c.bf16 %v431_v57, %v430_v56  ;;  %1144 = vst [vmem:[%s1244_s26 + $0xc0] sm:$0xff] %v1084_v62   ;;  %v434_v10 = vmax.f32 %v370_v2, 0.0  ;;  %v372_v11 = vadd.f32 %v1212_v1, %v301_v3  ;;  %v303_v12 = vmul.f32 %v1202_v0, %v232_v60 }
  0x41   : > { %v304_v13 = vmul.f32 %v1202_v0, %v233_v61  ;;  %v1094_v15 = vpack.c.bf16 %v433_v6, %v432_v63  ;;  %v435_v16 = vmax.f32 %v371_v7, 0.0  ;;  %v373_v17 = vadd.f32 %v1212_v1, %v302_v8 }
  0x42   : > { %1145 = vst [vmem:[%s1244_s26 + $0xc8] sm:$0xff] %v1089_v5   ;;  %v305_v18 = vmul.f32 %v1202_v0, %v234_v4  ;;  %v436_v20 = vmax.f32 %v372_v11, 0.0  ;;  %v374_v21 = vadd.f32 %v1212_v1, %v303_v12  ;;  %v306_v23 = vmul.f32 %v1202_v0, %v235_v9 }
  0x43   : > { %v375_v22 = vadd.f32 %v1212_v1, %v304_v13  ;;  %1146 = vst [vmem:[%s1244_s26 + $0xd0] sm:$0xff] %v1094_v15   ;;  %v1099_v24 = vpack.c.bf16 %v435_v16, %v434_v10  ;;  %v437_v25 = vmax.f32 %v373_v17, 0.0  ;;  %v307_v27 = vmul.f32 %v1202_v0, %v236_v14 }
  0x44   : > { %v376_v26 = vadd.f32 %v1212_v1, %v305_v18  ;;  %v438_v28 = vmax.f32 %v374_v21, 0.0  ;;  %v377_v30 = vadd.f32 %v1212_v1, %v306_v23  ;;  %v308_v31 = vmul.f32 %v1202_v0, %v237_v19 }
  0x45   : > { %v439_v29 = vmax.f32 %v375_v22, 0.0  ;;  %1147 = vst [vmem:[%s1244_s26 + $0xd8] sm:$0xff] %v1099_v24   ;;  %v1104_v32 = vpack.c.bf16 %v437_v25, %v436_v20  ;;  %v378_v34 = vadd.f32 %v1212_v1, %v307_v27 }
  0x46   : > { %v440_v33 = vmax.f32 %v376_v26, 0.0  ;;  %v441_v36 = vmax.f32 %v377_v30, 0.0  ;;  %v379_v37 = vadd.f32 %v1212_v1, %v308_v31 }
  0x47   : > { %v1109_v35 = vpack.c.bf16 %v439_v29, %v438_v28  ;;  %1148 = vst [vmem:[%s1244_s26 + $0xe0] sm:$0xff] %v1104_v32   ;;  %v442_v38 = vmax.f32 %v378_v34, 0.0 }
  0x48   : > { %v1114_v39 = vpack.c.bf16 %v441_v36, %v440_v33  ;;  %v443_v40 = vmax.f32 %v379_v37, 0.0 }
  0x49   : > { %1149 = vst [vmem:[%s1244_s26 + $0xe8] sm:$0xff] %v1109_v35  }
  0x4a   : > { %1150 = vst [vmem:[%s1244_s26 + $0xf0] sm:$0xff] %v1114_v39   ;;  %v1119_v41 = vpack.c.bf16 %v443_v40, %v442_v38 }
  0x4c   : > { %1151 = vst [vmem:[%s1244_s26 + $0xf8] sm:$0xff] %v1119_v41  }
  0x4d PF: > { %s13_s12 = sadd.s32 1, %s1166_s12  }
  0x4e   : > { %p10_p4 = scmp.ge.s32.totalorder %s13_s12, 4  }
  0x50   :  { %12 = sbr.rel (!%p10_p4) target bundleno = 1 (0x1), region = 62 }

// kernel: residual_branch3d.3
= control target key start
LH: loop header
LB: loop body
LE: loop exit
PB: predicated region body
PF: predicated region fallthrough
CT: control target
= control target key end

     0   :  { %s1849_s12 = smov 0   ;;  %s1851_s13 = smov 0   ;;  %s2215_s0 = inlined_call_operand.vmem [shape: bf16[1024,128], index: 0, kind: input, shape index: {}]   ;;  %s2216_s1 = inlined_call_operand.vmem [shape: bf16[128,128], index: 1, kind: input, shape index: {}]   ;;  %s2217_s2 = inlined_call_operand.vmem [shape: f32[1024,128], index: 2, kind: output, shape index: {0}]   ;;  %s2218_s3 = inlined_call_operand.vmem [shape: f32[16,128], index: 3, kind: output, shape index: {1}]  }
   0x1   :  { %s1853_s14 = smov 0  }
   0x2 LB: > { %s33_s15 = sadd.s32 1, %s1822_s13  ;;  %p1555_p0 = scmp.ge.s32.totalorder %s1826_s14, 1  ;;  %s1826_s14 = sphi %s1853_s14, %s14_s14   ;;  %s1822_s13 = sphi %s1851_s13, %s2220_s13   ;;  %s1818_s12 = sphi %s1849_s12, %s2219_s12  }
   0x3   : > { %p35_p1 = scmp.ge.s32.totalorder %s33_s15, 2  ;;  %p185_p2 = scmp.lt.s32.totalorder %s1826_s14, 3 }
   0x5   : > { %s2222_s15 = smov (%p35_p1, %s33_s15), 0  ;;  %p186_p3 = pnand %p1555_p0, %p185_p2 }
   0x6   : > { %s1556_s18 = sshll.u32 (!%p186_p3), %s1818_s12, 6  ;;  %p257_p5 = scmp.lt.s32.totalorder (!%p186_p3), %s1818_s12, 1 }
   0x7   : > { %189 = sbr.rel (%p186_p3) target bundleno = 385 (0x181), region = 28  ;;  %p231_p4 = scmp.lt.s32.totalorder (!%p186_p3), %s1556_s18, 127 }
   0xc   : > { %v1764_v0 = vld [vmem:[%s2216_s1 + $0x38] sm:$0xff]   ;;  %v1765_v1 = vld [vmem:[%s2216_s1 + $0x30] sm:$0xff]   ;;  %s2224_s18 = smov (!%p231_p4, %s1556_s18), 127  ;;  %v1766_v2 = vld [vmem:[%s2216_s1 + $0x28] sm:$0xff]   ;;  %s2226_s12 = smov (!%p257_p5, %s1818_s12), 1  ;;  %v1828_v46 = vmov 0.0  }
   0xd   : > { %1643 = vmatprep.subr.bf16.mxu0 %v1764_v0  ;;  %1723 = vmatprep.subr.bf16.mxu1 %v1764_v0  ;;  %s1557_s23 = sshll.u32 %s2224_s18, 2  ;;  %v1767_v3 = vld [vmem:[%s2216_s1 + $0x20] sm:$0xff]   ;;  %v1768_v5 = vld [vmem:[%s2216_s1 + $0x18] sm:$0xff]   ;;  %v1769_v6 = vld [vmem:[%s2216_s1 + $0x10] sm:$0xff]   ;;  %s1559_s10 = sshll.u32 %s2224_s18, 3 }
   0xe   : > { %1644 = vmatpush3.bf16.msra.mxu0 %v1764_v0  ;;  %1731 = vmatpush3.bf16.msra.mxu1 %v1764_v0  ;;  %s1885_s26 = scalar_lea.vmem %s2215_s0, %s1557_s23  ;;  %v1770_v7 = vld [vmem:[%s2216_s1 + $0x8] sm:$0xff]   ;;  %v1771_v8 = vld [vmem:[%s2216_s1] sm:$0xff]   ;;  %s1938_s17 = scalar_lea.vmem %s2217_s2, %s1559_s10 }
   0xf   : > { %1645 = vmatprep.subr.bf16.mxu0 %v1765_v1  ;;  %1724 = vmatprep.subr.bf16.mxu1 %v1765_v1  ;;  %v1772_v4 = vld [vmem:[%s1885_s26] sm:$0xff]   ;;  %v1773_v10 = vld [vmem:[%s1885_s26 + $0x8] sm:$0xff]   ;;  %v1774_v11 = vld [vmem:[%s1885_s26 + $0x10] sm:$0xff]   ;;  %s1560_s18 = sshll.u32 %s2226_s12, 3 }
  0x10   : > { %1659 = vmatprep.mubr.bf16.mxu0 %v1772_v4  ;;  %v1788_v9 = vld [vmem:[%s1885_s26 + $0x80] sm:$0xff]   ;;  %v1789_v12 = vld [vmem:[%s1885_s26 + $0x88] sm:$0xff]   ;;  %v1790_v13 = vld [vmem:[%s1885_s26 + $0x90] sm:$0xff]   ;;  %s1957_s21 = scalar_lea.vmem %s2218_s3, %s1560_s18 }
  0x11   : > { %1691 = vmatprep.mubr.bf16.mxu1 %v1788_v9  ;;  %v1775_v14 = vld [vmem:[%s1885_s26 + $0x18] sm:$0xff]   ;;  %v1776_v15 = vld [vmem:[%s1885_s26 + $0x20] sm:$0xff]   ;;  %v1777_v18 = vld [vmem:[%s1885_s26 + $0x28] sm:$0xff]   ;;  %1205 = vst [vmem:[%s1957_s21] sm:$0xff] %v1828_v46 }
  0x12   : > { %1646 = vmatpush3.bf16.msra.mxu0 %v1765_v1  ;;  %1732 = vmatpush3.bf16.msra.mxu1 %v1765_v1  ;;  %v1791_v16 = vld [vmem:[%s1885_s26 + $0x98] sm:$0xff]   ;;  %v1792_v17 = vld [vmem:[%s1885_s26 + $0xa0] sm:$0xff]   ;;  %v1793_v19 = vld [vmem:[%s1885_s26 + $0xa8] sm:$0xff]  }
  0x13   : > { %1647 = vmatprep.subr.bf16.mxu0 %v1766_v2  ;;  %1725 = vmatprep.subr.bf16.mxu1 %v1766_v2  ;;  %v1778_v20 = vld [vmem:[%s1885_s26 + $0x30] sm:$0xff]   ;;  %v1779_v22 = vld [vmem:[%s1885_s26 + $0x38] sm:$0xff]   ;;  %v1780_v24 = vld [vmem:[%s1885_s26 + $0x40] sm:$0xff]  }
  0x14   : > { %v1794_v21 = vld [vmem:[%s1885_s26 + $0xb0] sm:$0xff]   ;;  %v1795_v23 = vld [vmem:[%s1885_s26 + $0xb8] sm:$0xff]   ;;  %v1796_v25 = vld [vmem:[%s1885_s26 + $0xc0] sm:$0xff]  }
  0x15   : > { %v1781_v26 = vld [vmem:[%s1885_s26 + $0x48] sm:$0xff]   ;;  %v1782_v28 = vld [vmem:[%s1885_s26 + $0x50] sm:$0xff]   ;;  %v1783_v30 = vld [vmem:[%s1885_s26 + $0x58] sm:$0xff]  }
  0x16   : > { %1648 = vmatpush3.bf16.msra.mxu0 %v1766_v2  ;;  %1733 = vmatpush3.bf16.msra.mxu1 %v1766_v2  ;;  %v1797_v27 = vld [vmem:[%s1885_s26 + $0xc8] sm:$0xff]   ;;  %v1798_v29 = vld [vmem:[%s1885_s26 + $0xd0] sm:$0xff]   ;;  %v1799_v31 = vld [vmem:[%s1885_s26 + $0xd8] sm:$0xff]  }
  0x17   : > { %1649 = vmatprep.subr.bf16.mxu0 %v1767_v3  ;;  %1726 = vmatprep.subr.bf16.mxu1 %v1767_v3  ;;  %v1784_v32 = vld [vmem:[%s1885_s26 + $0x60] sm:$0xff]   ;;  %v1785_v34 = vld [vmem:[%s1885_s26 + $0x68] sm:$0xff]   ;;  %v1786_v36 = vld [vmem:[%s1885_s26 + $0x70] sm:$0xff]  }
  0x18   : > { %v1800_v33 = vld [vmem:[%s1885_s26 + $0xe0] sm:$0xff]   ;;  %v1801_v35 = vld [vmem:[%s1885_s26 + $0xe8] sm:$0xff]   ;;  %v1802_v37 = vld [vmem:[%s1885_s26 + $0xf0] sm:$0xff]  }
  0x19   : > { %v1787_v38 = vld [vmem:[%s1885_s26 + $0x78] sm:$0xff]  }
  0x1a   : > { %1650 = vmatpush3.bf16.msra.mxu0 %v1767_v3  ;;  %1734 = vmatpush3.bf16.msra.mxu1 %v1767_v3  ;;  %v1803_v39 = vld [vmem:[%s1885_s26 + $0xf8] sm:$0xff]  }
  0x1b   : > { %1651 = vmatprep.subr.bf16.mxu0 %v1768_v5  ;;  %1727 = vmatprep.subr.bf16.mxu1 %v1768_v5 }
  0x1e   : > { %1652 = vmatpush3.bf16.msra.mxu0 %v1768_v5  ;;  %1735 = vmatpush3.bf16.msra.mxu1 %v1768_v5 }
  0x1f   : > { %1653 = vmatprep.subr.bf16.mxu0 %v1769_v6  ;;  %1728 = vmatprep.subr.bf16.mxu1 %v1769_v6 }
  0x22   : > { %1654 = vmatpush3.bf16.msra.mxu0 %v1769_v6  ;;  %1736 = vmatpush3.bf16.msra.mxu1 %v1769_v6 }
  0x23   : > { %1655 = vmatprep.subr.bf16.mxu0 %v1770_v7  ;;  %1729 = vmatprep.subr.bf16.mxu1 %v1770_v7 }
  0x26   : > { %1656 = vmatpush3.bf16.msra.mxu0 %v1770_v7  ;;  %1737 = vmatpush3.bf16.msra.mxu1 %v1770_v7 }
  0x27   : > { %1657 = vmatprep.subr.bf16.mxu0 %v1771_v8  ;;  %1730 = vmatprep.subr.bf16.mxu1 %v1771_v8 }
  0x2a   : > { %1658 = vmatpush3.bf16.msra.mxu0 %v1771_v8  ;;  %1738 = vmatpush3.bf16.msra.mxu1 %v1771_v8 }
  0x2d   : > { %1660 = vmatmul.mubr.bf16.vlgmr.msra.gmra.mxu0 %v1773_v10  ;;  %1692 = vmatmul.mubr.bf16.vlgmr.msra.gmra.mxu1 %v1789_v12 }
  0x2e   : > { %1663 = vmatprep.mubr.bf16.mxu0 %v1774_v11  ;;  %1695 = vmatprep.mubr.bf16.mxu1 %v1790_v13 }
  0x35   : > { %1664 = vmatmul.mubr.bf16.gmra.mxu0 %v1775_v14  ;;  %1696 = vmatmul.mubr.bf16.gmra.mxu1 %v1791_v16 }
  0x36   : > { %1667 = vmatprep.mubr.bf16.mxu0 %v1776_v15  ;;  %1699 = vmatprep.mubr.bf16.mxu1 %v1792_v17 }
  0x3d   : > { %1668 = vmatmul.mubr.bf16.gmra.mxu0 %v1777_v18  ;;  %1700 = vmatmul.mubr.bf16.gmra.mxu1 %v1793_v19 }
  0x3e   : > { %1671 = vmatprep.mubr.bf16.mxu0 %v1778_v20  ;;  %1703 = vmatprep.mubr.bf16.mxu1 %v1794_v21 }
  0x45   : > { %1672 = vmatmul.mubr.bf16.gmra.mxu0 %v1779_v22  ;;  %1704 = vmatmul.mubr.bf16.gmra.mxu1 %v1795_v23 }
  0x46   : > { %1675 = vmatprep.mubr.bf16.mxu0 %v1780_v24  ;;  %1707 = vmatprep.mubr.bf16.mxu1 %v1796_v25 }
  0x4d   : > { %1676 = vmatmul.mubr.bf16.gmra.mxu0 %v1781_v26  ;;  %1708 = vmatmul.mubr.bf16.gmra.mxu1 %v1797_v27 }
  0x4e   : > { %1679 = vmatprep.mubr.bf16.mxu0 %v1782_v28  ;;  %1711 = vmatprep.mubr.bf16.mxu1 %v1798_v29 }
  0x55   : > { %1680 = vmatmul.mubr.bf16.gmra.mxu0 %v1783_v30  ;;  %1712 = vmatmul.mubr.bf16.gmra.mxu1 %v1799_v31 }
  0x56   : > { %1683 = vmatprep.mubr.bf16.mxu0 %v1784_v32  ;;  %1715 = vmatprep.mubr.bf16.mxu1 %v1800_v33 }
  0x5d   : > { %1684 = vmatmul.mubr.bf16.gmra.mxu0 %v1785_v34  ;;  %1716 = vmatmul.mubr.bf16.gmra.mxu1 %v1801_v35 }
  0x5e   : > { %1687 = vmatprep.mubr.bf16.mxu0 %v1786_v36  ;;  %1719 = vmatprep.mubr.bf16.mxu1 %v1802_v37 }
  0x65   : > { %1688 = vmatmul.mubr.bf16.gmra.mxu0 %v1787_v38  ;;  %1720 = vmatmul.mubr.bf16.gmra.mxu1 %v1803_v39 }
  0xed   : > { %v1661_v40 = vpop.f32.mrf.mxu0  ;;  %v1941_v41 = vpop.f32.mrf.mxu1 }
  0xee   : > { %880 = vst [vmem:[%s1938_s17 + $0x10] sm:$0xff] %v1661_v40  ;;  %912 = vst [vmem:[%s1938_s17 + $0x110] sm:$0xff] %v1941_v41  ;;  %v1278_v54 = vmul.f32 %v1661_v40, %v1661_v40 }
  0xef   : > { %v619_v42 = vpop.f32.mrf.mxu0  ;;  %v1947_v43 = vpop.f32.mrf.mxu1 }
  0xf0   : > { %878 = vst [vmem:[%s1938_s17] sm:$0xff] %v619_v42  ;;  %910 = vst [vmem:[%s1938_s17 + $0x100] sm:$0xff] %v1947_v43  ;;  %v1276_v49 = vmul.f32 %v619_v42, %v619_v42 }
  0xf1   : > { %v1662_v44 = vpop.f32.mrf.mxu0  ;;  %v1952_v45 = vpop.f32.mrf.mxu1 }
  0xf2   : > { %881 = vst [vmem:[%s1938_s17 + $0x18] sm:$0xff] %v1662_v44  ;;  %913 = vst [vmem:[%s1938_s17 + $0x118] sm:$0xff] %v1952_v45  ;;  %v1279_v59 = vmul.f32 %v1662_v44, %v1662_v44 }
  0xf3   : > { %v622_v47 = vpop.f32.mrf.mxu0  ;;  %v1963_v48 = vpop.f32.mrf.mxu1 }
  0xf4   : > { %879 = vst [vmem:[%s1938_s17 + $0x8] sm:$0xff] %v622_v47  ;;  %v1206_v50 = vadd.f32 %v622_v47, %v619_v42  ;;  %v1277_v51 = vmul.f32 %v622_v47, %v622_v47  ;;  %911 = vst [vmem:[%s1938_s17 + $0x108] sm:$0xff] %v1963_v48 }
  0xf5   : > { %v1665_v52 = vpop.f32.mrf.mxu0  ;;  %v1968_v53 = vpop.f32.mrf.mxu1 }
  0xf6   : > { %v1207_v55 = vadd.f32 %v1661_v40, %v1206_v50  ;;  %v1340_v56 = vadd.f32 %v1277_v51, %v1276_v49  ;;  %884 = vst [vmem:[%s1938_s17 + $0x30] sm:$0xff] %v1665_v52  ;;  %916 = vst [vmem:[%s1938_s17 + $0x130] sm:$0xff] %v1968_v53  ;;  %v1282_v10 = vmul.f32 %v1665_v52, %v1665_v52 }
  0xf7   : > { %v635_v57 = vpop.f32.mrf.mxu0  ;;  %v1973_v58 = vpop.f32.mrf.mxu1 }
  0xf8   : > { %v1341_v60 = vadd.f32 %v1340_v56, %v1278_v54  ;;  %882 = vst [vmem:[%s1938_s17 + $0x20] sm:$0xff] %v635_v57  ;;  %v1208_v61 = vadd.f32 %v1662_v44, %v1207_v55  ;;  %914 = vst [vmem:[%s1938_s17 + $0x120] sm:$0xff] %v1973_v58  ;;  %v1280_v1 = vmul.f32 %v635_v57, %v635_v57 }
  0xf9   : > { %v1666_v62 = vpop.f32.mrf.mxu0  ;;  %v1978_v63 = vpop.f32.mrf.mxu1 }
  0xfa   : > { %v1209_v0 = vadd.f32 %v1208_v61, %v635_v57  ;;  %v1342_v2 = vadd.f32 %v1341_v60, %v1279_v59  ;;  %885 = vst [vmem:[%s1938_s17 + $0x38] sm:$0xff] %v1666_v62  ;;  %917 = vst [vmem:[%s1938_s17 + $0x138] sm:$0xff] %v1978_v63  ;;  %v1283_v15 = vmul.f32 %v1666_v62, %v1666_v62 }
  0xfb   : > { %v638_v3 = vpop.f32.mrf.mxu0  ;;  %v1983_v4 = vpop.f32.mrf.mxu1 }
  0xfc   : > { %v1343_v5 = vadd.f32 %v1342_v2, %v1280_v1  ;;  %883 = vst [vmem:[%s1938_s17 + $0x28] sm:$0xff] %v638_v3  ;;  %v1210_v6 = vadd.f32 %v1209_v0, %v638_v3  ;;  %v1281_v7 = vmul.f32 %v638_v3, %v638_v3  ;;  %915 = vst [vmem:[%s1938_s17 + $0x128] sm:$0xff] %v1983_v4 }
  0xfd   : > { %v1669_v8 = vpop.f32.mrf.mxu0  ;;  %v1988_v9 = vpop.f32.mrf.mxu1 }
  0xfe   : > { %v1211_v11 = vadd.f32 %v1665_v52, %v1210_v6  ;;  %v1344_v12 = vadd.f32 %v1343_v5, %v1281_v7  ;;  %888 = vst [vmem:[%s1938_s17 + $0x50] sm:$0xff] %v1669_v8  ;;  %920 = vst [vmem:[%s1938_s17 + $0x150] sm:$0xff] %v1988_v9  ;;  %v1286_v30 = vmul.f32 %v1669_v8, %v1669_v8 }
  0xff   : > { %v651_v13 = vpop.f32.mrf.mxu0  ;;  %v1993_v14 = vpop.f32.mrf.mxu1 }
 0x100   : > { %v1345_v16 = vadd.f32 %v1344_v12, %v1282_v10  ;;  %886 = vst [vmem:[%s1938_s17 + $0x40] sm:$0xff] %v651_v13  ;;  %v1212_v17 = vadd.f32 %v1666_v62, %v1211_v11  ;;  %918 = vst [vmem:[%s1938_s17 + $0x140] sm:$0xff] %v1993_v14  ;;  %v1284_v21 = vmul.f32 %v651_v13, %v651_v13 }
 0x101   : > { %v1670_v18 = vpop.f32.mrf.mxu0  ;;  %v1998_v19 = vpop.f32.mrf.mxu1 }
 0x102   : > { %v1213_v20 = vadd.f32 %v1212_v17, %v651_v13  ;;  %v1346_v22 = vadd.f32 %v1345_v16, %v1283_v15  ;;  %889 = vst [vmem:[%s1938_s17 + $0x58] sm:$0xff] %v1670_v18  ;;  %921 = vst [vmem:[%s1938_s17 + $0x158] sm:$0xff] %v1998_v19  ;;  %v1287_v35 = vmul.f32 %v1670_v18, %v1670_v18 }
 0x103   : > { %v654_v23 = vpop.f32.mrf.mxu0  ;;  %v2003_v24 = vpop.f32.mrf.mxu1 }
 0x104   : > { %v1347_v25 = vadd.f32 %v1346_v22, %v1284_v21  ;;  %887 = vst [vmem:[%s1938_s17 + $0x48] sm:$0xff] %v654_v23  ;;  %v1214_v26 = vadd.f32 %v1213_v20, %v654_v23  ;;  %v1285_v27 = vmul.f32 %v654_v23, %v654_v23  ;;  %919 = vst [vmem:[%s1938_s17 + $0x148] sm:$0xff] %v2003_v24 }
 0x105   : > { %v1673_v28 = vpop.f32.mrf.mxu0  ;;  %v2008_v29 = vpop.f32.mrf.mxu1 }
 0x106   : > { %v1215_v31 = vadd.f32 %v1669_v8, %v1214_v26  ;;  %v1348_v32 = vadd.f32 %v1347_v25, %v1285_v27  ;;  %892 = vst [vmem:[%s1938_s17 + $0x70] sm:$0xff] %v1673_v28  ;;  %924 = vst [vmem:[%s1938_s17 + $0x170] sm:$0xff] %v2008_v29  ;;  %v1290_v55 = vmul.f32 %v1673_v28, %v1673_v28 }
 0x107   : > { %v667_v33 = vpop.f32.mrf.mxu0  ;;  %v2013_v34 = vpop.f32.mrf.mxu1 }
 0x108   : > { %v1349_v36 = vadd.f32 %v1348_v32, %v1286_v30  ;;  %890 = vst [vmem:[%s1938_s17 + $0x60] sm:$0xff] %v667_v33  ;;  %v1216_v37 = vadd.f32 %v1670_v18, %v1215_v31  ;;  %922 = vst [vmem:[%s1938_s17 + $0x160] sm:$0xff] %v2013_v34  ;;  %v1288_v42 = vmul.f32 %v667_v33, %v667_v33 }
 0x109   : > { %v1674_v38 = vpop.f32.mrf.mxu0  ;;  %v2018_v39 = vpop.f32.mrf.mxu1 }
 0x10a   : > { %v1217_v40 = vadd.f32 %v1216_v37, %v667_v33  ;;  %v1350_v44 = vadd.f32 %v1349_v36, %v1287_v35  ;;  %893 = vst [vmem:[%s1938_s17 + $0x78] sm:$0xff] %v1674_v38  ;;  %925 = vst [vmem:[%s1938_s17 + $0x178] sm:$0xff] %v2018_v39  ;;  %v1291_v61 = vmul.f32 %v1674_v38, %v1674_v38 }
 0x10b   : > { %v670_v46 = vpop.f32.mrf.mxu0  ;;  %v2023_v47 = vpop.f32.mrf.mxu1 }
 0x10c   : > { %v1351_v49 = vadd.f32 %v1350_v44, %v1288_v42  ;;  %891 = vst [vmem:[%s1938_s17 + $0x68] sm:$0xff] %v670_v46  ;;  %v1218_v50 = vadd.f32 %v1217_v40, %v670_v46  ;;  %v1289_v51 = vmul.f32 %v670_v46, %v670_v46  ;;  %923 = vst [vmem:[%s1938_s17 + $0x168] sm:$0xff] %v2023_v47 }
 0x10d   : > { %v1677_v52 = vpop.f32.mrf.mxu0  ;;  %v2028_v54 = vpop.f32.mrf.mxu1 }
 0x10e   : > { %v1219_v56 = vadd.f32 %v1673_v28, %v1218_v50  ;;  %v1352_v57 = vadd.f32 %v1351_v49, %v1289_v51  ;;  %896 = vst [vmem:[%s1938_s17 + $0x90] sm:$0xff] %v1677_v52  ;;  %928 = vst [vmem:[%s1938_s17 + $0x190] sm:$0xff] %v2028_v54  ;;  %v1294_v16 = vmul.f32 %v1677_v52, %v1677_v52 }
 0x10f   : > { %v683_v59 = vpop.f32.mrf.mxu0  ;;  %v2033_v60 = vpop.f32.mrf.mxu1 }
 0x110   : > { %v1353_v62 = vadd.f32 %v1352_v57, %v1290_v55  ;;  %894 = vst [vmem:[%s1938_s17 + $0x80] sm:$0xff] %v683_v59  ;;  %v1220_v0 = vadd.f32 %v1674_v38, %v1219_v56  ;;  %926 = vst [vmem:[%s1938_s17 + $0x180] sm:$0xff] %v2033_v60  ;;  %v1292_v5 = vmul.f32 %v683_v59, %v683_v59 }
 0x111   : > { %v1678_v1 = vpop.f32.mrf.mxu0  ;;  %v2038_v2 = vpop.f32.mrf.mxu1 }
 0x112   : > { %v1221_v3 = vadd.f32 %v1220_v0, %v683_v59  ;;  %v1354_v6 = vadd.f32 %v1353_v62, %v1291_v61  ;;  %897 = vst [vmem:[%s1938_s17 + $0x98] sm:$0xff] %v1678_v1  ;;  %929 = vst [vmem:[%s1938_s17 + $0x198] sm:$0xff] %v2038_v2  ;;  %v1295_v22 = vmul.f32 %v1678_v1, %v1678_v1 }
 0x113   : > { %v686_v7 = vpop.f32.mrf.mxu0  ;;  %v2043_v8 = vpop.f32.mrf.mxu1 }
 0x114   : > { %v1355_v10 = vadd.f32 %v1354_v6, %v1292_v5  ;;  %895 = vst [vmem:[%s1938_s17 + $0x88] sm:$0xff] %v686_v7  ;;  %v1222_v11 = vadd.f32 %v1221_v3, %v686_v7  ;;  %v1293_v12 = vmul.f32 %v686_v7, %v686_v7  ;;  %927 = vst [vmem:[%s1938_s17 + $0x188] sm:$0xff] %v2043_v8 }
 0x115   : > { %v1681_v13 = vpop.f32.mrf.mxu0  ;;  %v2048_v15 = vpop.f32.mrf.mxu1 }
 0x116   : > { %v1223_v17 = vadd.f32 %v1677_v52, %v1222_v11  ;;  %v1356_v18 = vadd.f32 %v1355_v10, %v1293_v12  ;;  %900 = vst [vmem:[%s1938_s17 + $0xb0] sm:$0xff] %v1681_v13  ;;  %932 = vst [vmem:[%s1938_s17 + $0x1b0] sm:$0xff] %v2048_v15  ;;  %v1298_v42 = vmul.f32 %v1681_v13, %v1681_v13 }
 0x117   : > { %v699_v20 = vpop.f32.mrf.mxu0  ;;  %v2053_v21 = vpop.f32.mrf.mxu1 }
 0x118   : > { %v1357_v23 = vadd.f32 %v1356_v18, %v1294_v16  ;;  %898 = vst [vmem:[%s1938_s17 + $0xa0] sm:$0xff] %v699_v20  ;;  %v1224_v25 = vadd.f32 %v1678_v1, %v1223_v17  ;;  %930 = vst [vmem:[%s1938_s17 + $0x1a0] sm:$0xff] %v2053_v21  ;;  %v1296_v30 = vmul.f32 %v699_v20, %v699_v20 }
 0x119   : > { %v1682_v26 = vpop.f32.mrf.mxu0  ;;  %v2058_v27 = vpop.f32.mrf.mxu1 }
 0x11a   : > { %v1225_v28 = vadd.f32 %v1224_v25, %v699_v20  ;;  %v1358_v31 = vadd.f32 %v1357_v23, %v1295_v22  ;;  %901 = vst [vmem:[%s1938_s17 + $0xb8] sm:$0xff] %v1682_v26  ;;  %933 = vst [vmem:[%s1938_s17 + $0x1b8] sm:$0xff] %v2058_v27  ;;  %v1299_v51 = vmul.f32 %v1682_v26, %v1682_v26 }
 0x11b   : > { %v702_v32 = vpop.f32.mrf.mxu0  ;;  %v2063_v33 = vpop.f32.mrf.mxu1 }
 0x11c   : > { %v1359_v35 = vadd.f32 %v1358_v31, %v1296_v30  ;;  %899 = vst [vmem:[%s1938_s17 + $0xa8] sm:$0xff] %v702_v32  ;;  %v1226_v36 = vadd.f32 %v1225_v28, %v702_v32  ;;  %v1297_v37 = vmul.f32 %v702_v32, %v702_v32  ;;  %931 = vst [vmem:[%s1938_s17 + $0x1a8] sm:$0xff] %v2063_v33 }
 0x11d   : > { %v1685_v38 = vpop.f32.mrf.mxu0  ;;  %v2068_v40 = vpop.f32.mrf.mxu1 }
 0x11e   : > { %v1227_v44 = vadd.f32 %v1681_v13, %v1226_v36  ;;  %v1360_v46 = vadd.f32 %v1359_v35, %v1297_v37  ;;  %904 = vst [vmem:[%s1938_s17 + $0xd0] sm:$0xff] %v1685_v38  ;;  %936 = vst [vmem:[%s1938_s17 + $0x1d0] sm:$0xff] %v2068_v40  ;;  %v1302_v11 = vmul.f32 %v1685_v38, %v1685_v38 }
 0x11f   : > { %v715_v49 = vpop.f32.mrf.mxu0  ;;  %v2073_v50 = vpop.f32.mrf.mxu1 }
 0x120   : > { %v1361_v52 = vadd.f32 %v1360_v46, %v1298_v42  ;;  %902 = vst [vmem:[%s1938_s17 + $0xc0] sm:$0xff] %v715_v49  ;;  %v1228_v55 = vadd.f32 %v1682_v26, %v1227_v44  ;;  %934 = vst [vmem:[%s1938_s17 + $0x1c0] sm:$0xff] %v2073_v50  ;;  %v1300_v61 = vmul.f32 %v715_v49, %v715_v49 }
 0x121   : > { %v1686_v56 = vpop.f32.mrf.mxu0  ;;  %v2078_v57 = vpop.f32.mrf.mxu1 }
 0x122   : > { %v1229_v59 = vadd.f32 %v1228_v55, %v715_v49  ;;  %v1362_v62 = vadd.f32 %v1361_v52, %v1299_v51  ;;  %905 = vst [vmem:[%s1938_s17 + $0xd8] sm:$0xff] %v1686_v56  ;;  %937 = vst [vmem:[%s1938_s17 + $0x1d8] sm:$0xff] %v2078_v57  ;;  %v1303_v18 = vmul.f32 %v1686_v56, %v1686_v56 }
 0x123   : > { %v718_v0 = vpop.f32.mrf.mxu0  ;;  %v2083_v1 = vpop.f32.mrf.mxu1  ;;  %v1308_v52 = vmul.f32 %v1947_v43, %v1947_v43 }
 0x124   : > { %v1363_v3 = vadd.f32 %v1362_v62, %v1300_v61  ;;  %903 = vst [vmem:[%s1938_s17 + $0xc8] sm:$0xff] %v718_v0  ;;  %v1230_v5 = vadd.f32 %v1229_v59, %v718_v0  ;;  %v1301_v6 = vmul.f32 %v718_v0, %v718_v0  ;;  %935 = vst [vmem:[%s1938_s17 + $0x1c8] sm:$0xff] %v2083_v1 }
 0x125   : > { %v1689_v7 = vpop.f32.mrf.mxu0  ;;  %v2088_v10 = vpop.f32.mrf.mxu1  ;;  %v1309_v61 = vmul.f32 %v1963_v48, %v1963_v48  ;;  %v1310_v0 = vmul.f32 %v1941_v41, %v1941_v41 }
 0x126   : > { %v1231_v12 = vadd.f32 %v1685_v38, %v1230_v5  ;;  %v1364_v13 = vadd.f32 %v1363_v3, %v1301_v6  ;;  %908 = vst [vmem:[%s1938_s17 + $0xf0] sm:$0xff] %v1689_v7  ;;  %940 = vst [vmem:[%s1938_s17 + $0x1f0] sm:$0xff] %v2088_v10  ;;  %v1306_v38 = vmul.f32 %v1689_v7, %v1689_v7 }
 0x127   : > { %v731_v16 = vpop.f32.mrf.mxu0  ;;  %v2093_v17 = vpop.f32.mrf.mxu1  ;;  %v1311_v6 = vmul.f32 %v1952_v45, %v1952_v45 }
 0x128   : > { %v1365_v20 = vadd.f32 %v1364_v13, %v1302_v11  ;;  %906 = vst [vmem:[%s1938_s17 + $0xe0] sm:$0xff] %v731_v16  ;;  %v1232_v22 = vadd.f32 %v1686_v56, %v1231_v12  ;;  %938 = vst [vmem:[%s1938_s17 + $0x1e0] sm:$0xff] %v2093_v17  ;;  %v1304_v28 = vmul.f32 %v731_v16, %v731_v16 }
 0x129   : > { %v1690_v23 = vpop.f32.mrf.mxu0  ;;  %v2098_v25 = vpop.f32.mrf.mxu1  ;;  %v1312_v12 = vmul.f32 %v1973_v58, %v1973_v58 }
 0x12a   : > { %v1233_v26 = vadd.f32 %v1232_v22, %v731_v16  ;;  %v1366_v30 = vadd.f32 %v1365_v20, %v1303_v18  ;;  %909 = vst [vmem:[%s1938_s17 + $0xf8] sm:$0xff] %v1690_v23  ;;  %941 = vst [vmem:[%s1938_s17 + $0x1f8] sm:$0xff] %v2098_v25  ;;  %v1307_v46 = vmul.f32 %v1690_v23, %v1690_v23 }
 0x12b   : > { %v734_v31 = vpop.f32.mrf.mxu0  ;;  %v2103_v32 = vpop.f32.mrf.mxu1  ;;  %v1313_v18 = vmul.f32 %v1983_v4, %v1983_v4 }
 0x12c   : > { %v1367_v35 = vadd.f32 %v1366_v30, %v1304_v28  ;;  %907 = vst [vmem:[%s1938_s17 + $0xe8] sm:$0xff] %v734_v31  ;;  %v1234_v36 = vadd.f32 %v1233_v26, %v734_v31  ;;  %v1305_v37 = vmul.f32 %v734_v31, %v734_v31  ;;  %939 = vst [vmem:[%s1938_s17 + $0x1e8] sm:$0xff] %v2103_v32 }
 0x12d   : > { %v1316_v28 = vmul.f32 %v1993_v14, %v1993_v14 }
 0x12e   : > { %v1235_v42 = vadd.f32 %v1689_v7, %v1234_v36  ;;  %v1368_v44 = vadd.f32 %v1367_v35, %v1305_v37  ;;  %v1317_v35 = vmul.f32 %v2003_v24, %v2003_v24 }
 0x130   : > { %v1369_v49 = vadd.f32 %v1368_v44, %v1306_v38  ;;  %v1236_v51 = vadd.f32 %v1690_v23, %v1235_v42  ;;  %v1320_v44 = vmul.f32 %v2013_v34, %v2013_v34 }
 0x132   : > { %v1237_v55 = vadd.f32 %v1236_v51, %v1947_v43  ;;  %v1370_v56 = vadd.f32 %v1369_v49, %v1307_v46  ;;  %v1321_v51 = vmul.f32 %v2023_v47, %v2023_v47 }
 0x134   : > { %v1238_v59 = vadd.f32 %v1237_v55, %v1963_v48  ;;  %v1371_v62 = vadd.f32 %v1370_v56, %v1308_v52 }
 0x136   : > { %v1239_v3 = vadd.f32 %v1941_v41, %v1238_v59  ;;  %v1372_v5 = vadd.f32 %v1371_v62, %v1309_v61  ;;  %v1314_v41 = vmul.f32 %v1968_v53, %v1968_v53  ;;  %v1324_v61 = vmul.f32 %v2033_v60, %v2033_v60 }
 0x138   : > { %v1373_v7 = vadd.f32 %v1372_v5, %v1310_v0  ;;  %v1240_v11 = vadd.f32 %v1952_v45, %v1239_v3  ;;  %v1315_v45 = vmul.f32 %v1978_v63, %v1978_v63  ;;  %v1325_v3 = vmul.f32 %v2043_v8, %v2043_v8 }
 0x13a   : > { %v1241_v43 = vadd.f32 %v1240_v11, %v1973_v58  ;;  %v1374_v13 = vadd.f32 %v1373_v7, %v1311_v6 }
 0x13c   : > { %v1375_v48 = vadd.f32 %v1374_v13, %v1312_v12  ;;  %v1242_v16 = vadd.f32 %v1241_v43, %v1983_v4  ;;  %v1328_v43 = vmul.f32 %v2053_v21, %v2053_v21 }
 0x13e   : > { %v1243_v20 = vadd.f32 %v1968_v53, %v1242_v16  ;;  %v1376_v22 = vadd.f32 %v1375_v48, %v1313_v18  ;;  %v1318_v53 = vmul.f32 %v1988_v9, %v1988_v9  ;;  %v1329_v48 = vmul.f32 %v2063_v33, %v2063_v33 }
 0x140   : > { %v1377_v23 = vadd.f32 %v1376_v22, %v1314_v41  ;;  %v1244_v26 = vadd.f32 %v1978_v63, %v1243_v20  ;;  %v1319_v63 = vmul.f32 %v1998_v19, %v1998_v19  ;;  %v1332_v22 = vmul.f32 %v2073_v50, %v2073_v50 }
 0x142   : > { %v1245_v58 = vadd.f32 %v1244_v26, %v1993_v14  ;;  %v1378_v30 = vadd.f32 %v1377_v23, %v1315_v45  ;;  %v1333_v26 = vmul.f32 %v2083_v1, %v2083_v1 }
 0x144   : > { %v1379_v31 = vadd.f32 %v1378_v30, %v1316_v28  ;;  %v1246_v4 = vadd.f32 %v1245_v58, %v2003_v24 }
 0x146   : > { %v1247_v36 = vadd.f32 %v1988_v9, %v1246_v4  ;;  %v1380_v37 = vadd.f32 %v1379_v31, %v1317_v35  ;;  %v1322_v9 = vmul.f32 %v2008_v29, %v2008_v29  ;;  %v1336_v4 = vmul.f32 %v2093_v17, %v2093_v17 }
 0x148   : > { %v1381_v38 = vadd.f32 %v1380_v37, %v1318_v53  ;;  %v1248_v42 = vadd.f32 %v1998_v19, %v1247_v36  ;;  %v1323_v19 = vmul.f32 %v2018_v39, %v2018_v39  ;;  %v1337_v36 = vmul.f32 %v2103_v32, %v2103_v32 }
 0x14a   : > { %v1249_v14 = vadd.f32 %v1248_v42, %v2013_v34  ;;  %v1382_v46 = vadd.f32 %v1381_v38, %v1319_v63 }
 0x14c   : > { %v1383_v49 = vadd.f32 %v1382_v46, %v1320_v44  ;;  %v1250_v24 = vadd.f32 %v1249_v14, %v2023_v47 }
 0x14e   : > { %v1251_v52 = vadd.f32 %v2008_v29, %v1250_v24  ;;  %v1384_v55 = vadd.f32 %v1383_v49, %v1321_v51  ;;  %v1326_v29 = vmul.f32 %v2028_v54, %v2028_v54 }
 0x150   : > { %v1385_v56 = vadd.f32 %v1384_v55, %v1322_v9  ;;  %v1252_v59 = vadd.f32 %v2018_v39, %v1251_v52  ;;  %v1327_v39 = vmul.f32 %v2038_v2, %v2038_v2 }
 0x152   : > { %v1253_v34 = vadd.f32 %v1252_v59, %v2033_v60  ;;  %v1386_v62 = vadd.f32 %v1385_v56, %v1323_v19 }
 0x154   : > { %v1387_v0 = vadd.f32 %v1386_v62, %v1324_v61  ;;  %v1254_v47 = vadd.f32 %v1253_v34, %v2043_v8 }
 0x156   : > { %v1255_v5 = vadd.f32 %v2028_v54, %v1254_v47  ;;  %v1388_v6 = vadd.f32 %v1387_v0, %v1325_v3  ;;  %v1330_v54 = vmul.f32 %v2048_v15, %v2048_v15 }
 0x158   : > { %v1389_v7 = vadd.f32 %v1388_v6, %v1326_v29  ;;  %v1256_v11 = vadd.f32 %v2038_v2, %v1255_v5  ;;  %v1331_v2 = vmul.f32 %v2058_v27, %v2058_v27 }
 0x15a   : > { %v1257_v60 = vadd.f32 %v1256_v11, %v2053_v21  ;;  %v1390_v12 = vadd.f32 %v1389_v7, %v1327_v39 }
 0x15c   : > { %v1391_v13 = vadd.f32 %v1390_v12, %v1328_v43  ;;  %v1258_v8 = vadd.f32 %v1257_v60, %v2063_v33 }
 0x15e   : > { %v1259_v16 = vadd.f32 %v2048_v15, %v1258_v8  ;;  %v1392_v18 = vadd.f32 %v1391_v13, %v1329_v48  ;;  %v1334_v15 = vmul.f32 %v2068_v40, %v2068_v40 }
 0x160   : > { %v1393_v41 = vadd.f32 %v1392_v18, %v1330_v54  ;;  %v1260_v20 = vadd.f32 %v2058_v27, %v1259_v16  ;;  %v1335_v27 = vmul.f32 %v2078_v57, %v2078_v57 }
 0x162   : > { %v1261_v21 = vadd.f32 %v1260_v20, %v2073_v50  ;;  %v1394_v45 = vadd.f32 %v1393_v41, %v1331_v2 }
 0x164   : > { %v1395_v23 = vadd.f32 %v1394_v45, %v1332_v22  ;;  %v1262_v33 = vadd.f32 %v1261_v21, %v2083_v1 }
 0x166   : > { %v1263_v58 = vadd.f32 %v2068_v40, %v1262_v33  ;;  %v1396_v28 = vadd.f32 %v1395_v23, %v1333_v26  ;;  %v1338_v40 = vmul.f32 %v2088_v10, %v2088_v10 }
 0x168   : > { %v1397_v30 = vadd.f32 %v1396_v28, %v1334_v15  ;;  %v1264_v31 = vadd.f32 %v2078_v57, %v1263_v58  ;;  %v1339_v57 = vmul.f32 %v2098_v25, %v2098_v25 }
 0x16a   : > { %v1265_v50 = vadd.f32 %v1264_v31, %v2093_v17  ;;  %v1398_v35 = vadd.f32 %v1397_v30, %v1335_v27 }
 0x16c   : > { %v1399_v53 = vadd.f32 %v1398_v35, %v1336_v4  ;;  %v1266_v1 = vadd.f32 %v1265_v50, %v2103_v32 }
 0x16e   : > { %v1267_v37 = vadd.f32 %v2088_v10, %v1266_v1  ;;  %v1400_v63 = vadd.f32 %v1399_v53, %v1337_v36 }
 0x170   : > { %v1268_v38 = vadd.f32 %v2098_v25, %v1267_v37  ;;  %v1401_v17 = vadd.f32 %v1400_v63, %v1338_v40 }
 0x172   : > { %v1269_v42 = vrot.slane %v1268_v38, 4  ;;  %v1402_v14 = vadd.f32 %v1401_v17, %v1339_v57 }
 0x174   : > { %v1270_v44 = vadd.f32 %v1269_v42, %v1268_v38  ;;  %v1403_v46 = vrot.slane %v1402_v14, 4 }
 0x176   : > { %v1271_v49 = vrot.slane %v1270_v44, 2  ;;  %v1404_v32 = vadd.f32 %v1403_v46, %v1402_v14 }
 0x178   : > { %v1272_v24 = vadd.f32 %v1271_v49, %v1270_v44  ;;  %v1405_v51 = vrot.slane %v1404_v32, 2 }
 0x17a   : > { %v1273_v9 = vrot.slane %v1272_v24, 1  ;;  %v1406_v52 = vadd.f32 %v1405_v51, %v1404_v32 }
 0x17c   : > { %v1274_v10 = vadd.f32 %v1273_v9, %v1272_v24  ;;  %v1407_v55 = vrot.slane %v1406_v52, 1 }
 0x17e   : > { %1275 = vst [vmem:[%s1957_s21] sm:$0x1] %v1274_v10  ;;  %v1408_v19 = vadd.f32 %v1407_v55, %v1406_v52 }
 0x180   : > { %1409 = vst [vmem:[%s1957_s21 + $0x1] sm:$0x1] %v1408_v19 }
 0x181 PF: > { %s14_s14 = sadd.s32 1, %s1826_s14   ;;  %s2219_s12 = smov %s1822_s13 }
 0x182   : > { %p11_p6 = scmp.ge.s32.totalorder %s14_s14, 4   ;;  %s2220_s13 = smov %s2222_s15 }
 0x184   :  { %13 = sbr.rel (!%p11_p6) target bundleno = 2 (0x2), region = 85 }

// kernel: residual_branch3d.5
= control target key start
LH: loop header
LB: loop body
LE: loop exit
PB: predicated region body
PF: predicated region fallthrough
CT: control target
= control target key end

     0   :  { %s3025_s12 = smov 0   ;;  %s3027_s13 = smov 0   ;;  %s3537_s0 = inlined_call_operand.vmem [shape: bf16[1024,512], index: 0, kind: input, shape index: {}]   ;;  %s3538_s1 = inlined_call_operand.vmem [shape: bf16[512,128], index: 1, kind: input, shape index: {}]   ;;  %s3539_s2 = inlined_call_operand.vmem [shape: f32[1024,128], index: 2, kind: output, shape index: {0}]   ;;  %s3540_s3 = inlined_call_operand.vmem [shape: f32[16,128], index: 3, kind: output, shape index: {1}]  }
   0x1   :  { %s3029_s14 = smov 0  }
   0x2 LB: > { %s33_s15 = sadd.s32 1, %s2997_s13  ;;  %p2559_p0 = scmp.ge.s32.totalorder %s3001_s14, 1  ;;  %s3001_s14 = sphi %s3029_s14, %s14_s14   ;;  %s2997_s13 = sphi %s3027_s13, %s3542_s13   ;;  %s2993_s12 = sphi %s3025_s12, %s3541_s12  }
   0x3   : > { %p35_p1 = scmp.ge.s32.totalorder %s33_s15, 2  ;;  %p188_p2 = scmp.lt.s32.totalorder %s3001_s14, 3 }
   0x5   : > { %s3544_s15 = smov (%p35_p1, %s33_s15), 0  ;;  %p189_p3 = pnand %p2559_p0, %p188_p2 }
   0x6   : > { %s2560_s9 = sshll.u32 (!%p189_p3), %s2993_s12, 6  ;;  %p265_p5 = scmp.lt.s32.totalorder (!%p189_p3), %s2993_s12, 1 }
   0x7   : > { %192 = sbr.rel (%p189_p3) target bundleno = 541 (0x21d), region = 28  ;;  %p237_p4 = scmp.lt.s32.totalorder (!%p189_p3), %s2560_s9, 127 }
   0xc   : > { %v2755_v0 = vld [vmem:[%s3538_s1 + $0x38] sm:$0xff]   ;;  %v3003_v1 = vmov 0   ;;  %v2757_v3 = vld [vmem:[%s3538_s1 + $0x30] sm:$0xff]   ;;  %v2759_v5 = vld [vmem:[%s3538_s1 + $0x28] sm:$0xff]   ;;  %s3546_s9 = smov (!%p237_p4, %s2560_s9), 127  ;;  %s3548_s12 = smov (!%p265_p5, %s2993_s12), 1 }
   0xd   : > { %1297 = vmatprep.subr.bf16.mxu0 %v3003_v1  ;;  %1586 = vmatprep.subr.bf16.mxu1 %v3003_v1  ;;  %v2756_v2 = vld [vmem:[%s3538_s1 + $0xb8] sm:$0xff]   ;;  %v2758_v4 = vld [vmem:[%s3538_s1 + $0xb0] sm:$0xff]   ;;  %v2760_v6 = vld [vmem:[%s3538_s1 + $0xa8] sm:$0xff]   ;;  %s2728_s26 = sshll.u32 %s3546_s9, 4  ;;  %s2564_s19 = sshll.u32 %s3546_s9, 3 }
   0xe   : > { %1298 = vmatpush1.bf16.msra.mxu0 %v2755_v0  ;;  %1587 = vmatpush1.bf16.msra.mxu1 %v2756_v2  ;;  %v2761_v7 = vld [vmem:[%s3538_s1 + $0x20] sm:$0xff]   ;;  %v2763_v9 = vld [vmem:[%s3538_s1 + $0x18] sm:$0xff]   ;;  %v2765_v11 = vld [vmem:[%s3538_s1 + $0x10] sm:$0xff]   ;;  %s3119_s4 = scalar_lea.vmem %s3537_s0, %s2728_s26  ;;  %s3288_s22 = scalar_lea.vmem %s3539_s2, %s2564_s19 }
   0xf   : > { %1299 = vmatprep.subr.bf16.mxu0 %v3003_v1  ;;  %1588 = vmatprep.subr.bf16.mxu1 %v3003_v1  ;;  %v2762_v8 = vld [vmem:[%s3538_s1 + $0xa0] sm:$0xff]   ;;  %v2764_v10 = vld [vmem:[%s3538_s1 + $0x98] sm:$0xff]   ;;  %v2766_v12 = vld [vmem:[%s3538_s1 + $0x90] sm:$0xff]   ;;  %s2565_s9 = sshll.u32 %s3548_s12, 3 }
  0x10   : > { %v2767_v13 = vld [vmem:[%s3538_s1 + $0x8] sm:$0xff]   ;;  %v2769_v15 = vld [vmem:[%s3538_s1] sm:$0xff]   ;;  %v2771_v17 = vld [vmem:[%s3538_s1 + $0x78] sm:$0xff]   ;;  %s3359_s24 = scalar_lea.vmem %s3540_s3, %s2565_s9 }
  0x11   : > { %v2768_v14 = vld [vmem:[%s3538_s1 + $0x88] sm:$0xff]   ;;  %v2770_v16 = vld [vmem:[%s3538_s1 + $0x80] sm:$0xff]   ;;  %v2772_v18 = vld [vmem:[%s3538_s1 + $0xf8] sm:$0xff]  }
  0x12   : > { %1300 = vmatpush1.bf16.msra.mxu0 %v2757_v3  ;;  %1589 = vmatpush1.bf16.msra.mxu1 %v2758_v4  ;;  %v2789_v19 = vld [vmem:[%s3119_s4 + $0x4] ss:$16 sps:$4 sm:$0xff]   ;;  %v2792_v21 = vld [vmem:[%s3119_s4 + $0xc] ss:$16 sps:$4 sm:$0xff]   ;;  %v2787_v35 = vld [vmem:[%s3119_s4] ss:$16 sps:$4 sm:$0xff]  }
  0x13   : > { %1301 = vmatprep.subr.bf16.mxu0 %v3003_v1  ;;  %1590 = vmatprep.subr.bf16.mxu1 %v3003_v1  ;;  %v2773_v20 = vld [vmem:[%s3538_s1 + $0x70] sm:$0xff]   ;;  %v2775_v23 = vld [vmem:[%s3538_s1 + $0x68] sm:$0xff]   ;;  %v2777_v25 = vld [vmem:[%s3538_s1 + $0x60] sm:$0xff]  }
  0x14   : > { %v2774_v22 = vld [vmem:[%s3538_s1 + $0xf0] sm:$0xff]   ;;  %1329 = vmatprep.mubr.bf16.mxu0 %v2789_v19  ;;  %1618 = vmatprep.mubr.bf16.mxu1 %v2792_v21  ;;  %v2776_v24 = vld [vmem:[%s3538_s1 + $0xe8] sm:$0xff]   ;;  %v2778_v26 = vld [vmem:[%s3538_s1 + $0xe0] sm:$0xff]  }
  0x15   : > { %v2779_v27 = vld [vmem:[%s3538_s1 + $0x58] sm:$0xff]   ;;  %v2781_v29 = vld [vmem:[%s3538_s1 + $0x50] sm:$0xff]   ;;  %v2783_v31 = vld [vmem:[%s3538_s1 + $0x48] sm:$0xff]  }
  0x16   : > { %1302 = vmatpush1.bf16.msra.mxu0 %v2759_v5  ;;  %1591 = vmatpush1.bf16.msra.mxu1 %v2760_v6  ;;  %v2780_v28 = vld [vmem:[%s3538_s1 + $0xd8] sm:$0xff]   ;;  %v2782_v30 = vld [vmem:[%s3538_s1 + $0xd0] sm:$0xff]   ;;  %v2784_v32 = vld [vmem:[%s3538_s1 + $0xc8] sm:$0xff]  }
  0x17   : > { %1303 = vmatprep.subr.bf16.mxu0 %v3003_v1  ;;  %1592 = vmatprep.subr.bf16.mxu1 %v3003_v1  ;;  %v2785_v33 = vld [vmem:[%s3538_s1 + $0x40] sm:$0xff]   ;;  %v2790_v36 = vld [vmem:[%s3119_s4 + $0x8] ss:$16 sps:$4 sm:$0xff]   ;;  %v2795_v38 = vld [vmem:[%s3119_s4 + $0x2c] ss:$16 sps:$4 sm:$0xff]  }
  0x18   : > { %v2786_v34 = vld [vmem:[%s3538_s1 + $0xc0] sm:$0xff]   ;;  %v2798_v40 = vld [vmem:[%s3119_s4 + $0x28] ss:$16 sps:$4 sm:$0xff]   ;;  %v2801_v42 = vld [vmem:[%s3119_s4 + $0x4c] ss:$16 sps:$4 sm:$0xff]  }
  0x19   : > { %v2793_v37 = vld [vmem:[%s3119_s4 + $0x24] ss:$16 sps:$4 sm:$0xff]   ;;  %v2797_v39 = vld [vmem:[%s3119_s4 + $0x20] ss:$16 sps:$4 sm:$0xff]   ;;  %v2804_v44 = vld [vmem:[%s3119_s4 + $0x48] ss:$16 sps:$4 sm:$0xff]  }
  0x1a   : > { %1304 = vmatpush1.bf16.msra.mxu0 %v2761_v7  ;;  %1593 = vmatpush1.bf16.msra.mxu1 %v2762_v8  ;;  %v2799_v41 = vld [vmem:[%s3119_s4 + $0x44] ss:$16 sps:$4 sm:$0xff]   ;;  %v2803_v43 = vld [vmem:[%s3119_s4 + $0x40] ss:$16 sps:$4 sm:$0xff]   ;;  %v2807_v46 = vld [vmem:[%s3119_s4 + $0x6c] ss:$16 sps:$4 sm:$0xff]  }
  0x1b   : > { %1305 = vmatprep.subr.bf16.mxu0 %v3003_v1  ;;  %1594 = vmatprep.subr.bf16.mxu1 %v3003_v1  ;;  %v2805_v45 = vld [vmem:[%s3119_s4 + $0x64] ss:$16 sps:$4 sm:$0xff]   ;;  %v2809_v47 = vld [vmem:[%s3119_s4 + $0x60] ss:$16 sps:$4 sm:$0xff]   ;;  %v2810_v48 = vld [vmem:[%s3119_s4 + $0x68] ss:$16 sps:$4 sm:$0xff]  }
  0x1c   : > { %v2811_v49 = vld [vmem:[%s3119_s4 + $0x84] ss:$16 sps:$4 sm:$0xff]   ;;  %v2813_v50 = vld [vmem:[%s3119_s4 + $0x8c] ss:$16 sps:$4 sm:$0xff]   ;;  %v2815_v51 = vld [vmem:[%s3119_s4 + $0x80] ss:$16 sps:$4 sm:$0xff]  }
  0x1d   : > { %v2816_v52 = vld [vmem:[%s3119_s4 + $0x88] ss:$16 sps:$4 sm:$0xff]   ;;  %v2817_v53 = vld [vmem:[%s3119_s4 + $0xa4] ss:$16 sps:$4 sm:$0xff]   ;;  %v2819_v54 = vld [vmem:[%s3119_s4 + $0xac] ss:$16 sps:$4 sm:$0xff]  }
  0x1e   : > { %1306 = vmatpush1.bf16.msra.mxu0 %v2763_v9  ;;  %1595 = vmatpush1.bf16.msra.mxu1 %v2764_v10  ;;  %v2821_v55 = vld [vmem:[%s3119_s4 + $0xa0] ss:$16 sps:$4 sm:$0xff]   ;;  %v2822_v56 = vld [vmem:[%s3119_s4 + $0xa8] ss:$16 sps:$4 sm:$0xff]   ;;  %v2823_v57 = vld [vmem:[%s3119_s4 + $0xc4] ss:$16 sps:$4 sm:$0xff]  }
  0x1f   : > { %1307 = vmatprep.subr.bf16.mxu0 %v3003_v1  ;;  %1596 = vmatprep.subr.bf16.mxu1 %v3003_v1  ;;  %v2825_v58 = vld [vmem:[%s3119_s4 + $0xcc] ss:$16 sps:$4 sm:$0xff]   ;;  %v2827_v59 = vld [vmem:[%s3119_s4 + $0xc0] ss:$16 sps:$4 sm:$0xff]   ;;  %v2828_v60 = vld [vmem:[%s3119_s4 + $0xc8] ss:$16 sps:$4 sm:$0xff]  }
  0x20   : > { %v2829_v61 = vld [vmem:[%s3119_s4 + $0xe4] ss:$16 sps:$4 sm:$0xff]   ;;  %v2831_v62 = vld [vmem:[%s3119_s4 + $0xec] ss:$16 sps:$4 sm:$0xff]   ;;  %v2833_v63 = vld [vmem:[%s3119_s4 + $0xe0] ss:$16 sps:$4 sm:$0xff]  }
  0x21   : > { %v2834_v0 = vld [vmem:[%s3119_s4 + $0xe8] ss:$16 sps:$4 sm:$0xff]   ;;  %v2837_v2 = vld [vmem:[%s3119_s4 + $0x10c] ss:$16 sps:$4 sm:$0xff]   ;;  %v2839_v3 = vld [vmem:[%s3119_s4 + $0x100] ss:$16 sps:$4 sm:$0xff]  }
  0x22   : > { %1308 = vmatpush1.bf16.msra.mxu0 %v2765_v11  ;;  %1597 = vmatpush1.bf16.msra.mxu1 %v2766_v12  ;;  %v2840_v4 = vld [vmem:[%s3119_s4 + $0x108] ss:$16 sps:$4 sm:$0xff]   ;;  %v2841_v5 = vld [vmem:[%s3119_s4 + $0x124] ss:$16 sps:$4 sm:$0xff]   ;;  %v2843_v6 = vld [vmem:[%s3119_s4 + $0x12c] ss:$16 sps:$4 sm:$0xff]  }
  0x23   : > { %1309 = vmatprep.subr.bf16.mxu0 %v3003_v1  ;;  %1598 = vmatprep.subr.bf16.mxu1 %v3003_v1  ;;  %v2845_v7 = vld [vmem:[%s3119_s4 + $0x120] ss:$16 sps:$4 sm:$0xff]   ;;  %v2846_v8 = vld [vmem:[%s3119_s4 + $0x128] ss:$16 sps:$4 sm:$0xff]   ;;  %v2847_v9 = vld [vmem:[%s3119_s4 + $0x144] ss:$16 sps:$4 sm:$0xff]  }
  0x24   : > { %v2849_v10 = vld [vmem:[%s3119_s4 + $0x14c] ss:$16 sps:$4 sm:$0xff]   ;;  %v2851_v11 = vld [vmem:[%s3119_s4 + $0x140] ss:$16 sps:$4 sm:$0xff]   ;;  %v2852_v12 = vld [vmem:[%s3119_s4 + $0x148] ss:$16 sps:$4 sm:$0xff]  }
  0x25   : > { %v2863_v19 = vld [vmem:[%s3119_s4 + $0x180] ss:$16 sps:$4 sm:$0xff]   ;;  %v2865_v21 = vld [vmem:[%s3119_s4 + $0x1a4] ss:$16 sps:$4 sm:$0xff]  }
  0x26   : > { %1310 = vmatpush1.bf16.msra.mxu0 %v2767_v13  ;;  %1599 = vmatpush1.bf16.msra.mxu1 %v2768_v14  ;;  %v2853_v13 = vld [vmem:[%s3119_s4 + $0x164] ss:$16 sps:$4 sm:$0xff]   ;;  %v2855_v14 = vld [vmem:[%s3119_s4 + $0x16c] ss:$16 sps:$4 sm:$0xff]  }
  0x27   : > { %1311 = vmatprep.subr.bf16.mxu0 %v3003_v1  ;;  %1600 = vmatprep.subr.bf16.mxu1 %v3003_v1 }
  0x2a   : > { %1312 = vmatpush1.bf16.msra.mxu0 %v2769_v15  ;;  %1601 = vmatpush1.bf16.msra.mxu1 %v2770_v16  ;;  %v2857_v15 = vld [vmem:[%s3119_s4 + $0x160] ss:$16 sps:$4 sm:$0xff]   ;;  %v2858_v16 = vld [vmem:[%s3119_s4 + $0x168] ss:$16 sps:$4 sm:$0xff]  }
  0x2b   : > { %1313 = vmatprep.subr.bf16.mxu0 %v3003_v1  ;;  %1602 = vmatprep.subr.bf16.mxu1 %v3003_v1 }
  0x2e   : > { %1314 = vmatpush2.bf16.msra.mxu0 %v2771_v17  ;;  %1603 = vmatpush2.bf16.msra.mxu1 %v2772_v18  ;;  %v2859_v17 = vld [vmem:[%s3119_s4 + $0x184] ss:$16 sps:$4 sm:$0xff]   ;;  %v2861_v18 = vld [vmem:[%s3119_s4 + $0x18c] ss:$16 sps:$4 sm:$0xff]  }
  0x2f   : > { %1315 = vmatprep.subr.bf16.mxu0 %v3003_v1  ;;  %1604 = vmatprep.subr.bf16.mxu1 %v3003_v1 }
  0x32   : > { %1316 = vmatpush2.bf16.msra.mxu0 %v2773_v20  ;;  %1605 = vmatpush2.bf16.msra.mxu1 %v2774_v22  ;;  %v2864_v20 = vld [vmem:[%s3119_s4 + $0x188] ss:$16 sps:$4 sm:$0xff]   ;;  %v2867_v22 = vld [vmem:[%s3119_s4 + $0x1ac] ss:$16 sps:$4 sm:$0xff]  }
  0x33   : > { %1317 = vmatprep.subr.bf16.mxu0 %v3003_v1  ;;  %1606 = vmatprep.subr.bf16.mxu1 %v3003_v1 }
  0x36   : > { %1318 = vmatpush2.bf16.msra.mxu0 %v2775_v23  ;;  %1607 = vmatpush2.bf16.msra.mxu1 %v2776_v24  ;;  %v2869_v23 = vld [vmem:[%s3119_s4 + $0x1a0] ss:$16 sps:$4 sm:$0xff]   ;;  %v2870_v24 = vld [vmem:[%s3119_s4 + $0x1a8] ss:$16 sps:$4 sm:$0xff]  }
  0x37   : > { %1319 = vmatprep.subr.bf16.mxu0 %v3003_v1  ;;  %1608 = vmatprep.subr.bf16.mxu1 %v3003_v1 }
  0x3a   : > { %1320 = vmatpush2.bf16.msra.mxu0 %v2777_v25  ;;  %1609 = vmatpush2.bf16.msra.mxu1 %v2778_v26  ;;  %v2871_v25 = vld [vmem:[%s3119_s4 + $0x1c4] ss:$16 sps:$4 sm:$0xff]   ;;  %v2873_v26 = vld [vmem:[%s3119_s4 + $0x1cc] ss:$16 sps:$4 sm:$0xff]  }
  0x3b   : > { %1321 = vmatprep.subr.bf16.mxu0 %v3003_v1  ;;  %1610 = vmatprep.subr.bf16.mxu1 %v3003_v1 }
  0x3e   : > { %1322 = vmatpush2.bf16.msra.mxu0 %v2779_v27  ;;  %1611 = vmatpush2.bf16.msra.mxu1 %v2780_v28  ;;  %v2875_v27 = vld [vmem:[%s3119_s4 + $0x1c0] ss:$16 sps:$4 sm:$0xff]   ;;  %v2876_v28 = vld [vmem:[%s3119_s4 + $0x1c8] ss:$16 sps:$4 sm:$0xff]  }
  0x3f   : > { %1323 = vmatprep.subr.bf16.mxu0 %v3003_v1  ;;  %1612 = vmatprep.subr.bf16.mxu1 %v3003_v1 }
  0x42   : > { %1324 = vmatpush2.bf16.msra.mxu0 %v2781_v29  ;;  %1613 = vmatpush2.bf16.msra.mxu1 %v2782_v30  ;;  %v2877_v29 = vld [vmem:[%s3119_s4 + $0x1e4] ss:$16 sps:$4 sm:$0xff]   ;;  %v2879_v30 = vld [vmem:[%s3119_s4 + $0x1ec] ss:$16 sps:$4 sm:$0xff]  }
  0x43   : > { %1325 = vmatprep.subr.bf16.mxu0 %v3003_v1  ;;  %1614 = vmatprep.subr.bf16.mxu1 %v3003_v1 }
  0x46   : > { %1326 = vmatpush2.bf16.msra.mxu0 %v2783_v31  ;;  %1615 = vmatpush2.bf16.msra.mxu1 %v2784_v32  ;;  %v2881_v31 = vld [vmem:[%s3119_s4 + $0x1e0] ss:$16 sps:$4 sm:$0xff]   ;;  %v2882_v32 = vld [vmem:[%s3119_s4 + $0x1e8] ss:$16 sps:$4 sm:$0xff]  }
  0x47   : > { %1327 = vmatprep.subr.bf16.mxu0 %v3003_v1  ;;  %1616 = vmatprep.subr.bf16.mxu1 %v3003_v1  ;;  %v2835_v1 = vld [vmem:[%s3119_s4 + $0x104] ss:$16 sps:$4 sm:$0xff]  }
  0x4a   : > { %1328 = vmatpush2.bf16.msra.mxu0 %v2785_v33  ;;  %1617 = vmatpush2.bf16.msra.mxu1 %v2786_v34  ;;  %v2883_v33 = vld [vmem:[%s3119_s4 + $0x204] ss:$16 sps:$4 sm:$0xff]   ;;  %v2885_v34 = vld [vmem:[%s3119_s4 + $0x20c] ss:$16 sps:$4 sm:$0xff]  }
  0x4d   : > { %1330 = vmatmul.mubr.bf16.vlgmr.msra.gmra.mxu0 %v2787_v35  ;;  %1619 = vmatmul.mubr.bf16.vlgmr.msra.gmra.mxu1 %v2790_v36  ;;  %v2887_v35 = vld [vmem:[%s3119_s4 + $0x200] ss:$16 sps:$4 sm:$0xff]   ;;  %v2888_v36 = vld [vmem:[%s3119_s4 + $0x208] ss:$16 sps:$4 sm:$0xff]  }
  0x4e   : > { %1337 = vmatprep.mubr.bf16.mxu0 %v2793_v37  ;;  %1626 = vmatprep.mubr.bf16.mxu1 %v2795_v38  ;;  %v2889_v37 = vld [vmem:[%s3119_s4 + $0x224] ss:$16 sps:$4 sm:$0xff]   ;;  %v2891_v38 = vld [vmem:[%s3119_s4 + $0x22c] ss:$16 sps:$4 sm:$0xff]  }
  0x55   : > { %1338 = vmatmul.mubr.bf16.gmra.mxu0 %v2797_v39  ;;  %1627 = vmatmul.mubr.bf16.gmra.mxu1 %v2798_v40  ;;  %v2893_v39 = vld [vmem:[%s3119_s4 + $0x220] ss:$16 sps:$4 sm:$0xff]   ;;  %v2894_v40 = vld [vmem:[%s3119_s4 + $0x228] ss:$16 sps:$4 sm:$0xff]  }
  0x56   : > { %1345 = vmatprep.mubr.bf16.mxu0 %v2799_v41  ;;  %1634 = vmatprep.mubr.bf16.mxu1 %v2801_v42  ;;  %v2895_v41 = vld [vmem:[%s3119_s4 + $0x244] ss:$16 sps:$4 sm:$0xff]   ;;  %v2897_v42 = vld [vmem:[%s3119_s4 + $0x24c] ss:$16 sps:$4 sm:$0xff]  }
  0x5d   : > { %1346 = vmatmul.mubr.bf16.gmra.mxu0 %v2803_v43  ;;  %1635 = vmatmul.mubr.bf16.gmra.mxu1 %v2804_v44  ;;  %v2899_v43 = vld [vmem:[%s3119_s4 + $0x240] ss:$16 sps:$4 sm:$0xff]   ;;  %v2900_v44 = vld [vmem:[%s3119_s4 + $0x248] ss:$16 sps:$4 sm:$0xff]  }
  0x5e   : > { %1353 = vmatprep.mubr.bf16.mxu0 %v2805_v45  ;;  %1642 = vmatprep.mubr.bf16.mxu1 %v2807_v46  ;;  %v2901_v45 = vld [vmem:[%s3119_s4 + $0x264] ss:$16 sps:$4 sm:$0xff]   ;;  %v2903_v46 = vld [vmem:[%s3119_s4 + $0x26c] ss:$16 sps:$4 sm:$0xff]  }
  0x65   : > { %1354 = vmatmul.mubr.bf16.gmra.mxu0 %v2809_v47  ;;  %1643 = vmatmul.mubr.bf16.gmra.mxu1 %v2810_v48  ;;  %v2905_v47 = vld [vmem:[%s3119_s4 + $0x260] ss:$16 sps:$4 sm:$0xff]   ;;  %v2906_v48 = vld [vmem:[%s3119_s4 + $0x268] ss:$16 sps:$4 sm:$0xff]  }
  0x66   : > { %1361 = vmatprep.mubr.bf16.mxu0 %v2811_v49  ;;  %1650 = vmatprep.mubr.bf16.mxu1 %v2813_v50  ;;  %v2907_v49 = vld [vmem:[%s3119_s4 + $0x284] ss:$16 sps:$4 sm:$0xff]   ;;  %v2909_v50 = vld [vmem:[%s3119_s4 + $0x28c] ss:$16 sps:$4 sm:$0xff]  }
  0x6d   : > { %1362 = vmatmul.mubr.bf16.gmra.mxu0 %v2815_v51  ;;  %1651 = vmatmul.mubr.bf16.gmra.mxu1 %v2816_v52  ;;  %v2911_v51 = vld [vmem:[%s3119_s4 + $0x280] ss:$16 sps:$4 sm:$0xff]   ;;  %v2912_v52 = vld [vmem:[%s3119_s4 + $0x288] ss:$16 sps:$4 sm:$0xff]  }
  0x6e   : > { %1369 = vmatprep.mubr.bf16.mxu0 %v2817_v53  ;;  %1658 = vmatprep.mubr.bf16.mxu1 %v2819_v54  ;;  %v2913_v53 = vld [vmem:[%s3119_s4 + $0x2a4] ss:$16 sps:$4 sm:$0xff]   ;;  %v2915_v54 = vld [vmem:[%s3119_s4 + $0x2ac] ss:$16 sps:$4 sm:$0xff]  }
  0x75   : > { %1370 = vmatmul.mubr.bf16.gmra.mxu0 %v2821_v55  ;;  %1659 = vmatmul.mubr.bf16.gmra.mxu1 %v2822_v56  ;;  %v2917_v55 = vld [vmem:[%s3119_s4 + $0x2a0] ss:$16 sps:$4 sm:$0xff]   ;;  %v2918_v56 = vld [vmem:[%s3119_s4 + $0x2a8] ss:$16 sps:$4 sm:$0xff]  }
  0x76   : > { %1377 = vmatprep.mubr.bf16.mxu0 %v2823_v57  ;;  %1666 = vmatprep.mubr.bf16.mxu1 %v2825_v58  ;;  %v2919_v57 = vld [vmem:[%s3119_s4 + $0x2c4] ss:$16 sps:$4 sm:$0xff]   ;;  %v2921_v58 = vld [vmem:[%s3119_s4 + $0x2cc] ss:$16 sps:$4 sm:$0xff]  }
  0x7d   : > { %1378 = vmatmul.mubr.bf16.gmra.mxu0 %v2827_v59  ;;  %1667 = vmatmul.mubr.bf16.gmra.mxu1 %v2828_v60  ;;  %v2923_v59 = vld [vmem:[%s3119_s4 + $0x2c0] ss:$16 sps:$4 sm:$0xff]   ;;  %v2924_v60 = vld [vmem:[%s3119_s4 + $0x2c8] ss:$16 sps:$4 sm:$0xff]  }
  0x7e   : > { %1385 = vmatprep.mubr.bf16.mxu0 %v2829_v61  ;;  %1674 = vmatprep.mubr.bf16.mxu1 %v2831_v62  ;;  %v2925_v61 = vld [vmem:[%s3119_s4 + $0x2e4] ss:$16 sps:$4 sm:$0xff]   ;;  %v2927_v62 = vld [vmem:[%s3119_s4 + $0x2ec] ss:$16 sps:$4 sm:$0xff]  }
  0x85   : > { %1386 = vmatmul.mubr.bf16.gmra.mxu0 %v2833_v63  ;;  %1675 = vmatmul.mubr.bf16.gmra.mxu1 %v2834_v0  ;;  %v2929_v63 = vld [vmem:[%s3119_s4 + $0x2e0] ss:$16 sps:$4 sm:$0xff]   ;;  %v2930_v0 = vld [vmem:[%s3119_s4 + $0x2e8] ss:$16 sps:$4 sm:$0xff]  }
  0x86   : > { %1393 = vmatprep.mubr.bf16.mxu0 %v2835_v1  ;;  %1682 = vmatprep.mubr.bf16.mxu1 %v2837_v2  ;;  %v2931_v1 = vld [vmem:[%s3119_s4 + $0x304] ss:$16 sps:$4 sm:$0xff]   ;;  %v2933_v2 = vld [vmem:[%s3119_s4 + $0x30c] ss:$16 sps:$4 sm:$0xff]  }
  0x8d   : > { %1394 = vmatmul.mubr.bf16.gmra.mxu0 %v2839_v3  ;;  %1683 = vmatmul.mubr.bf16.gmra.mxu1 %v2840_v4  ;;  %v2935_v3 = vld [vmem:[%s3119_s4 + $0x300] ss:$16 sps:$4 sm:$0xff]   ;;  %v2936_v4 = vld [vmem:[%s3119_s4 + $0x308] ss:$16 sps:$4 sm:$0xff]  }
  0x8e   : > { %1401 = vmatprep.mubr.bf16.mxu0 %v2841_v5  ;;  %1690 = vmatprep.mubr.bf16.mxu1 %v2843_v6  ;;  %v2937_v5 = vld [vmem:[%s3119_s4 + $0x324] ss:$16 sps:$4 sm:$0xff]   ;;  %v2939_v6 = vld [vmem:[%s3119_s4 + $0x32c] ss:$16 sps:$4 sm:$0xff]  }
  0x95   : > { %1402 = vmatmul.mubr.bf16.gmra.mxu0 %v2845_v7  ;;  %1691 = vmatmul.mubr.bf16.gmra.mxu1 %v2846_v8 }
  0x96   : > { %1409 = vmatprep.mubr.bf16.mxu0 %v2847_v9  ;;  %1698 = vmatprep.mubr.bf16.mxu1 %v2849_v10 }
  0x9d   : > { %1410 = vmatmul.mubr.bf16.gmra.mxu0 %v2851_v11  ;;  %1699 = vmatmul.mubr.bf16.gmra.mxu1 %v2852_v12 }
  0x9e   : > { %1417 = vmatprep.mubr.bf16.mxu0 %v2853_v13  ;;  %1706 = vmatprep.mubr.bf16.mxu1 %v2855_v14  ;;  %v2941_v13 = vld [vmem:[%s3119_s4 + $0x320] ss:$16 sps:$4 sm:$0xff]  }
  0xa5   : > { %1418 = vmatmul.mubr.bf16.gmra.mxu0 %v2857_v15  ;;  %1707 = vmatmul.mubr.bf16.gmra.mxu1 %v2858_v16  ;;  %v2942_v15 = vld [vmem:[%s3119_s4 + $0x328] ss:$16 sps:$4 sm:$0xff]   ;;  %v2943_v16 = vld [vmem:[%s3119_s4 + $0x344] ss:$16 sps:$4 sm:$0xff]  }
  0xa6   : > { %1425 = vmatprep.mubr.bf16.mxu0 %v2859_v17  ;;  %1714 = vmatprep.mubr.bf16.mxu1 %v2861_v18 }
  0xad   : > { %1426 = vmatmul.mubr.bf16.gmra.mxu0 %v2863_v19  ;;  %1715 = vmatmul.mubr.bf16.gmra.mxu1 %v2864_v20  ;;  %v2945_v19 = vld [vmem:[%s3119_s4 + $0x34c] ss:$16 sps:$4 sm:$0xff]  }
  0xae   : > { %1433 = vmatprep.mubr.bf16.mxu0 %v2865_v21  ;;  %1722 = vmatprep.mubr.bf16.mxu1 %v2867_v22 }
  0xb5   : > { %1434 = vmatmul.mubr.bf16.gmra.mxu0 %v2869_v23  ;;  %1723 = vmatmul.mubr.bf16.gmra.mxu1 %v2870_v24 }
  0xb6   : > { %1441 = vmatprep.mubr.bf16.mxu0 %v2871_v25  ;;  %1730 = vmatprep.mubr.bf16.mxu1 %v2873_v26 }
  0xbd   : > { %1442 = vmatmul.mubr.bf16.gmra.mxu0 %v2875_v27  ;;  %1731 = vmatmul.mubr.bf16.gmra.mxu1 %v2876_v28 }
  0xbe   : > { %1449 = vmatprep.mubr.bf16.mxu0 %v2877_v29  ;;  %1738 = vmatprep.mubr.bf16.mxu1 %v2879_v30 }
  0xc5   : > { %1450 = vmatmul.mubr.bf16.gmra.mxu0 %v2881_v31  ;;  %1739 = vmatmul.mubr.bf16.gmra.mxu1 %v2882_v32 }
  0xc6   : > { %1457 = vmatprep.mubr.bf16.mxu0 %v2883_v33  ;;  %1746 = vmatprep.mubr.bf16.mxu1 %v2885_v34  ;;  %v2947_v33 = vld [vmem:[%s3119_s4 + $0x340] ss:$16 sps:$4 sm:$0xff]  }
  0xcd   : > { %1458 = vmatmul.mubr.bf16.gmra.mxu0 %v2887_v35  ;;  %1747 = vmatmul.mubr.bf16.gmra.mxu1 %v2888_v36  ;;  %v2948_v35 = vld [vmem:[%s3119_s4 + $0x348] ss:$16 sps:$4 sm:$0xff]   ;;  %v2949_v36 = vld [vmem:[%s3119_s4 + $0x364] ss:$16 sps:$4 sm:$0xff]  }
  0xce   : > { %1465 = vmatprep.mubr.bf16.mxu0 %v2889_v37  ;;  %1754 = vmatprep.mubr.bf16.mxu1 %v2891_v38 }
  0xd5   : > { %1466 = vmatmul.mubr.bf16.gmra.mxu0 %v2893_v39  ;;  %1755 = vmatmul.mubr.bf16.gmra.mxu1 %v2894_v40  ;;  %v2951_v40 = vld [vmem:[%s3119_s4 + $0x36c] ss:$16 sps:$4 sm:$0xff]  }
  0xd6   : > { %1473 = vmatprep.mubr.bf16.mxu0 %v2895_v41  ;;  %1762 = vmatprep.mubr.bf16.mxu1 %v2897_v42 }
  0xdd   : > { %1474 = vmatmul.mubr.bf16.gmra.mxu0 %v2899_v43  ;;  %1763 = vmatmul.mubr.bf16.gmra.mxu1 %v2900_v44 }
  0xde   : > { %1481 = vmatprep.mubr.bf16.mxu0 %v2901_v45  ;;  %1770 = vmatprep.mubr.bf16.mxu1 %v2903_v46 }
  0xe5   : > { %1482 = vmatmul.mubr.bf16.gmra.mxu0 %v2905_v47  ;;  %1771 = vmatmul.mubr.bf16.gmra.mxu1 %v2906_v48 }
  0xe6   : > { %1489 = vmatprep.mubr.bf16.mxu0 %v2907_v49  ;;  %1778 = vmatprep.mubr.bf16.mxu1 %v2909_v50 }
  0xed   : > { %1490 = vmatmul.mubr.bf16.gmra.mxu0 %v2911_v51  ;;  %1779 = vmatmul.mubr.bf16.gmra.mxu1 %v2912_v52 }
  0xee   : > { %1497 = vmatprep.mubr.bf16.mxu0 %v2913_v53  ;;  %1786 = vmatprep.mubr.bf16.mxu1 %v2915_v54  ;;  %v2953_v53 = vld [vmem:[%s3119_s4 + $0x360] ss:$16 sps:$4 sm:$0xff]  }
  0xf5   : > { %1498 = vmatmul.mubr.bf16.gmra.mxu0 %v2917_v55  ;;  %1787 = vmatmul.mubr.bf16.gmra.mxu1 %v2918_v56  ;;  %v2954_v55 = vld [vmem:[%s3119_s4 + $0x368] ss:$16 sps:$4 sm:$0xff]   ;;  %v2957_v56 = vld [vmem:[%s3119_s4 + $0x384] ss:$16 sps:$4 sm:$0xff]  }
  0xf6   : > { %1505 = vmatprep.mubr.bf16.mxu0 %v2919_v57  ;;  %1794 = vmatprep.mubr.bf16.mxu1 %v2921_v58 }
  0xfd   : > { %1506 = vmatmul.mubr.bf16.gmra.mxu0 %v2923_v59  ;;  %1795 = vmatmul.mubr.bf16.gmra.mxu1 %v2924_v60  ;;  %v2960_v60 = vld [vmem:[%s3119_s4 + $0x38c] ss:$16 sps:$4 sm:$0xff]  }
  0xfe   : > { %1513 = vmatprep.mubr.bf16.mxu0 %v2925_v61  ;;  %1802 = vmatprep.mubr.bf16.mxu1 %v2927_v62 }
 0x105   : > { %1514 = vmatmul.mubr.bf16.gmra.mxu0 %v2929_v63  ;;  %1803 = vmatmul.mubr.bf16.gmra.mxu1 %v2930_v0 }
 0x106   : > { %1521 = vmatprep.mubr.bf16.mxu0 %v2931_v1  ;;  %1810 = vmatprep.mubr.bf16.mxu1 %v2933_v2 }
 0x10d   : > { %v1331_v7 = vpop.f32.mrf.mxu0  ;;  %1522 = vmatmul.mubr.bf16.gmra.mxu0 %v2935_v3  ;;  %v1620_v8 = vpop.f32.mrf.mxu1  ;;  %1811 = vmatmul.mubr.bf16.gmra.mxu1 %v2936_v4 }
 0x10e   : > { %1529 = vmatprep.mubr.bf16.mxu0 %v2937_v5  ;;  %v1621_v9 = vadd.f32 %v1620_v8, %v1331_v7  ;;  %1818 = vmatprep.mubr.bf16.mxu1 %v2939_v6 }
 0x10f   : > { %v1333_v10 = vpop.f32.mrf.mxu0  ;;  %v1622_v11 = vpop.f32.mrf.mxu1 }
 0x110   : > { %1879 = vst [vmem:[%s3288_s22] sm:$0xff] %v1621_v9  ;;  %v2277_v21 = vmul.f32 %v1621_v9, %v1621_v9  ;;  %v2958_v11 = vld [vmem:[%s3119_s4 + $0x388] ss:$16 sps:$4 sm:$0xff]  }
 0x111   : > { %v1334_v12 = vpop.f32.mrf.mxu0  ;;  %v1623_v14 = vpop.f32.mrf.mxu1 }
 0x112   : > { %v1624_v17 = vadd.f32 %v1623_v14, %v1334_v12  ;;  %v2963_v12 = vld [vmem:[%s3119_s4 + $0x3a4] ss:$16 sps:$4 sm:$0xff]  }
 0x113   : > { %v1336_v18 = vpop.f32.mrf.mxu0  ;;  %v1625_v20 = vpop.f32.mrf.mxu1 }
 0x114   : > { %1880 = vst [vmem:[%s3288_s22 + $0x8] sm:$0xff] %v1624_v17  ;;  %v2207_v22 = vadd.f32 %v1624_v17, %v1621_v9  ;;  %v2278_v23 = vmul.f32 %v1624_v17, %v1624_v17  ;;  %v2955_v9 = vld [vmem:[%s3119_s4 + $0x380] ss:$16 sps:$4 sm:$0xff]  }
 0x115   : > { %v1339_v24 = vpop.f32.mrf.mxu0  ;;  %1530 = vmatmul.mubr.bf16.gmra.mxu0 %v2941_v13  ;;  %v1628_v25 = vpop.f32.mrf.mxu1  ;;  %1819 = vmatmul.mubr.bf16.gmra.mxu1 %v2942_v15 }
 0x116   : > { %1537 = vmatprep.mubr.bf16.mxu0 %v2943_v16  ;;  %v2341_v26 = vadd.f32 %v2278_v23, %v2277_v21  ;;  %v1629_v27 = vadd.f32 %v1628_v25, %v1339_v24  ;;  %1826 = vmatprep.mubr.bf16.mxu1 %v2945_v19  ;;  %v2966_v16 = vld [vmem:[%s3119_s4 + $0x3ac] ss:$16 sps:$4 sm:$0xff]  }
 0x117   : > { %v1341_v28 = vpop.f32.mrf.mxu0  ;;  %v1630_v29 = vpop.f32.mrf.mxu1 }
 0x118   : > { %1881 = vst [vmem:[%s3288_s22 + $0x10] sm:$0xff] %v1629_v27  ;;  %v2208_v30 = vadd.f32 %v2207_v22, %v1629_v27  ;;  %v2279_v31 = vmul.f32 %v1629_v27, %v1629_v27  ;;  %v2961_v29 = vld [vmem:[%s3119_s4 + $0x3a0] ss:$16 sps:$4 sm:$0xff]  }
 0x119   : > { %v1342_v32 = vpop.f32.mrf.mxu0  ;;  %v1631_v34 = vpop.f32.mrf.mxu1 }
 0x11a   : > { %v2342_v37 = vadd.f32 %v2341_v26, %v2279_v31  ;;  %v1632_v38 = vadd.f32 %v1631_v34, %v1342_v32  ;;  %v2964_v31 = vld [vmem:[%s3119_s4 + $0x3a8] ss:$16 sps:$4 sm:$0xff]   ;;  %v2969_v32 = vld [vmem:[%s3119_s4 + $0x3c4] ss:$16 sps:$4 sm:$0xff]  }
 0x11b   : > { %v1344_v39 = vpop.f32.mrf.mxu0  ;;  %v1633_v41 = vpop.f32.mrf.mxu1 }
 0x11c   : > { %1882 = vst [vmem:[%s3288_s22 + $0x18] sm:$0xff] %v1632_v38  ;;  %v2209_v42 = vadd.f32 %v2208_v30, %v1632_v38  ;;  %v2280_v43 = vmul.f32 %v1632_v38, %v1632_v38 }
 0x11d   : > { %v1347_v44 = vpop.f32.mrf.mxu0  ;;  %1538 = vmatmul.mubr.bf16.gmra.mxu0 %v2947_v33  ;;  %v1636_v45 = vpop.f32.mrf.mxu1  ;;  %1827 = vmatmul.mubr.bf16.gmra.mxu1 %v2948_v35 }
 0x11e   : > { %1545 = vmatprep.mubr.bf16.mxu0 %v2949_v36  ;;  %v2343_v46 = vadd.f32 %v2342_v37, %v2280_v43  ;;  %v1637_v47 = vadd.f32 %v1636_v45, %v1347_v44  ;;  %1834 = vmatprep.mubr.bf16.mxu1 %v2951_v40  ;;  %v2972_v36 = vld [vmem:[%s3119_s4 + $0x3cc] ss:$16 sps:$4 sm:$0xff]  }
 0x11f   : > { %v1349_v48 = vpop.f32.mrf.mxu0  ;;  %v1638_v49 = vpop.f32.mrf.mxu1 }
 0x120   : > { %1883 = vst [vmem:[%s3288_s22 + $0x20] sm:$0xff] %v1637_v47  ;;  %v2210_v50 = vadd.f32 %v2209_v42, %v1637_v47  ;;  %v2281_v51 = vmul.f32 %v1637_v47, %v1637_v47  ;;  %v2967_v49 = vld [vmem:[%s3119_s4 + $0x3c0] ss:$16 sps:$4 sm:$0xff]  }
 0x121   : > { %v1350_v52 = vpop.f32.mrf.mxu0  ;;  %v1639_v54 = vpop.f32.mrf.mxu1 }
 0x122   : > { %v2344_v57 = vadd.f32 %v2343_v46, %v2281_v51  ;;  %v1640_v58 = vadd.f32 %v1639_v54, %v1350_v52  ;;  %v2970_v51 = vld [vmem:[%s3119_s4 + $0x3c8] ss:$16 sps:$4 sm:$0xff]   ;;  %v2975_v52 = vld [vmem:[%s3119_s4 + $0x3e4] ss:$16 sps:$4 sm:$0xff]  }
 0x123   : > { %v1352_v59 = vpop.f32.mrf.mxu0  ;;  %v1641_v61 = vpop.f32.mrf.mxu1 }
 0x124   : > { %1884 = vst [vmem:[%s3288_s22 + $0x28] sm:$0xff] %v1640_v58  ;;  %v2211_v62 = vadd.f32 %v2210_v50, %v1640_v58  ;;  %v2282_v63 = vmul.f32 %v1640_v58, %v1640_v58 }
 0x125   : > { %v1355_v0 = vpop.f32.mrf.mxu0  ;;  %1546 = vmatmul.mubr.bf16.gmra.mxu0 %v2953_v53  ;;  %v1644_v1 = vpop.f32.mrf.mxu1  ;;  %1835 = vmatmul.mubr.bf16.gmra.mxu1 %v2954_v55 }
 0x126   : > { %1553 = vmatprep.mubr.bf16.mxu0 %v2957_v56  ;;  %v2345_v2 = vadd.f32 %v2344_v57, %v2282_v63  ;;  %v1645_v3 = vadd.f32 %v1644_v1, %v1355_v0  ;;  %1842 = vmatprep.mubr.bf16.mxu1 %v2960_v60  ;;  %v2978_v56 = vld [vmem:[%s3119_s4 + $0x3ec] ss:$16 sps:$4 sm:$0xff]  }
 0x127   : > { %v1357_v4 = vpop.f32.mrf.mxu0  ;;  %v1646_v5 = vpop.f32.mrf.mxu1 }
 0x128   : > { %1885 = vst [vmem:[%s3288_s22 + $0x30] sm:$0xff] %v1645_v3  ;;  %v2212_v6 = vadd.f32 %v2211_v62, %v1645_v3  ;;  %v2283_v7 = vmul.f32 %v1645_v3, %v1645_v3  ;;  %v2973_v5 = vld [vmem:[%s3119_s4 + $0x3e0] ss:$16 sps:$4 sm:$0xff]  }
 0x129   : > { %v1358_v8 = vpop.f32.mrf.mxu0  ;;  %v1647_v10 = vpop.f32.mrf.mxu1 }
 0x12a   : > { %v2346_v13 = vadd.f32 %v2345_v2, %v2283_v7  ;;  %v1648_v14 = vadd.f32 %v1647_v10, %v1358_v8  ;;  %v2976_v7 = vld [vmem:[%s3119_s4 + $0x3e8] ss:$16 sps:$4 sm:$0xff]  }
 0x12b   : > { %v1360_v15 = vpop.f32.mrf.mxu0  ;;  %v1649_v17 = vpop.f32.mrf.mxu1 }
 0x12c   : > { %1886 = vst [vmem:[%s3288_s22 + $0x38] sm:$0xff] %v1648_v14  ;;  %v2213_v18 = vadd.f32 %v2212_v6, %v1648_v14  ;;  %v2284_v19 = vmul.f32 %v1648_v14, %v1648_v14 }
 0x12d   : > { %v1363_v20 = vpop.f32.mrf.mxu0  ;;  %1554 = vmatmul.mubr.bf16.gmra.mxu0 %v2955_v9  ;;  %v1652_v21 = vpop.f32.mrf.mxu1  ;;  %1843 = vmatmul.mubr.bf16.gmra.mxu1 %v2958_v11 }
 0x12e   : > { %1561 = vmatprep.mubr.bf16.mxu0 %v2963_v12  ;;  %v2347_v22 = vadd.f32 %v2346_v13, %v2284_v19  ;;  %v1653_v23 = vadd.f32 %v1652_v21, %v1363_v20  ;;  %1850 = vmatprep.mubr.bf16.mxu1 %v2966_v16 }
 0x12f   : > { %v1365_v24 = vpop.f32.mrf.mxu0  ;;  %v1654_v25 = vpop.f32.mrf.mxu1 }
 0x130   : > { %1887 = vst [vmem:[%s3288_s22 + $0x40] sm:$0xff] %v1653_v23  ;;  %v2214_v26 = vadd.f32 %v2213_v18, %v1653_v23  ;;  %v2285_v27 = vmul.f32 %v1653_v23, %v1653_v23 }
 0x131   : > { %v1366_v28 = vpop.f32.mrf.mxu0  ;;  %v1655_v30 = vpop.f32.mrf.mxu1 }
 0x132   : > { %v2348_v33 = vadd.f32 %v2347_v22, %v2285_v27  ;;  %v1656_v34 = vadd.f32 %v1655_v30, %v1366_v28 }
 0x133   : > { %v1368_v35 = vpop.f32.mrf.mxu0  ;;  %v1657_v37 = vpop.f32.mrf.mxu1 }
 0x134   : > { %1888 = vst [vmem:[%s3288_s22 + $0x48] sm:$0xff] %v1656_v34  ;;  %v2215_v38 = vadd.f32 %v2214_v26, %v1656_v34  ;;  %v2286_v39 = vmul.f32 %v1656_v34, %v1656_v34 }
 0x135   : > { %v1371_v40 = vpop.f32.mrf.mxu0  ;;  %1562 = vmatmul.mubr.bf16.gmra.mxu0 %v2961_v29  ;;  %v1660_v41 = vpop.f32.mrf.mxu1  ;;  %1851 = vmatmul.mubr.bf16.gmra.mxu1 %v2964_v31 }
 0x136   : > { %1569 = vmatprep.mubr.bf16.mxu0 %v2969_v32  ;;  %v2349_v42 = vadd.f32 %v2348_v33, %v2286_v39  ;;  %v1661_v43 = vadd.f32 %v1660_v41, %v1371_v40  ;;  %1858 = vmatprep.mubr.bf16.mxu1 %v2972_v36 }
 0x137   : > { %v1373_v44 = vpop.f32.mrf.mxu0  ;;  %v1662_v45 = vpop.f32.mrf.mxu1 }
 0x138   : > { %1889 = vst [vmem:[%s3288_s22 + $0x50] sm:$0xff] %v1661_v43  ;;  %v2216_v46 = vadd.f32 %v2215_v38, %v1661_v43  ;;  %v2287_v47 = vmul.f32 %v1661_v43, %v1661_v43 }
 0x139   : > { %v1374_v48 = vpop.f32.mrf.mxu0  ;;  %v1663_v50 = vpop.f32.mrf.mxu1 }
 0x13a   : > { %v2350_v53 = vadd.f32 %v2349_v42, %v2287_v47  ;;  %v1664_v54 = vadd.f32 %v1663_v50, %v1374_v48 }
 0x13b   : > { %v1376_v55 = vpop.f32.mrf.mxu0  ;;  %v1665_v57 = vpop.f32.mrf.mxu1 }
 0x13c   : > { %1890 = vst [vmem:[%s3288_s22 + $0x58] sm:$0xff] %v1664_v54  ;;  %v2217_v58 = vadd.f32 %v2216_v46, %v1664_v54  ;;  %v2288_v59 = vmul.f32 %v1664_v54, %v1664_v54 }
 0x13d   : > { %v1379_v60 = vpop.f32.mrf.mxu0  ;;  %1570 = vmatmul.mubr.bf16.gmra.mxu0 %v2967_v49  ;;  %v1668_v61 = vpop.f32.mrf.mxu1  ;;  %1859 = vmatmul.mubr.bf16.gmra.mxu1 %v2970_v51 }
 0x13e   : > { %1577 = vmatprep.mubr.bf16.mxu0 %v2975_v52  ;;  %v2351_v62 = vadd.f32 %v2350_v53, %v2288_v59  ;;  %v1669_v63 = vadd.f32 %v1668_v61, %v1379_v60  ;;  %1866 = vmatprep.mubr.bf16.mxu1 %v2978_v56 }
 0x13f   : > { %v1381_v0 = vpop.f32.mrf.mxu0  ;;  %v1670_v1 = vpop.f32.mrf.mxu1 }
 0x140   : > { %1891 = vst [vmem:[%s3288_s22 + $0x60] sm:$0xff] %v1669_v63  ;;  %v2218_v2 = vadd.f32 %v2217_v58, %v1669_v63  ;;  %v2289_v3 = vmul.f32 %v1669_v63, %v1669_v63 }
 0x141   : > { %v1382_v4 = vpop.f32.mrf.mxu0  ;;  %v1671_v6 = vpop.f32.mrf.mxu1 }
 0x142   : > { %v2352_v8 = vadd.f32 %v2351_v62, %v2289_v3  ;;  %v1672_v9 = vadd.f32 %v1671_v6, %v1382_v4 }
 0x143   : > { %v1384_v10 = vpop.f32.mrf.mxu0  ;;  %v1673_v11 = vpop.f32.mrf.mxu1 }
 0x144   : > { %1892 = vst [vmem:[%s3288_s22 + $0x68] sm:$0xff] %v1672_v9  ;;  %v2219_v12 = vadd.f32 %v2218_v2, %v1672_v9  ;;  %v2290_v13 = vmul.f32 %v1672_v9, %v1672_v9 }
 0x145   : > { %v1387_v14 = vpop.f32.mrf.mxu0  ;;  %1578 = vmatmul.mubr.bf16.gmra.mxu0 %v2973_v5  ;;  %v1676_v15 = vpop.f32.mrf.mxu1  ;;  %1867 = vmatmul.mubr.bf16.gmra.mxu1 %v2976_v7 }
 0x146   : > { %v2353_v16 = vadd.f32 %v2352_v8, %v2290_v13  ;;  %v1677_v17 = vadd.f32 %v1676_v15, %v1387_v14 }
 0x147   : > { %v1389_v18 = vpop.f32.mrf.mxu0  ;;  %v1678_v19 = vpop.f32.mrf.mxu1 }
 0x148   : > { %1893 = vst [vmem:[%s3288_s22 + $0x70] sm:$0xff] %v1677_v17  ;;  %v2220_v20 = vadd.f32 %v2219_v12, %v1677_v17  ;;  %v2291_v21 = vmul.f32 %v1677_v17, %v1677_v17 }
 0x149   : > { %v1390_v22 = vpop.f32.mrf.mxu0  ;;  %v1679_v23 = vpop.f32.mrf.mxu1 }
 0x14a   : > { %v2354_v24 = vadd.f32 %v2353_v16, %v2291_v21  ;;  %v1680_v25 = vadd.f32 %v1679_v23, %v1390_v22 }
 0x14b   : > { %v1392_v26 = vpop.f32.mrf.mxu0  ;;  %v1681_v27 = vpop.f32.mrf.mxu1 }
 0x14c   : > { %1894 = vst [vmem:[%s3288_s22 + $0x78] sm:$0xff] %v1680_v25  ;;  %v2221_v28 = vadd.f32 %v2220_v20, %v1680_v25  ;;  %v2292_v29 = vmul.f32 %v1680_v25, %v1680_v25 }
 0x14d   : > { %v1395_v30 = vpop.f32.mrf.mxu0  ;;  %v1684_v31 = vpop.f32.mrf.mxu1 }
 0x14e   : > { %v2355_v32 = vadd.f32 %v2354_v24, %v2292_v29  ;;  %v1685_v33 = vadd.f32 %v1684_v31, %v1395_v30 }
 0x14f   : > { %v1397_v34 = vpop.f32.mrf.mxu0  ;;  %v1686_v35 = vpop.f32.mrf.mxu1 }
 0x150   : > { %1895 = vst [vmem:[%s3288_s22 + $0x80] sm:$0xff] %v1685_v33  ;;  %v2222_v36 = vadd.f32 %v2221_v28, %v1685_v33  ;;  %v2293_v37 = vmul.f32 %v1685_v33, %v1685_v33 }
 0x151   : > { %v1398_v38 = vpop.f32.mrf.mxu0  ;;  %v1687_v39 = vpop.f32.mrf.mxu1 }
 0x152   : > { %v2356_v40 = vadd.f32 %v2355_v32, %v2293_v37  ;;  %v1688_v41 = vadd.f32 %v1687_v39, %v1398_v38 }
 0x153   : > { %v1400_v42 = vpop.f32.mrf.mxu0  ;;  %v1689_v43 = vpop.f32.mrf.mxu1 }
 0x154   : > { %1896 = vst [vmem:[%s3288_s22 + $0x88] sm:$0xff] %v1688_v41  ;;  %v2223_v44 = vadd.f32 %v2222_v36, %v1688_v41  ;;  %v2294_v45 = vmul.f32 %v1688_v41, %v1688_v41 }
 0x155   : > { %v1403_v46 = vpop.f32.mrf.mxu0  ;;  %v1692_v47 = vpop.f32.mrf.mxu1 }
 0x156   : > { %v2357_v48 = vadd.f32 %v2356_v40, %v2294_v45  ;;  %v1693_v49 = vadd.f32 %v1692_v47, %v1403_v46 }
 0x157   : > { %v1405_v50 = vpop.f32.mrf.mxu0  ;;  %v1694_v51 = vpop.f32.mrf.mxu1 }
 0x158   : > { %1897 = vst [vmem:[%s3288_s22 + $0x90] sm:$0xff] %v1693_v49  ;;  %v2224_v52 = vadd.f32 %v2223_v44, %v1693_v49  ;;  %v2295_v53 = vmul.f32 %v1693_v49, %v1693_v49 }
 0x159   : > { %v1406_v54 = vpop.f32.mrf.mxu0  ;;  %v1695_v55 = vpop.f32.mrf.mxu1 }
 0x15a   : > { %v2358_v56 = vadd.f32 %v2357_v48, %v2295_v53  ;;  %v1696_v57 = vadd.f32 %v1695_v55, %v1406_v54 }
 0x15b   : > { %v1408_v58 = vpop.f32.mrf.mxu0  ;;  %v1697_v59 = vpop.f32.mrf.mxu1 }
 0x15c   : > { %1898 = vst [vmem:[%s3288_s22 + $0x98] sm:$0xff] %v1696_v57  ;;  %v2225_v60 = vadd.f32 %v2224_v52, %v1696_v57  ;;  %v2296_v61 = vmul.f32 %v1696_v57, %v1696_v57 }
 0x15d   : > { %v1411_v62 = vpop.f32.mrf.mxu0  ;;  %v1700_v63 = vpop.f32.mrf.mxu1 }
 0x15e   : > { %v2359_v0 = vadd.f32 %v2358_v56, %v2296_v61  ;;  %v1701_v1 = vadd.f32 %v1700_v63, %v1411_v62 }
 0x15f   : > { %v1413_v2 = vpop.f32.mrf.mxu0  ;;  %v1702_v3 = vpop.f32.mrf.mxu1 }
 0x160   : > { %1899 = vst [vmem:[%s3288_s22 + $0xa0] sm:$0xff] %v1701_v1  ;;  %v2226_v4 = vadd.f32 %v2225_v60, %v1701_v1  ;;  %v2297_v5 = vmul.f32 %v1701_v1, %v1701_v1 }
 0x161   : > { %v1414_v6 = vpop.f32.mrf.mxu0  ;;  %v1703_v7 = vpop.f32.mrf.mxu1 }
 0x162   : > { %v2360_v8 = vadd.f32 %v2359_v0, %v2297_v5  ;;  %v1704_v9 = vadd.f32 %v1703_v7, %v1414_v6 }
 0x163   : > { %v1416_v10 = vpop.f32.mrf.mxu0  ;;  %v1705_v11 = vpop.f32.mrf.mxu1 }
 0x164   : > { %1900 = vst [vmem:[%s3288_s22 + $0xa8] sm:$0xff] %v1704_v9  ;;  %v2227_v12 = vadd.f32 %v2226_v4, %v1704_v9  ;;  %v2298_v13 = vmul.f32 %v1704_v9, %v1704_v9 }
 0x165   : > { %v1419_v14 = vpop.f32.mrf.mxu0  ;;  %v1708_v15 = vpop.f32.mrf.mxu1 }
 0x166   : > { %v2361_v16 = vadd.f32 %v2360_v8, %v2298_v13  ;;  %v1709_v17 = vadd.f32 %v1708_v15, %v1419_v14 }
 0x167   : > { %v1421_v18 = vpop.f32.mrf.mxu0  ;;  %v1710_v19 = vpop.f32.mrf.mxu1 }
 0x168   : > { %1901 = vst [vmem:[%s3288_s22 + $0xb0] sm:$0xff] %v1709_v17  ;;  %v2228_v20 = vadd.f32 %v2227_v12, %v1709_v17  ;;  %v2299_v21 = vmul.f32 %v1709_v17, %v1709_v17 }
 0x169   : > { %v1422_v22 = vpop.f32.mrf.mxu0  ;;  %v1711_v23 = vpop.f32.mrf.mxu1 }
 0x16a   : > { %v2362_v24 = vadd.f32 %v2361_v16, %v2299_v21  ;;  %v1712_v25 = vadd.f32 %v1711_v23, %v1422_v22 }
 0x16b   : > { %v1424_v26 = vpop.f32.mrf.mxu0  ;;  %v1713_v27 = vpop.f32.mrf.mxu1 }
 0x16c   : > { %1902 = vst [vmem:[%s3288_s22 + $0xb8] sm:$0xff] %v1712_v25  ;;  %v2229_v28 = vadd.f32 %v2228_v20, %v1712_v25  ;;  %v2300_v29 = vmul.f32 %v1712_v25, %v1712_v25 }
 0x16d   : > { %v1427_v30 = vpop.f32.mrf.mxu0  ;;  %v1716_v31 = vpop.f32.mrf.mxu1 }
 0x16e   : > { %v2363_v32 = vadd.f32 %v2362_v24, %v2300_v29  ;;  %v1717_v33 = vadd.f32 %v1716_v31, %v1427_v30 }
 0x16f   : > { %v1429_v34 = vpop.f32.mrf.mxu0  ;;  %v1718_v35 = vpop.f32.mrf.mxu1 }
 0x170   : > { %1903 = vst [vmem:[%s3288_s22 + $0xc0] sm:$0xff] %v1717_v33  ;;  %v2230_v36 = vadd.f32 %v2229_v28, %v1717_v33  ;;  %v2301_v37 = vmul.f32 %v1717_v33, %v1717_v33 }
 0x171   : > { %v1430_v38 = vpop.f32.mrf.mxu0  ;;  %v1719_v39 = vpop.f32.mrf.mxu1 }
 0x172   : > { %v2364_v40 = vadd.f32 %v2363_v32, %v2301_v37  ;;  %v1720_v41 = vadd.f32 %v1719_v39, %v1430_v38  ;;  %v3004_v37 = vmov 0.0  }
 0x173   : > { %v1432_v42 = vpop.f32.mrf.mxu0  ;;  %v1721_v43 = vpop.f32.mrf.mxu1  ;;  %2206 = vst [vmem:[%s3359_s24] sm:$0xff] %v3004_v37 }
 0x174   : > { %1904 = vst [vmem:[%s3288_s22 + $0xc8] sm:$0xff] %v1720_v41  ;;  %v2231_v44 = vadd.f32 %v2230_v36, %v1720_v41  ;;  %v2302_v45 = vmul.f32 %v1720_v41, %v1720_v41 }
 0x175   : > { %v1435_v46 = vpop.f32.mrf.mxu0  ;;  %v1724_v47 = vpop.f32.mrf.mxu1 }
 0x176   : > { %v2365_v48 = vadd.f32 %v2364_v40, %v2302_v45  ;;  %v1725_v49 = vadd.f32 %v1724_v47, %v1435_v46 }
 0x177   : > { %v1437_v50 = vpop.f32.mrf.mxu0  ;;  %v1726_v51 = vpop.f32.mrf.mxu1 }
 0x178   : > { %1905 = vst [vmem:[%s3288_s22 + $0xd0] sm:$0xff] %v1725_v49  ;;  %v2232_v52 = vadd.f32 %v2231_v44, %v1725_v49  ;;  %v2303_v53 = vmul.f32 %v1725_v49, %v1725_v49 }
 0x179   : > { %v1438_v54 = vpop.f32.mrf.mxu0  ;;  %v1727_v55 = vpop.f32.mrf.mxu1 }
 0x17a   : > { %v2366_v56 = vadd.f32 %v2365_v48, %v2303_v53  ;;  %v1728_v57 = vadd.f32 %v1727_v55, %v1438_v54 }
 0x17b   : > { %v1440_v58 = vpop.f32.mrf.mxu0  ;;  %v1729_v59 = vpop.f32.mrf.mxu1 }
 0x17c   : > { %1906 = vst [vmem:[%s3288_s22 + $0xd8] sm:$0xff] %v1728_v57  ;;  %v2233_v60 = vadd.f32 %v2232_v52, %v1728_v57  ;;  %v2304_v61 = vmul.f32 %v1728_v57, %v1728_v57 }
 0x17d   : > { %v1443_v62 = vpop.f32.mrf.mxu0  ;;  %v1732_v63 = vpop.f32.mrf.mxu1 }
 0x17e   : > { %v2367_v0 = vadd.f32 %v2366_v56, %v2304_v61  ;;  %v1733_v1 = vadd.f32 %v1732_v63, %v1443_v62 }
 0x17f   : > { %v1445_v2 = vpop.f32.mrf.mxu0  ;;  %v1734_v3 = vpop.f32.mrf.mxu1 }
 0x180   : > { %1907 = vst [vmem:[%s3288_s22 + $0xe0] sm:$0xff] %v1733_v1  ;;  %v2234_v4 = vadd.f32 %v2233_v60, %v1733_v1  ;;  %v2305_v5 = vmul.f32 %v1733_v1, %v1733_v1 }
 0x181   : > { %v1446_v6 = vpop.f32.mrf.mxu0  ;;  %v1735_v7 = vpop.f32.mrf.mxu1 }
 0x182   : > { %v2368_v8 = vadd.f32 %v2367_v0, %v2305_v5  ;;  %v1736_v9 = vadd.f32 %v1735_v7, %v1446_v6 }
 0x183   : > { %v1448_v10 = vpop.f32.mrf.mxu0  ;;  %v1737_v11 = vpop.f32.mrf.mxu1 }
 0x184   : > { %1908 = vst [vmem:[%s3288_s22 + $0xe8] sm:$0xff] %v1736_v9  ;;  %v2235_v12 = vadd.f32 %v2234_v4, %v1736_v9  ;;  %v2306_v13 = vmul.f32 %v1736_v9, %v1736_v9 }
 0x185   : > { %v1451_v14 = vpop.f32.mrf.mxu0  ;;  %v1740_v15 = vpop.f32.mrf.mxu1 }
 0x186   : > { %v2369_v16 = vadd.f32 %v2368_v8, %v2306_v13  ;;  %v1741_v17 = vadd.f32 %v1740_v15, %v1451_v14 }
 0x187   : > { %v1453_v18 = vpop.f32.mrf.mxu0  ;;  %v1742_v19 = vpop.f32.mrf.mxu1 }
 0x188   : > { %1909 = vst [vmem:[%s3288_s22 + $0xf0] sm:$0xff] %v1741_v17  ;;  %v2236_v20 = vadd.f32 %v2235_v12, %v1741_v17  ;;  %v2307_v21 = vmul.f32 %v1741_v17, %v1741_v17 }
 0x189   : > { %v1454_v22 = vpop.f32.mrf.mxu0  ;;  %v1743_v23 = vpop.f32.mrf.mxu1 }
 0x18a   : > { %v2370_v24 = vadd.f32 %v2369_v16, %v2307_v21  ;;  %v1744_v25 = vadd.f32 %v1743_v23, %v1454_v22 }
 0x18b   : > { %v1456_v26 = vpop.f32.mrf.mxu0  ;;  %v1745_v27 = vpop.f32.mrf.mxu1 }
 0x18c   : > { %1910 = vst [vmem:[%s3288_s22 + $0xf8] sm:$0xff] %v1744_v25  ;;  %v3349_v28 = vadd.f32 %v2236_v20, %v1744_v25  ;;  %v2308_v29 = vmul.f32 %v1744_v25, %v1744_v25 }
 0x18d   : > { %v1459_v30 = vpop.f32.mrf.mxu0  ;;  %v1748_v31 = vpop.f32.mrf.mxu1 }
 0x18e   : > { %v3352_v32 = vadd.f32 %v2370_v24, %v2308_v29  ;;  %v3354_v33 = vadd.f32 %v1748_v31, %v1459_v30 }
 0x18f   : > { %v1461_v34 = vpop.f32.mrf.mxu0  ;;  %v1750_v35 = vpop.f32.mrf.mxu1 }
 0x190   : > { %1911 = vst [vmem:[%s3288_s22 + $0x100] sm:$0xff] %v3354_v33 }
 0x191   : > { %v1462_v36 = vpop.f32.mrf.mxu0  ;;  %v1751_v38 = vpop.f32.mrf.mxu1 }
 0x192   : > { %v3364_v39 = vadd.f32 %v1751_v38, %v1462_v36 }
 0x193   : > { %v1464_v40 = vpop.f32.mrf.mxu0  ;;  %v1753_v41 = vpop.f32.mrf.mxu1 }
 0x194   : > { %1912 = vst [vmem:[%s3288_s22 + $0x108] sm:$0xff] %v3364_v39 }
 0x195   : > { %v1467_v42 = vpop.f32.mrf.mxu0  ;;  %v1756_v43 = vpop.f32.mrf.mxu1 }
 0x196   : > { %v3368_v44 = vadd.f32 %v1756_v43, %v1467_v42 }
 0x197   : > { %v1469_v45 = vpop.f32.mrf.mxu0  ;;  %v1758_v46 = vpop.f32.mrf.mxu1 }
 0x198   : > { %1913 = vst [vmem:[%s3288_s22 + $0x110] sm:$0xff] %v3368_v44 }
 0x199   : > { %v1470_v47 = vpop.f32.mrf.mxu0  ;;  %v1759_v48 = vpop.f32.mrf.mxu1 }
 0x19a   : > { %v3372_v49 = vadd.f32 %v1759_v48, %v1470_v47 }
 0x19b   : > { %v1472_v50 = vpop.f32.mrf.mxu0  ;;  %v1761_v51 = vpop.f32.mrf.mxu1 }
 0x19c   : > { %1914 = vst [vmem:[%s3288_s22 + $0x118] sm:$0xff] %v3372_v49 }
 0x19d   : > { %v1475_v52 = vpop.f32.mrf.mxu0  ;;  %v1764_v53 = vpop.f32.mrf.mxu1 }
 0x19e   : > { %v3376_v54 = vadd.f32 %v1764_v53, %v1475_v52 }
 0x19f   : > { %v1477_v55 = vpop.f32.mrf.mxu0  ;;  %v1766_v56 = vpop.f32.mrf.mxu1 }
 0x1a0   : > { %1915 = vst [vmem:[%s3288_s22 + $0x120] sm:$0xff] %v3376_v54  ;;  %v2309_v55 = vmul.f32 %v3354_v33, %v3354_v33 }
 0x1a1   : > { %v1478_v57 = vpop.f32.mrf.mxu0  ;;  %v1767_v58 = vpop.f32.mrf.mxu1 }
 0x1a2   : > { %v3380_v59 = vadd.f32 %v1767_v58, %v1478_v57  ;;  %v2238_v58 = vadd.f32 %v3349_v28, %v3354_v33 }
 0x1a3   : > { %v1480_v60 = vpop.f32.mrf.mxu0  ;;  %v1769_v61 = vpop.f32.mrf.mxu1 }
 0x1a4   : > { %1916 = vst [vmem:[%s3288_s22 + $0x128] sm:$0xff] %v3380_v59  ;;  %v2310_v60 = vmul.f32 %v3364_v39, %v3364_v39 }
 0x1a5   : > { %v1483_v62 = vpop.f32.mrf.mxu0  ;;  %v1772_v63 = vpop.f32.mrf.mxu1 }
 0x1a6   : > { %v3384_v0 = vadd.f32 %v1772_v63, %v1483_v62 }
 0x1a7   : > { %v1485_v1 = vpop.f32.mrf.mxu0  ;;  %v1774_v2 = vpop.f32.mrf.mxu1 }
 0x1a8   : > { %1917 = vst [vmem:[%s3288_s22 + $0x130] sm:$0xff] %v3384_v0  ;;  %v2372_v1 = vadd.f32 %v3352_v32, %v2309_v55  ;;  %v2239_v2 = vadd.f32 %v2238_v58, %v3364_v39 }
 0x1a9   : > { %v1486_v3 = vpop.f32.mrf.mxu0  ;;  %v1775_v4 = vpop.f32.mrf.mxu1 }
 0x1aa   : > { %v3388_v5 = vadd.f32 %v1775_v4, %v1486_v3  ;;  %v2311_v3 = vmul.f32 %v3368_v44, %v3368_v44  ;;  %v2373_v28 = vadd.f32 %v2372_v1, %v2310_v60  ;;  %v2240_v33 = vadd.f32 %v2239_v2, %v3368_v44 }
 0x1ab   : > { %v1488_v6 = vpop.f32.mrf.mxu0  ;;  %v1777_v7 = vpop.f32.mrf.mxu1 }
 0x1ac   : > { %1918 = vst [vmem:[%s3288_s22 + $0x138] sm:$0xff] %v3388_v5  ;;  %v2312_v7 = vmul.f32 %v3372_v49, %v3372_v49  ;;  %v2374_v32 = vadd.f32 %v2373_v28, %v2311_v3  ;;  %v2241_v39 = vadd.f32 %v2240_v33, %v3372_v49 }
 0x1ad   : > { %v1491_v8 = vpop.f32.mrf.mxu0  ;;  %v1780_v9 = vpop.f32.mrf.mxu1 }
 0x1ae   : > { %v3392_v10 = vadd.f32 %v1780_v9, %v1491_v8  ;;  %v2242_v44 = vadd.f32 %v2241_v39, %v3376_v54 }
 0x1af   : > { %v1493_v11 = vpop.f32.mrf.mxu0  ;;  %v1782_v12 = vpop.f32.mrf.mxu1 }
 0x1b0   : > { %1919 = vst [vmem:[%s3288_s22 + $0x140] sm:$0xff] %v3392_v10  ;;  %v2313_v12 = vmul.f32 %v3376_v54, %v3376_v54  ;;  %v2243_v49 = vadd.f32 %v2242_v44, %v3380_v59 }
 0x1b1   : > { %v1494_v13 = vpop.f32.mrf.mxu0  ;;  %v1783_v14 = vpop.f32.mrf.mxu1 }
 0x1b2   : > { %v3396_v15 = vadd.f32 %v1783_v14, %v1494_v13  ;;  %v2244_v54 = vadd.f32 %v2243_v49, %v3384_v0 }
 0x1b3   : > { %v1496_v16 = vpop.f32.mrf.mxu0  ;;  %v1785_v17 = vpop.f32.mrf.mxu1 }
 0x1b4   : > { %1920 = vst [vmem:[%s3288_s22 + $0x148] sm:$0xff] %v3396_v15  ;;  %v2375_v16 = vadd.f32 %v2374_v32, %v2312_v7  ;;  %v2314_v17 = vmul.f32 %v3380_v59, %v3380_v59  ;;  %v2245_v59 = vadd.f32 %v2244_v54, %v3388_v5 }
 0x1b5   : > { %v1499_v18 = vpop.f32.mrf.mxu0  ;;  %v1788_v19 = vpop.f32.mrf.mxu1 }
 0x1b6   : > { %v3400_v20 = vadd.f32 %v1788_v19, %v1499_v18 }
 0x1b7   : > { %v1501_v21 = vpop.f32.mrf.mxu0  ;;  %v1790_v22 = vpop.f32.mrf.mxu1 }
 0x1b8   : > { %1921 = vst [vmem:[%s3288_s22 + $0x150] sm:$0xff] %v3400_v20  ;;  %v2376_v22 = vadd.f32 %v2375_v16, %v2313_v12 }
 0x1b9   : > { %v1502_v23 = vpop.f32.mrf.mxu0  ;;  %v1791_v24 = vpop.f32.mrf.mxu1 }
 0x1ba   : > { %v3404_v25 = vadd.f32 %v1791_v24, %v1502_v23  ;;  %v2315_v23 = vmul.f32 %v3384_v0, %v3384_v0  ;;  %v2246_v0 = vadd.f32 %v2245_v59, %v3392_v10 }
 0x1bb   : > { %v1504_v26 = vpop.f32.mrf.mxu0  ;;  %v1793_v27 = vpop.f32.mrf.mxu1 }
 0x1bc   : > { %1922 = vst [vmem:[%s3288_s22 + $0x158] sm:$0xff] %v3404_v25  ;;  %v2377_v27 = vadd.f32 %v2376_v22, %v2314_v17 }
 0x1bd   : > { %v1507_v29 = vpop.f32.mrf.mxu0  ;;  %v1796_v30 = vpop.f32.mrf.mxu1 }
 0x1be   : > { %v3408_v31 = vadd.f32 %v1796_v30, %v1507_v29  ;;  %v2316_v29 = vmul.f32 %v3388_v5, %v3388_v5  ;;  %v2247_v5 = vadd.f32 %v2246_v0, %v3396_v15 }
 0x1bf   : > { %v1509_v34 = vpop.f32.mrf.mxu0  ;;  %v1798_v35 = vpop.f32.mrf.mxu1 }
 0x1c0   : > { %1923 = vst [vmem:[%s3288_s22 + $0x160] sm:$0xff] %v3408_v31  ;;  %v2321_v1 = vmul.f32 %v3408_v31, %v3408_v31 }
 0x1c1   : > { %v1510_v36 = vpop.f32.mrf.mxu0  ;;  %v1799_v37 = vpop.f32.mrf.mxu1 }
 0x1c2   : > { %v3412_v38 = vadd.f32 %v1799_v37, %v1510_v36  ;;  %v2378_v36 = vadd.f32 %v2377_v27, %v2315_v23  ;;  %v2317_v37 = vmul.f32 %v3392_v10, %v3392_v10  ;;  %v2248_v10 = vadd.f32 %v2247_v5, %v3400_v20 }
 0x1c3   : > { %v1512_v40 = vpop.f32.mrf.mxu0  ;;  %v1801_v41 = vpop.f32.mrf.mxu1 }
 0x1c4   : > { %1924 = vst [vmem:[%s3288_s22 + $0x168] sm:$0xff] %v3412_v38 }
 0x1c5   : > { %v1515_v42 = vpop.f32.mrf.mxu0  ;;  %v1804_v43 = vpop.f32.mrf.mxu1 }
 0x1c6   : > { %v3416_v45 = vadd.f32 %v1804_v43, %v1515_v42  ;;  %v2379_v42 = vadd.f32 %v2378_v36, %v2316_v29  ;;  %v2318_v43 = vmul.f32 %v3396_v15, %v3396_v15  ;;  %v2249_v15 = vadd.f32 %v2248_v10, %v3404_v25 }
 0x1c7   : > { %v1517_v46 = vpop.f32.mrf.mxu0  ;;  %v1806_v47 = vpop.f32.mrf.mxu1 }
 0x1c8   : > { %1925 = vst [vmem:[%s3288_s22 + $0x170] sm:$0xff] %v3416_v45 }
 0x1c9   : > { %v1518_v48 = vpop.f32.mrf.mxu0  ;;  %v1807_v50 = vpop.f32.mrf.mxu1 }
 0x1ca   : > { %v3420_v51 = vadd.f32 %v1807_v50, %v1518_v48  ;;  %v2380_v50 = vadd.f32 %v2379_v42, %v2317_v37 }
 0x1cb   : > { %v1520_v52 = vpop.f32.mrf.mxu0  ;;  %v1809_v53 = vpop.f32.mrf.mxu1 }
 0x1cc   : > { %1926 = vst [vmem:[%s3288_s22 + $0x178] sm:$0xff] %v3420_v51  ;;  %v2319_v52 = vmul.f32 %v3400_v20, %v3400_v20  ;;  %v2250_v20 = vadd.f32 %v2249_v15, %v3408_v31  ;;  %v2324_v31 = vmul.f32 %v3420_v51, %v3420_v51 }
 0x1cd   : > { %v1523_v56 = vpop.f32.mrf.mxu0  ;;  %v1812_v57 = vpop.f32.mrf.mxu1 }
 0x1ce   : > { %v3430_v61 = vadd.f32 %v1812_v57, %v1523_v56  ;;  %v2381_v56 = vadd.f32 %v2380_v50, %v2318_v43  ;;  %v2320_v57 = vmul.f32 %v3404_v25, %v3404_v25  ;;  %v2251_v25 = vadd.f32 %v2250_v20, %v3412_v38 }
 0x1cf   : > { %v1525_v62 = vpop.f32.mrf.mxu0  ;;  %v1814_v63 = vpop.f32.mrf.mxu1 }
 0x1d0   : > { %1927 = vst [vmem:[%s3288_s22 + $0x180] sm:$0xff] %v3430_v61  ;;  %v2382_v63 = vadd.f32 %v2381_v56, %v2319_v52 }
 0x1d1   : > { %v1526_v4 = vpop.f32.mrf.mxu0  ;;  %v1815_v6 = vpop.f32.mrf.mxu1 }
 0x1d2   : > { %v3441_v8 = vadd.f32 %v1815_v6, %v1526_v4  ;;  %v2383_v4 = vadd.f32 %v2382_v63, %v2320_v57  ;;  %v2322_v6 = vmul.f32 %v3412_v38, %v3412_v38  ;;  %v2325_v38 = vmul.f32 %v3430_v61, %v3430_v61 }
 0x1d3   : > { %v1528_v9 = vpop.f32.mrf.mxu0  ;;  %v1817_v11 = vpop.f32.mrf.mxu1 }
 0x1d4   : > { %1928 = vst [vmem:[%s3288_s22 + $0x188] sm:$0xff] %v3441_v8  ;;  %v2384_v9 = vadd.f32 %v2383_v4, %v2321_v1  ;;  %v2323_v11 = vmul.f32 %v3416_v45, %v3416_v45 }
 0x1d5   : > { %v1531_v13 = vpop.f32.mrf.mxu0  ;;  %v1820_v14 = vpop.f32.mrf.mxu1 }
 0x1d6   : > { %v3451_v18 = vadd.f32 %v1820_v14, %v1531_v13  ;;  %v2385_v12 = vadd.f32 %v2384_v9, %v2322_v6  ;;  %v2252_v13 = vadd.f32 %v2251_v25, %v3416_v45  ;;  %v2326_v45 = vmul.f32 %v3441_v8, %v3441_v8 }
 0x1d7   : > { %v1533_v19 = vpop.f32.mrf.mxu0  ;;  %v1822_v21 = vpop.f32.mrf.mxu1 }
 0x1d8   : > { %1929 = vst [vmem:[%s3288_s22 + $0x190] sm:$0xff] %v3451_v18  ;;  %v2386_v17 = vadd.f32 %v2385_v12, %v2323_v11  ;;  %v2253_v19 = vadd.f32 %v2252_v13, %v3420_v51  ;;  %v2327_v51 = vmul.f32 %v3451_v18, %v3451_v18 }
 0x1d9   : > { %v1534_v24 = vpop.f32.mrf.mxu0  ;;  %v1823_v26 = vpop.f32.mrf.mxu1 }
 0x1da   : > { %v3461_v30 = vadd.f32 %v1823_v26, %v1534_v24  ;;  %v2387_v49 = vadd.f32 %v2386_v17, %v2324_v31  ;;  %v2254_v23 = vadd.f32 %v2253_v19, %v3430_v61 }
 0x1db   : > { %v1536_v34 = vpop.f32.mrf.mxu0  ;;  %v1825_v35 = vpop.f32.mrf.mxu1 }
 0x1dc   : > { %1930 = vst [vmem:[%s3288_s22 + $0x198] sm:$0xff] %v3461_v30  ;;  %v2388_v54 = vadd.f32 %v2387_v49, %v2325_v38  ;;  %v2255_v29 = vadd.f32 %v2254_v23, %v3441_v8  ;;  %v2328_v61 = vmul.f32 %v3461_v30, %v3461_v30 }
 0x1dd   : > { %v1539_v40 = vpop.f32.mrf.mxu0  ;;  %v1828_v41 = vpop.f32.mrf.mxu1 }
 0x1de   : > { %v3471_v46 = vadd.f32 %v1828_v41, %v1539_v40  ;;  %v2389_v36 = vadd.f32 %v2388_v54, %v2326_v45  ;;  %v2256_v59 = vadd.f32 %v2255_v29, %v3451_v18 }
 0x1df   : > { %v1541_v47 = vpop.f32.mrf.mxu0  ;;  %v1830_v48 = vpop.f32.mrf.mxu1 }
 0x1e0   : > { %1931 = vst [vmem:[%s3288_s22 + $0x1a0] sm:$0xff] %v3471_v46  ;;  %v2390_v42 = vadd.f32 %v2389_v36, %v2327_v51  ;;  %v2257_v0 = vadd.f32 %v2256_v59, %v3461_v30  ;;  %v2329_v8 = vmul.f32 %v3471_v46, %v3471_v46 }
 0x1e1   : > { %v1542_v53 = vpop.f32.mrf.mxu0  ;;  %v1831_v55 = vpop.f32.mrf.mxu1 }
 0x1e2   : > { %v3481_v58 = vadd.f32 %v1831_v55, %v1542_v53  ;;  %v2391_v48 = vadd.f32 %v2390_v42, %v2328_v61  ;;  %v2258_v50 = vadd.f32 %v2257_v0, %v3471_v46 }
 0x1e3   : > { %v1544_v60 = vpop.f32.mrf.mxu0  ;;  %v1833_v62 = vpop.f32.mrf.mxu1 }
 0x1e4   : > { %1932 = vst [vmem:[%s3288_s22 + $0x1a8] sm:$0xff] %v3481_v58  ;;  %v2330_v18 = vmul.f32 %v3481_v58, %v3481_v58  ;;  %v2392_v55 = vadd.f32 %v2391_v48, %v2329_v8  ;;  %v2259_v56 = vadd.f32 %v2258_v50, %v3481_v58 }
 0x1e5   : > { %v1547_v2 = vpop.f32.mrf.mxu0  ;;  %v1836_v3 = vpop.f32.mrf.mxu1 }
 0x1e6   : > { %v1837_v28 = vadd.f32 %v1836_v3, %v1547_v2  ;;  %v2393_v60 = vadd.f32 %v2392_v55, %v2330_v18 }
 0x1e7   : > { %v1549_v33 = vpop.f32.mrf.mxu0  ;;  %v1838_v7 = vpop.f32.mrf.mxu1 }
 0x1e8   : > { %1933 = vst [vmem:[%s3288_s22 + $0x1b0] sm:$0xff] %v1837_v28  ;;  %v2331_v30 = vmul.f32 %v1837_v28, %v1837_v28  ;;  %v2260_v62 = vadd.f32 %v2259_v56, %v1837_v28 }
 0x1e9   : > { %v1550_v32 = vpop.f32.mrf.mxu0  ;;  %v1839_v39 = vpop.f32.mrf.mxu1 }
 0x1ea   : > { %v1840_v14 = vadd.f32 %v1839_v39, %v1550_v32  ;;  %v2394_v2 = vadd.f32 %v2393_v60, %v2331_v30 }
 0x1eb   : > { %v1552_v16 = vpop.f32.mrf.mxu0  ;;  %v1841_v44 = vpop.f32.mrf.mxu1 }
 0x1ec   : > { %1934 = vst [vmem:[%s3288_s22 + $0x1b8] sm:$0xff] %v1840_v14  ;;  %v2332_v63 = vmul.f32 %v1840_v14, %v1840_v14  ;;  %v2261_v3 = vadd.f32 %v2260_v62, %v1840_v14 }
 0x1ed   : > { %v1555_v21 = vpop.f32.mrf.mxu0  ;;  %v1844_v22 = vpop.f32.mrf.mxu1 }
 0x1ee   : > { %v1845_v24 = vadd.f32 %v1844_v22, %v1555_v21  ;;  %v2395_v33 = vadd.f32 %v2394_v2, %v2332_v63 }
 0x1ef   : > { %v1557_v26 = vpop.f32.mrf.mxu0  ;;  %v1846_v27 = vpop.f32.mrf.mxu1 }
 0x1f0   : > { %1935 = vst [vmem:[%s3288_s22 + $0x1c0] sm:$0xff] %v1845_v24  ;;  %v2333_v4 = vmul.f32 %v1845_v24, %v1845_v24  ;;  %v2262_v7 = vadd.f32 %v2261_v3, %v1845_v24 }
 0x1f1   : > { %v1558_v34 = vpop.f32.mrf.mxu0  ;;  %v1847_v35 = vpop.f32.mrf.mxu1 }
 0x1f2   : > { %v1848_v37 = vadd.f32 %v1847_v35, %v1558_v34  ;;  %v2396_v32 = vadd.f32 %v2395_v33, %v2333_v4 }
 0x1f3   : > { %v1560_v40 = vpop.f32.mrf.mxu0  ;;  %v1849_v41 = vpop.f32.mrf.mxu1 }
 0x1f4   : > { %1936 = vst [vmem:[%s3288_s22 + $0x1c8] sm:$0xff] %v1848_v37  ;;  %v2334_v58 = vmul.f32 %v1848_v37, %v1848_v37  ;;  %v2263_v28 = vadd.f32 %v2262_v7, %v1848_v37 }
 0x1f5   : > { %v1563_v43 = vpop.f32.mrf.mxu0  ;;  %v1852_v47 = vpop.f32.mrf.mxu1 }
 0x1f6   : > { %v1853_v5 = vadd.f32 %v1852_v47, %v1563_v43  ;;  %v2397_v31 = vadd.f32 %v2396_v32, %v2334_v58 }
 0x1f7   : > { %v1565_v52 = vpop.f32.mrf.mxu0  ;;  %v1854_v53 = vpop.f32.mrf.mxu1 }
 0x1f8   : > { %1937 = vst [vmem:[%s3288_s22 + $0x1d0] sm:$0xff] %v1853_v5  ;;  %v2335_v39 = vmul.f32 %v1853_v5, %v1853_v5  ;;  %v2264_v16 = vadd.f32 %v2263_v28, %v1853_v5 }
 0x1f9   : > { %v1566_v10 = vpop.f32.mrf.mxu0  ;;  %v1855_v57 = vpop.f32.mrf.mxu1 }
 0x1fa   : > { %v1856_v15 = vadd.f32 %v1855_v57, %v1566_v10  ;;  %v2398_v38 = vadd.f32 %v2397_v31, %v2335_v39 }
 0x1fb   : > { %v1568_v1 = vpop.f32.mrf.mxu0  ;;  %v1857_v46 = vpop.f32.mrf.mxu1 }
 0x1fc   : > { %1938 = vst [vmem:[%s3288_s22 + $0x1d8] sm:$0xff] %v1856_v15  ;;  %v2336_v14 = vmul.f32 %v1856_v15, %v1856_v15  ;;  %v2265_v21 = vadd.f32 %v2264_v16, %v1856_v15 }
 0x1fd   : > { %v1571_v20 = vpop.f32.mrf.mxu0  ;;  %v1860_v6 = vpop.f32.mrf.mxu1 }
 0x1fe   : > { %v1861_v9 = vadd.f32 %v1860_v6, %v1571_v20  ;;  %v2399_v45 = vadd.f32 %v2398_v38, %v2336_v14 }
 0x1ff   : > { %v1573_v25 = vpop.f32.mrf.mxu0  ;;  %v1862_v11 = vpop.f32.mrf.mxu1 }
 0x200   : > { %1939 = vst [vmem:[%s3288_s22 + $0x1e0] sm:$0xff] %v1861_v9  ;;  %v2337_v22 = vmul.f32 %v1861_v9, %v1861_v9  ;;  %v2266_v24 = vadd.f32 %v2265_v21, %v1861_v9 }
 0x201   : > { %v1574_v12 = vpop.f32.mrf.mxu0  ;;  %v1863_v13 = vpop.f32.mrf.mxu1 }
 0x202   : > { %v1864_v44 = vadd.f32 %v1863_v13, %v1574_v12  ;;  %v2400_v51 = vadd.f32 %v2399_v45, %v2337_v22 }
 0x203   : > { %v1576_v17 = vpop.f32.mrf.mxu0  ;;  %v1865_v19 = vpop.f32.mrf.mxu1 }
 0x204   : > { %1940 = vst [vmem:[%s3288_s22 + $0x1e8] sm:$0xff] %v1864_v44  ;;  %v2338_v26 = vmul.f32 %v1864_v44, %v1864_v44  ;;  %v2267_v34 = vadd.f32 %v2266_v24, %v1864_v44 }
 0x205   : > { %v1579_v49 = vpop.f32.mrf.mxu0  ;;  %v1868_v23 = vpop.f32.mrf.mxu1 }
 0x206   : > { %v1869_v27 = vadd.f32 %v1868_v23, %v1579_v49  ;;  %v2401_v61 = vadd.f32 %v2400_v51, %v2338_v26 }
 0x207   : > { %v1581_v54 = vpop.f32.mrf.mxu0  ;;  %v1870_v29 = vpop.f32.mrf.mxu1 }
 0x208   : > { %1941 = vst [vmem:[%s3288_s22 + $0x1f0] sm:$0xff] %v1869_v27  ;;  %v2339_v35 = vmul.f32 %v1869_v27, %v1869_v27  ;;  %v2268_v37 = vadd.f32 %v2267_v34, %v1869_v27 }
 0x209   : > { %v1582_v36 = vpop.f32.mrf.mxu0  ;;  %v1871_v59 = vpop.f32.mrf.mxu1 }
 0x20a   : > { %v1872_v40 = vadd.f32 %v1871_v59, %v1582_v36  ;;  %v2402_v0 = vadd.f32 %v2401_v61, %v2339_v35 }
 0x20b   : > { %v1584_v41 = vpop.f32.mrf.mxu0  ;;  %v1873_v42 = vpop.f32.mrf.mxu1 }
 0x20c   : > { %1942 = vst [vmem:[%s3288_s22 + $0x1f8] sm:$0xff] %v1872_v40  ;;  %v2269_v8 = vadd.f32 %v2268_v37, %v1872_v40  ;;  %v2340_v43 = vmul.f32 %v1872_v40, %v1872_v40 }
 0x20e   : > { %v2270_v47 = vrot.slane %v2269_v8, 4  ;;  %v2403_v48 = vadd.f32 %v2402_v0, %v2340_v43 }
 0x210   : > { %v2271_v50 = vadd.f32 %v2270_v47, %v2269_v8  ;;  %v2404_v18 = vrot.slane %v2403_v48, 4 }
 0x212   : > { %v2272_v5 = vrot.slane %v2271_v50, 2  ;;  %v2405_v52 = vadd.f32 %v2404_v18, %v2403_v48 }
 0x214   : > { %v2273_v53 = vadd.f32 %v2272_v5, %v2271_v50  ;;  %v2406_v55 = vrot.slane %v2405_v52, 2 }
 0x216   : > { %v2274_v56 = vrot.slane %v2273_v53, 1  ;;  %v2407_v30 = vadd.f32 %v2406_v55, %v2405_v52 }
 0x218   : > { %v2275_v10 = vadd.f32 %v2274_v56, %v2273_v53  ;;  %v2408_v57 = vrot.slane %v2407_v30, 1 }
 0x21a   : > { %2276 = vst [vmem:[%s3359_s24] sm:$0x1] %v2275_v10  ;;  %v2409_v60 = vadd.f32 %v2408_v57, %v2407_v30 }
 0x21c   : > { %2410 = vst [vmem:[%s3359_s24 + $0x1] sm:$0x1] %v2409_v60 }
 0x21d PF: > { %s14_s14 = sadd.s32 1, %s3001_s14   ;;  %s3541_s12 = smov %s2997_s13 }
 0x21e   : > { %p11_p6 = scmp.ge.s32.totalorder %s14_s14, 4   ;;  %s3542_s13 = smov %s3544_s15 }
 0x220   :  { %13 = sbr.rel (!%p11_p6) target bundleno = 2 (0x2), region = 85 }

</bundles_post_ra>
